<compile_context>
chip_gen: v6e
topology: v6e:2x2x1
jax: 0.10.0
libtpu: 0.0.40
codegen_flags: <defaults>
</compile_context>

<pallas_src>
import jax
import jax.numpy as jnp
import numpy as np
from jax import lax
from jax.experimental import pallas as pl
from jax.experimental.pallas import tpu as pltpu

KERNEL_SIZE = 31
STRIDE = 2
KE = (KERNEL_SIZE + 1) // 2          # 16 even-position taps
KO = KERNEL_SIZE // 2                # 15 odd-position taps
CIN_ALIGN = 16                       # bf16 sublane tile -> aligned slab stores


def _round_up(n, m):
    return (n + m - 1) // m * m


# ----------------------------------------------------------------------------
# Pallas kernels
# ----------------------------------------------------------------------------
def _enc_conv_prelu_kernel(xe_ref, xo_ref, w_ref, b_ref, a_ref, o_ref, slab_ref):
    """Stride-2 Conv1d + bias + PReLU as a single MXU dot.

    xe_ref : (1, Cin_p, T + KE - 1)  bf16  even phase of reflect-padded input
    xo_ref : (1, Cin_p, T + KE - 1)  bf16  odd phase
    w_ref  : (Cout, K * Cin_p)       bf16  taps folded into the contraction dim
    b_ref  : (Cout, 1)               f32
    a_ref  : (1,)                    f32   PReLU alpha (SMEM)
    o_ref  : (1, Cout, T)            bf16
    slab   : (K * Cin_p, T)          bf16  im2col scratch
    """
    T = o_ref.shape[-1]
    cin = xe_ref.shape[1]
    xe = xe_ref[0]
    xo = xo_ref[0]
    # Build the im2col slab: tap-major, channel-minor rows (aligned stores,
    # cin is a multiple of 16).
    for m in range(KE):
        slab_ref[m * cin:(m + 1) * cin, :] = xe[:, m:m + T]
    for m in range(KO):
        slab_ref[(KE + m) * cin:(KE + m + 1) * cin, :] = xo[:, m:m + T]
    acc = jnp.dot(w_ref[...], slab_ref[...], preferred_element_type=jnp.float32)
    acc = acc + b_ref[...]
    alpha = a_ref[0]
    acc = jnp.where(acc > 0, acc, alpha * acc)
    o_ref[0] = acc.astype(o_ref.dtype)


def _dec_convt_prelu_kernel(xq_ref, w_ref, b_ref, a_ref, o_ref, slab_ref):
    """Polyphase ConvTranspose1d(stride=2) + bias + PReLU as a single MXU dot.

    xq_ref : (1, Cin_p, Lin + KE - 1)  bf16  zero-padded (7 left, 8 right) input
    w_ref  : (2*Cout, KE * Cin_p)      bf16  [even-output-phase ; odd-output-phase]
    b_ref  : (2*Cout, 1)               f32
    a_ref  : (1,)                      f32   PReLU alpha (SMEM)
    o_ref  : (1, 2*Cout, Lin)          bf16  rows [:Cout]=even t, [Cout:]=odd t
    slab   : (KE * Cin_p, Lin)         bf16
    """
    lin = o_ref.shape[-1]
    cin = xq_ref.shape[1]
    xq = xq_ref[0]
    for m in range(KE):
        slab_ref[m * cin:(m + 1) * cin, :] = xq[:, m:m + lin]
    acc = jnp.dot(w_ref[...], slab_ref[...], preferred_element_type=jnp.float32)
    acc = acc + b_ref[...]
    alpha = a_ref[0]
    acc = jnp.where(acc > 0, acc, alpha * acc)
    o_ref[0] = acc.astype(o_ref.dtype)


# ----------------------------------------------------------------------------
# Wrappers (glue: padding / phase split / weight packing)
# ----------------------------------------------------------------------------
def conv1d_s2_reflect_prelu(x, w, b, alpha):
    """x: (B, Cin, L); w: (Cout, Cin, K) [PyTorch Conv1d layout]; b: (Cout,)."""
    B, Cin, L = x.shape
    Cout, _, K = w.shape
    assert K == KERNEL_SIZE
    pad = K // 2
    assert L % STRIDE == 0 and L > pad
    T = L // STRIDE
    cin_p = _round_up(Cin, CIN_ALIGN)

    xp = jnp.pad(x, ((0, 0), (0, 0), (pad, pad)), mode="reflect")
    xe = xp[:, :, 0::2]                         # (B, Cin, T + 15) even phase
    xo = xp[:, :, 1::2]                         # (B, Cin, T + 15) odd phase
    if cin_p != Cin:
        cpad = ((0, 0), (0, cin_p - Cin), (0, 0))
        xe = jnp.pad(xe, cpad)
        xo = jnp.pad(xo, cpad)
    xe = xe.astype(jnp.bfloat16)
    xo = xo.astype(jnp.bfloat16)
    Le = xe.shape[-1]                           # T + KE - 1

    # Weight: taps folded into contraction dim, same (tap-major, cin-minor)
    # ordering as the im2col slab: even kernel positions first, then odd.
    wt = jnp.transpose(w, (2, 0, 1))                       # (K, Cout, Cin)
    wcat = jnp.concatenate([wt[0::2], wt[1::2]], axis=0)   # (K, Cout, Cin)
    if cin_p != Cin:
        wcat = jnp.pad(wcat, ((0, 0), (0, 0), (0, cin_p - Cin)))
    w_flat = jnp.transpose(wcat, (1, 0, 2)).reshape(Cout, K * cin_p)
    w_flat = w_flat.astype(jnp.bfloat16)
    b2 = b.reshape(Cout, 1).astype(jnp.float32)
    a1 = jnp.full((1,), alpha, jnp.float32)

    return pl.pallas_call(
        _enc_conv_prelu_kernel,
        out_shape=jax.ShapeDtypeStruct((B, Cout, T), jnp.bfloat16),
        grid=(B,),
        in_specs=[
            pl.BlockSpec((1, cin_p, Le), lambda bi: (bi, 0, 0)),
            pl.BlockSpec((1, cin_p, Le), lambda bi: (bi, 0, 0)),
            pl.BlockSpec((Cout, K * cin_p), lambda bi: (0, 0)),
            pl.BlockSpec((Cout, 1), lambda bi: (0, 0)),
            pl.BlockSpec(memory_space=pltpu.MemorySpace.SMEM),
        ],
        out_specs=pl.BlockSpec((1, Cout, T), lambda bi: (bi, 0, 0)),
        scratch_shapes=[pltpu.VMEM((K * cin_p, T), jnp.bfloat16)],
        compiler_params=pltpu.CompilerParams(
            dimension_semantics=("parallel",),
            vmem_limit_bytes=48 * 1024 * 1024),
    )(xe, xo, w_flat, b2, a1)


def convtranspose1d_s2_prelu(x, w, b, alpha):
    """x: (B, Cin, Lin); w: (Cin, Cout, K) [PyTorch ConvTranspose1d layout]."""
    B, Cin, Lin = x.shape
    _, Cout, K = w.shape
    assert K == KERNEL_SIZE
    T = STRIDE * Lin                 # == (Lin-1)*2 - 2*(K//2) + K + (STRIDE-1)
    cin_p = _round_up(Cin, CIN_ALIGN)

    # Polyphase identity (wf[k] = flipped/transposed deconv kernel):
    #   out[2u]   = sum_{m<KO} wf[2m+1] . x[u + m - 7]
    #   out[2u+1] = sum_{m<KE} wf[2m]   . x[u + m - 7]
    # so pad x with 7 zeros left / 8 zeros right -> xq[j] = x[j - 7].
    xq = jnp.pad(x, ((0, 0), (0, 0), (KO // 2, KE // 2)))   # (B, Cin, Lin+15)
    if cin_p != Cin:
        xq = jnp.pad(xq, ((0, 0), (0, cin_p - Cin), (0, 0)))
    xq = xq.astype(jnp.bfloat16)
    Lq = xq.shape[-1]                # Lin + KE - 1

    wt = jnp.transpose(w, (2, 1, 0))                 # (K, Cout, Cin), wt[k]=w[:,:,k]^T
    w_odd_t = jnp.flip(wt[0::2], axis=0)             # (KE,...) taps for odd-t outputs
    w_even_t = jnp.concatenate(                      # (KE,...) taps for even-t outputs
        [jnp.flip(wt[1::2], axis=0),
         jnp.zeros((1, Cout, Cin), wt.dtype)], axis=0)
    wks = jnp.concatenate([w_even_t, w_odd_t], axis=1)      # (KE, 2*Cout, Cin)
    if cin_p != Cin:
        wks = jnp.pad(wks, ((0, 0), (0, 0), (0, cin_p - Cin)))
    w_flat = jnp.transpose(wks, (1, 0, 2)).reshape(2 * Cout, KE * cin_p)
    w_flat = w_flat.astype(jnp.bfloat16)
    b2 = jnp.concatenate([b, b], axis=0).reshape(2 * Cout, 1).astype(jnp.float32)
    a1 = jnp.full((1,), alpha, jnp.float32)

    res = pl.pallas_call(
        _dec_convt_prelu_kernel,
        out_shape=jax.ShapeDtypeStruct((B, 2 * Cout, Lin), jnp.bfloat16),
        grid=(B,),
        in_specs=[
            pl.BlockSpec((1, cin_p, Lq), lambda bi: (bi, 0, 0)),
            pl.BlockSpec((2 * Cout, KE * cin_p), lambda bi: (0, 0)),
            pl.BlockSpec((2 * Cout, 1), lambda bi: (0, 0)),
            pl.BlockSpec(memory_space=pltpu.MemorySpace.SMEM),
        ],
        out_specs=pl.BlockSpec((1, 2 * Cout, Lin), lambda bi: (bi, 0, 0)),
        scratch_shapes=[pltpu.VMEM((KE * cin_p, Lin), jnp.bfloat16)],
        compiler_params=pltpu.CompilerParams(
            dimension_semantics=("parallel",),
            vmem_limit_bytes=48 * 1024 * 1024),
    )(xq, w_flat, b2, a1)

    # Interleave phases: out[..., 2u] = res[:, :Cout], out[..., 2u+1] = res[:, Cout:]
    return jnp.stack([res[:, :Cout], res[:, Cout:]], axis=-1).reshape(B, Cout, T)


# ----------------------------------------------------------------------------
# Generator (parameters + forward)
# ----------------------------------------------------------------------------
def init_generator_params(key, input_channels, latent_dim, enc_channels,
                          dec_channels, K):
    params = {"enc": [], "dec": []}
    in_c = input_channels
    for out_c in enc_channels:
        key, k1, k2 = jax.random.split(key, 3)
        scale = 1.0 / np.sqrt(in_c * K)
        w = jax.random.normal(k1, (out_c, in_c, K), jnp.float32) * scale
        b = jax.random.normal(k2, (out_c,), jnp.float32) * scale
        params["enc"].append((w, b, 0.25))        # nn.PReLU() default alpha
        in_c = out_c
    for i, out_c in enumerate(dec_channels):
        if i == 0:
            in_c = enc_channels[-1] + latent_dim
        else:
            in_c = dec_channels[i - 1] + enc_channels[-(i + 1)]
        key, k1, k2 = jax.random.split(key, 3)
        scale = 1.0 / np.sqrt(in_c * K)
        w = jax.random.normal(k1, (in_c, out_c, K), jnp.float32) * scale
        b = jax.random.normal(k2, (out_c,), jnp.float32) * scale
        params["dec"].append((w, b, 0.25))
    return params


def generator_forward(params, x, z):
    skips = []
    h = x
    for (w, b, a) in params["enc"]:
        h = conv1d_s2_reflect_prelu(h, w, b, a)
        skips.append(h)
    h = jnp.concatenate([h, z.astype(h.dtype)], axis=1)
    for i, (w, b, a) in enumerate(params["dec"]):
        h = convtranspose1d_s2_prelu(h, w, b, a)
        if i < len(skips) - 1:
            h = jnp.concatenate([h, skips[-(i + 2)]], axis=1)
    return h.astype(jnp.float32)


# Pure-JAX f32 reference (for correctness check)
def _prelu(x, a):
    return jnp.where(x > 0, x, a * x)


def generator_reference(params, x, z):
    skips = []
    h = x
    for (w, b, a) in params["enc"]:
        K = w.shape[-1]
        pad = K // 2
        hp = jnp.pad(h, ((0, 0), (0, 0), (pad, pad)), mode="reflect")
        h = lax.conv_general_dilated(
            hp, w, window_strides=(STRIDE,), padding="VALID",
            dimension_numbers=("NCH", "OIH", "NCH"),
            precision=lax.Precision.HIGHEST)
        h = _prelu(h + b[None, :, None], a)
        skips.append(h)
    h = jnp.concatenate([h, z], axis=1)
    for i, (w, b, a) in enumerate(params["dec"]):
        K = w.shape[-1]
        pad = K // 2
        w_oih = jnp.transpose(jnp.flip(w, axis=2), (1, 0, 2))  # (Cout, Cin, K)
        h = lax.conv_general_dilated(
            h, w_oih, window_strides=(1,),
            padding=[(K - 1 - pad, K - 1 - pad + STRIDE - 1)],
            lhs_dilation=(STRIDE,),
            dimension_numbers=("NCH", "OIH", "NCH"),
            precision=lax.Precision.HIGHEST)
        h = _prelu(h + b[None, :, None], a)
        if i < len(skips) - 1:
            h = jnp.concatenate([h, skips[-(i + 2)]], axis=1)
    return h


if __name__ == "__main__":
    # Small, module-consistent shapes.
    B = 2
    L = 256
    input_channels = 1
    latent_dim = 32
    enc_channels = [8, 16, 32]
    dec_channels = [16, 8, 1]
    K = KERNEL_SIZE

    key = jax.random.PRNGKey(0)
    kx, kz, kp = jax.random.split(key, 3)
    x = jax.random.normal(kx, (B, input_channels, L), jnp.float32)
    z = jax.random.normal(
        kz, (B, latent_dim, L // (STRIDE ** len(enc_channels))), jnp.float32)
    params = init_generator_params(kp, input_channels, latent_dim,
                                   enc_channels, dec_channels, K)

    fwd = jax.jit(generator_forward)
    out = jax.block_until_ready(fwd(params, x, z))
    ref = jax.block_until_ready(generator_reference(params, x, z))

    assert out.shape == (B, dec_channels[-1], L), out.shape
    # bf16 MXU operands in the Pallas path vs f32 (HIGHEST-precision) reference.
    np.testing.assert_allclose(np.asarray(out), np.asarray(ref),
                               rtol=5e-2, atol=5e-2)
    print("KERNEL_OK")
</pallas_src>

<mosaic_0001>
module attributes {stable_mosaic.version = 11 : i64} {
  func.func @_enc_conv_prelu_kernel(%arg0: i32, %arg1: memref<1x16x143xbf16, #tpu.memory_space<vmem>>, %arg2: memref<1x16x143xbf16, #tpu.memory_space<vmem>>, %arg3: memref<8x496xbf16, #tpu.memory_space<vmem>>, %arg4: memref<8x1xf32, #tpu.memory_space<vmem>>, %arg5: memref<1xf32, #tpu.memory_space<smem>>, %arg6: memref<1x8x128xbf16, #tpu.memory_space<vmem>>, %arg7: memref<496x128xbf16, #tpu.memory_space<vmem>>) attributes {dimension_semantics = [#tpu.dimension_semantics<parallel>], iteration_bounds = array<i64: 2>, scalar_prefetch = 0 : i64, scratch_operands = 1 : i64, tpu.core_type = #tpu.core_type<tc>, window_params = [{transform_indices = @transform_0, window_bounds = array<i64: 1, 16, 143>}, {transform_indices = @transform_1, window_bounds = array<i64: 1, 16, 143>}, {pipeline_mode = #tpu.pipeline_mode<synchronous>, transform_indices = @transform_2, window_bounds = array<i64: 8, 496>}, {pipeline_mode = #tpu.pipeline_mode<synchronous>, transform_indices = @transform_3, window_bounds = array<i64: 8, 1>}, {transform_indices = @transform_4, window_bounds = array<i64: 1>}, {transform_indices = @transform_5, window_bounds = array<i64: 1, 8, 128>}]} {
    %c0 = arith.constant 0 : index
    %c0_0 = arith.constant 0 : index
    %c0_1 = arith.constant 0 : index
    %0 = vector.load %arg1[%c0, %c0_0, %c0_1] : memref<1x16x143xbf16, #tpu.memory_space<vmem>>, vector<1x16x143xbf16>
    %1 = vector.shape_cast %0 : vector<1x16x143xbf16> to vector<16x143xbf16>
    %c0_2 = arith.constant 0 : index
    %c0_3 = arith.constant 0 : index
    %c0_4 = arith.constant 0 : index
    %2 = vector.load %arg2[%c0_2, %c0_3, %c0_4] : memref<1x16x143xbf16, #tpu.memory_space<vmem>>, vector<1x16x143xbf16>
    %3 = vector.shape_cast %2 : vector<1x16x143xbf16> to vector<16x143xbf16>
    %4 = vector.extract_strided_slice %1 {offsets = [0, 0], sizes = [16, 128], strides = [1, 1]} : vector<16x143xbf16> to vector<16x128xbf16>
    %c0_5 = arith.constant 0 : index
    %c0_6 = arith.constant 0 : index
    %5 = vector.load %arg7[%c0_5, %c0_6] : memref<496x128xbf16, #tpu.memory_space<vmem>>, vector<16x128xbf16>
    tpu.vector_store %arg7[%c0_5, %c0_6], %4 {strides = array<i32>} : memref<496x128xbf16, #tpu.memory_space<vmem>>, vector<16x128xbf16>,
    %6 = vector.extract_strided_slice %1 {offsets = [0, 1], sizes = [16, 128], strides = [1, 1]} : vector<16x143xbf16> to vector<16x128xbf16>
    %c16 = arith.constant 16 : index
    %c0_7 = arith.constant 0 : index
    %7 = vector.load %arg7[%c16, %c0_7] : memref<496x128xbf16, #tpu.memory_space<vmem>>, vector<16x128xbf16>
    tpu.vector_store %arg7[%c16, %c0_7], %6 {strides = array<i32>} : memref<496x128xbf16, #tpu.memory_space<vmem>>, vector<16x128xbf16>,
    %8 = vector.extract_strided_slice %1 {offsets = [0, 2], sizes = [16, 128], strides = [1, 1]} : vector<16x143xbf16> to vector<16x128xbf16>
    %c32 = arith.constant 32 : index
    %c0_8 = arith.constant 0 : index
    %9 = vector.load %arg7[%c32, %c0_8] : memref<496x128xbf16, #tpu.memory_space<vmem>>, vector<16x128xbf16>
    tpu.vector_store %arg7[%c32, %c0_8], %8 {strides = array<i32>} : memref<496x128xbf16, #tpu.memory_space<vmem>>, vector<16x128xbf16>,
    %10 = vector.extract_strided_slice %1 {offsets = [0, 3], sizes = [16, 128], strides = [1, 1]} : vector<16x143xbf16> to vector<16x128xbf16>
    %c48 = arith.constant 48 : index
    %c0_9 = arith.constant 0 : index
    %11 = vector.load %arg7[%c48, %c0_9] : memref<496x128xbf16, #tpu.memory_space<vmem>>, vector<16x128xbf16>
    tpu.vector_store %arg7[%c48, %c0_9], %10 {strides = array<i32>} : memref<496x128xbf16, #tpu.memory_space<vmem>>, vector<16x128xbf16>,
    %12 = vector.extract_strided_slice %1 {offsets = [0, 4], sizes = [16, 128], strides = [1, 1]} : vector<16x143xbf16> to vector<16x128xbf16>
    %c64 = arith.constant 64 : index
    %c0_10 = arith.constant 0 : index
    %13 = vector.load %arg7[%c64, %c0_10] : memref<496x128xbf16, #tpu.memory_space<vmem>>, vector<16x128xbf16>
    tpu.vector_store %arg7[%c64, %c0_10], %12 {strides = array<i32>} : memref<496x128xbf16, #tpu.memory_space<vmem>>, vector<16x128xbf16>,
    %14 = vector.extract_strided_slice %1 {offsets = [0, 5], sizes = [16, 128], strides = [1, 1]} : vector<16x143xbf16> to vector<16x128xbf16>
    %c80 = arith.constant 80 : index
    %c0_11 = arith.constant 0 : index
    %15 = vector.load %arg7[%c80, %c0_11] : memref<496x128xbf16, #tpu.memory_space<vmem>>, vector<16x128xbf16>
    tpu.vector_store %arg7[%c80, %c0_11], %14 {strides = array<i32>} : memref<496x128xbf16, #tpu.memory_space<vmem>>, vector<16x128xbf16>,
    %16 = vector.extract_strided_slice %1 {offsets = [0, 6], sizes = [16, 128], strides = [1, 1]} : vector<16x143xbf16> to vector<16x128xbf16>
    %c96 = arith.constant 96 : index
    %c0_12 = arith.constant 0 : index
    %17 = vector.load %arg7[%c96, %c0_12] : memref<496x128xbf16, #tpu.memory_space<vmem>>, vector<16x128xbf16>
    tpu.vector_store %arg7[%c96, %c0_12], %16 {strides = array<i32>} : memref<496x128xbf16, #tpu.memory_space<vmem>>, vector<16x128xbf16>,
    %18 = vector.extract_strided_slice %1 {offsets = [0, 7], sizes = [16, 128], strides = [1, 1]} : vector<16x143xbf16> to vector<16x128xbf16>
    %c112 = arith.constant 112 : index
    %c0_13 = arith.constant 0 : index
    %19 = vector.load %arg7[%c112, %c0_13] : memref<496x128xbf16, #tpu.memory_space<vmem>>, vector<16x128xbf16>
    tpu.vector_store %arg7[%c112, %c0_13], %18 {strides = array<i32>} : memref<496x128xbf16, #tpu.memory_space<vmem>>, vector<16x128xbf16>,
    %20 = vector.extract_strided_slice %1 {offsets = [0, 8], sizes = [16, 128], strides = [1, 1]} : vector<16x143xbf16> to vector<16x128xbf16>
    %c128 = arith.constant 128 : index
    %c0_14 = arith.constant 0 : index
    %21 = vector.load %arg7[%c128, %c0_14] : memref<496x128xbf16, #tpu.memory_space<vmem>>, vector<16x128xbf16>
    tpu.vector_store %arg7[%c128, %c0_14], %20 {strides = array<i32>} : memref<496x128xbf16, #tpu.memory_space<vmem>>, vector<16x128xbf16>,
    %22 = vector.extract_strided_slice %1 {offsets = [0, 9], sizes = [16, 128], strides = [1, 1]} : vector<16x143xbf16> to vector<16x128xbf16>
    %c144 = arith.constant 144 : index
    %c0_15 = arith.constant 0 : index
    %23 = vector.load %arg7[%c144, %c0_15] : memref<496x128xbf16, #tpu.memory_space<vmem>>, vector<16x128xbf16>
    tpu.vector_store %arg7[%c144, %c0_15], %22 {strides = array<i32>} : memref<496x128xbf16, #tpu.memory_space<vmem>>, vector<16x128xbf16>,
    %24 = vector.extract_strided_slice %1 {offsets = [0, 10], sizes = [16, 128], strides = [1, 1]} : vector<16x143xbf16> to vector<16x128xbf16>
    %c160 = arith.constant 160 : index
    %c0_16 = arith.constant 0 : index
    %25 = vector.load %arg7[%c160, %c0_16] : memref<496x128xbf16, #tpu.memory_space<vmem>>, vector<16x128xbf16>
    tpu.vector_store %arg7[%c160, %c0_16], %24 {strides = array<i32>} : memref<496x128xbf16, #tpu.memory_space<vmem>>, vector<16x128xbf16>,
    %26 = vector.extract_strided_slice %1 {offsets = [0, 11], sizes = [16, 128], strides = [1, 1]} : vector<16x143xbf16> to vector<16x128xbf16>
    %c176 = arith.constant 176 : index
    %c0_17 = arith.constant 0 : index
    %27 = vector.load %arg7[%c176, %c0_17] : memref<496x128xbf16, #tpu.memory_space<vmem>>, vector<16x128xbf16>
    tpu.vector_store %arg7[%c176, %c0_17], %26 {strides = array<i32>} : memref<496x128xbf16, #tpu.memory_space<vmem>>, vector<16x128xbf16>,
    %28 = vector.extract_strided_slice %1 {offsets = [0, 12], sizes = [16, 128], strides = [1, 1]} : vector<16x143xbf16> to vector<16x128xbf16>
    %c192 = arith.constant 192 : index
    %c0_18 = arith.constant 0 : index
    %29 = vector.load %arg7[%c192, %c0_18] : memref<496x128xbf16, #tpu.memory_space<vmem>>, vector<16x128xbf16>
    tpu.vector_store %arg7[%c192, %c0_18], %28 {strides = array<i32>} : memref<496x128xbf16, #tpu.memory_space<vmem>>, vector<16x128xbf16>,
    %30 = vector.extract_strided_slice %1 {offsets = [0, 13], sizes = [16, 128], strides = [1, 1]} : vector<16x143xbf16> to vector<16x128xbf16>
    %c208 = arith.constant 208 : index
    %c0_19 = arith.constant 0 : index
    %31 = vector.load %arg7[%c208, %c0_19] : memref<496x128xbf16, #tpu.memory_space<vmem>>, vector<16x128xbf16>
    tpu.vector_store %arg7[%c208, %c0_19], %30 {strides = array<i32>} : memref<496x128xbf16, #tpu.memory_space<vmem>>, vector<16x128xbf16>,
    %32 = vector.extract_strided_slice %1 {offsets = [0, 14], sizes = [16, 128], strides = [1, 1]} : vector<16x143xbf16> to vector<16x128xbf16>
    %c224 = arith.constant 224 : index
    %c0_20 = arith.constant 0 : index
    %33 = vector.load %arg7[%c224, %c0_20] : memref<496x128xbf16, #tpu.memory_space<vmem>>, vector<16x128xbf16>
    tpu.vector_store %arg7[%c224, %c0_20], %32 {strides = array<i32>} : memref<496x128xbf16, #tpu.memory_space<vmem>>, vector<16x128xbf16>,
    %34 = vector.extract_strided_slice %1 {offsets = [0, 15], sizes = [16, 128], strides = [1, 1]} : vector<16x143xbf16> to vector<16x128xbf16>
    %c240 = arith.constant 240 : index
    %c0_21 = arith.constant 0 : index
    %35 = vector.load %arg7[%c240, %c0_21] : memref<496x128xbf16, #tpu.memory_space<vmem>>, vector<16x128xbf16>
    tpu.vector_store %arg7[%c240, %c0_21], %34 {strides = array<i32>} : memref<496x128xbf16, #tpu.memory_space<vmem>>, vector<16x128xbf16>,
    %36 = vector.extract_strided_slice %3 {offsets = [0, 0], sizes = [16, 128], strides = [1, 1]} : vector<16x143xbf16> to vector<16x128xbf16>
    %c256 = arith.constant 256 : index
    %c0_22 = arith.constant 0 : index
    %37 = vector.load %arg7[%c256, %c0_22] : memref<496x128xbf16, #tpu.memory_space<vmem>>, vector<16x128xbf16>
    tpu.vector_store %arg7[%c256, %c0_22], %36 {strides = array<i32>} : memref<496x128xbf16, #tpu.memory_space<vmem>>, vector<16x128xbf16>,
    %38 = vector.extract_strided_slice %3 {offsets = [0, 1], sizes = [16, 128], strides = [1, 1]} : vector<16x143xbf16> to vector<16x128xbf16>
    %c272 = arith.constant 272 : index
    %c0_23 = arith.constant 0 : index
    %39 = vector.load %arg7[%c272, %c0_23] : memref<496x128xbf16, #tpu.memory_space<vmem>>, vector<16x128xbf16>
    tpu.vector_store %arg7[%c272, %c0_23], %38 {strides = array<i32>} : memref<496x128xbf16, #tpu.memory_space<vmem>>, vector<16x128xbf16>,
    %40 = vector.extract_strided_slice %3 {offsets = [0, 2], sizes = [16, 128], strides = [1, 1]} : vector<16x143xbf16> to vector<16x128xbf16>
    %c288 = arith.constant 288 : index
    %c0_24 = arith.constant 0 : index
    %41 = vector.load %arg7[%c288, %c0_24] : memref<496x128xbf16, #tpu.memory_space<vmem>>, vector<16x128xbf16>
    tpu.vector_store %arg7[%c288, %c0_24], %40 {strides = array<i32>} : memref<496x128xbf16, #tpu.memory_space<vmem>>, vector<16x128xbf16>,
    %42 = vector.extract_strided_slice %3 {offsets = [0, 3], sizes = [16, 128], strides = [1, 1]} : vector<16x143xbf16> to vector<16x128xbf16>
    %c304 = arith.constant 304 : index
    %c0_25 = arith.constant 0 : index
    %43 = vector.load %arg7[%c304, %c0_25] : memref<496x128xbf16, #tpu.memory_space<vmem>>, vector<16x128xbf16>
    tpu.vector_store %arg7[%c304, %c0_25], %42 {strides = array<i32>} : memref<496x128xbf16, #tpu.memory_space<vmem>>, vector<16x128xbf16>,
    %44 = vector.extract_strided_slice %3 {offsets = [0, 4], sizes = [16, 128], strides = [1, 1]} : vector<16x143xbf16> to vector<16x128xbf16>
    %c320 = arith.constant 320 : index
    %c0_26 = arith.constant 0 : index
    %45 = vector.load %arg7[%c320, %c0_26] : memref<496x128xbf16, #tpu.memory_space<vmem>>, vector<16x128xbf16>
    tpu.vector_store %arg7[%c320, %c0_26], %44 {strides = array<i32>} : memref<496x128xbf16, #tpu.memory_space<vmem>>, vector<16x128xbf16>,
    %46 = vector.extract_strided_slice %3 {offsets = [0, 5], sizes = [16, 128], strides = [1, 1]} : vector<16x143xbf16> to vector<16x128xbf16>
    %c336 = arith.constant 336 : index
    %c0_27 = arith.constant 0 : index
    %47 = vector.load %arg7[%c336, %c0_27] : memref<496x128xbf16, #tpu.memory_space<vmem>>, vector<16x128xbf16>
    tpu.vector_store %arg7[%c336, %c0_27], %46 {strides = array<i32>} : memref<496x128xbf16, #tpu.memory_space<vmem>>, vector<16x128xbf16>,
    %48 = vector.extract_strided_slice %3 {offsets = [0, 6], sizes = [16, 128], strides = [1, 1]} : vector<16x143xbf16> to vector<16x128xbf16>
    %c352 = arith.constant 352 : index
    %c0_28 = arith.constant 0 : index
    %49 = vector.load %arg7[%c352, %c0_28] : memref<496x128xbf16, #tpu.memory_space<vmem>>, vector<16x128xbf16>
    tpu.vector_store %arg7[%c352, %c0_28], %48 {strides = array<i32>} : memref<496x128xbf16, #tpu.memory_space<vmem>>, vector<16x128xbf16>,
    %50 = vector.extract_strided_slice %3 {offsets = [0, 7], sizes = [16, 128], strides = [1, 1]} : vector<16x143xbf16> to vector<16x128xbf16>
    %c368 = arith.constant 368 : index
    %c0_29 = arith.constant 0 : index
    %51 = vector.load %arg7[%c368, %c0_29] : memref<496x128xbf16, #tpu.memory_space<vmem>>, vector<16x128xbf16>
    tpu.vector_store %arg7[%c368, %c0_29], %50 {strides = array<i32>} : memref<496x128xbf16, #tpu.memory_space<vmem>>, vector<16x128xbf16>,
    %52 = vector.extract_strided_slice %3 {offsets = [0, 8], sizes = [16, 128], strides = [1, 1]} : vector<16x143xbf16> to vector<16x128xbf16>
    %c384 = arith.constant 384 : index
    %c0_30 = arith.constant 0 : index
    %53 = vector.load %arg7[%c384, %c0_30] : memref<496x128xbf16, #tpu.memory_space<vmem>>, vector<16x128xbf16>
    tpu.vector_store %arg7[%c384, %c0_30], %52 {strides = array<i32>} : memref<496x128xbf16, #tpu.memory_space<vmem>>, vector<16x128xbf16>,
    %54 = vector.extract_strided_slice %3 {offsets = [0, 9], sizes = [16, 128], strides = [1, 1]} : vector<16x143xbf16> to vector<16x128xbf16>
    %c400 = arith.constant 400 : index
    %c0_31 = arith.constant 0 : index
    %55 = vector.load %arg7[%c400, %c0_31] : memref<496x128xbf16, #tpu.memory_space<vmem>>, vector<16x128xbf16>
    tpu.vector_store %arg7[%c400, %c0_31], %54 {strides = array<i32>} : memref<496x128xbf16, #tpu.memory_space<vmem>>, vector<16x128xbf16>,
    %56 = vector.extract_strided_slice %3 {offsets = [0, 10], sizes = [16, 128], strides = [1, 1]} : vector<16x143xbf16> to vector<16x128xbf16>
    %c416 = arith.constant 416 : index
    %c0_32 = arith.constant 0 : index
    %57 = vector.load %arg7[%c416, %c0_32] : memref<496x128xbf16, #tpu.memory_space<vmem>>, vector<16x128xbf16>
    tpu.vector_store %arg7[%c416, %c0_32], %56 {strides = array<i32>} : memref<496x128xbf16, #tpu.memory_space<vmem>>, vector<16x128xbf16>,
    %58 = vector.extract_strided_slice %3 {offsets = [0, 11], sizes = [16, 128], strides = [1, 1]} : vector<16x143xbf16> to vector<16x128xbf16>
    %c432 = arith.constant 432 : index
    %c0_33 = arith.constant 0 : index
    %59 = vector.load %arg7[%c432, %c0_33] : memref<496x128xbf16, #tpu.memory_space<vmem>>, vector<16x128xbf16>
    tpu.vector_store %arg7[%c432, %c0_33], %58 {strides = array<i32>} : memref<496x128xbf16, #tpu.memory_space<vmem>>, vector<16x128xbf16>,
    %60 = vector.extract_strided_slice %3 {offsets = [0, 12], sizes = [16, 128], strides = [1, 1]} : vector<16x143xbf16> to vector<16x128xbf16>
    %c448 = arith.constant 448 : index
    %c0_34 = arith.constant 0 : index
    %61 = vector.load %arg7[%c448, %c0_34] : memref<496x128xbf16, #tpu.memory_space<vmem>>, vector<16x128xbf16>
    tpu.vector_store %arg7[%c448, %c0_34], %60 {strides = array<i32>} : memref<496x128xbf16, #tpu.memory_space<vmem>>, vector<16x128xbf16>,
    %62 = vector.extract_strided_slice %3 {offsets = [0, 13], sizes = [16, 128], strides = [1, 1]} : vector<16x143xbf16> to vector<16x128xbf16>
    %c464 = arith.constant 464 : index
    %c0_35 = arith.constant 0 : index
    %63 = vector.load %arg7[%c464, %c0_35] : memref<496x128xbf16, #tpu.memory_space<vmem>>, vector<16x128xbf16>
    tpu.vector_store %arg7[%c464, %c0_35], %62 {strides = array<i32>} : memref<496x128xbf16, #tpu.memory_space<vmem>>, vector<16x128xbf16>,
    %64 = vector.extract_strided_slice %3 {offsets = [0, 14], sizes = [16, 128], strides = [1, 1]} : vector<16x143xbf16> to vector<16x128xbf16>
    %c480 = arith.constant 480 : index
    %c0_36 = arith.constant 0 : index
    %65 = vector.load %arg7[%c480, %c0_36] : memref<496x128xbf16, #tpu.memory_space<vmem>>, vector<16x128xbf16>
    tpu.vector_store %arg7[%c480, %c0_36], %64 {strides = array<i32>} : memref<496x128xbf16, #tpu.memory_space<vmem>>, vector<16x128xbf16>,
    %c0_37 = arith.constant 0 : index
    %c0_38 = arith.constant 0 : index
    %66 = vector.load %arg3[%c0_37, %c0_38] : memref<8x496xbf16, #tpu.memory_space<vmem>>, vector<8x496xbf16>
    %c0_39 = arith.constant 0 : index
    %c0_40 = arith.constant 0 : index
    %67 = vector.load %arg7[%c0_39, %c0_40] : memref<496x128xbf16, #tpu.memory_space<vmem>>, vector<496x128xbf16>
    %cst = arith.constant dense<0.000000e+00> : vector<8x128xf32>
    %68 = tpu.matmul %66, %67, %cst {dimension_numbers = #tpu.dot_dimension_numbers<[1], [0], [0], [1], [0, 0, 1, 1], [], []>} : vector<8x496xbf16>, vector<496x128xbf16>, vector<8x128xf32> -> vector<8x128xf32>
    %c0_41 = arith.constant 0 : index
    %c0_42 = arith.constant 0 : index
    %69 = vector.load %arg4[%c0_41, %c0_42] : memref<8x1xf32, #tpu.memory_space<vmem>>, vector<8x1xf32>
    %70 = vector.broadcast %69 : vector<8x1xf32> to vector<8x128xf32>
    %71 = arith.addf %68, %70 : vector<8x128xf32>
    %c0_43 = arith.constant 0 : index
    %72 = memref.load %arg5[%c0_43] : memref<1xf32, #tpu.memory_space<smem>>
    %cst_44 = arith.constant 0.000000e+00 : f32
    %73 = vector.broadcast %cst_44 : f32 to vector<8x128xf32>
    %74 = arith.cmpf ogt, %71, %73 : vector<8x128xf32>
    %75 = vector.broadcast %72 : f32 to vector<8x128xf32>
    %76 = arith.mulf %75, %71 : vector<8x128xf32>
    %77 = arith.select %74, %71, %76 : vector<8x128xi1>, vector<8x128xf32>
    %78 = arith.truncf %77 : vector<8x128xf32> to vector<8x128xbf16>
    %c0_45 = arith.constant 0 : index
    %c0_46 = arith.constant 0 : index
    %c0_47 = arith.constant 0 : index
    %79 = vector.load %arg6[%c0_45, %c0_46, %c0_47] : memref<1x8x128xbf16, #tpu.memory_space<vmem>>, vector<1x8x128xbf16>
    %80 = vector.shape_cast %79 : vector<1x8x128xbf16> to vector<8x128xbf16>
    %81 = vector.shape_cast %78 : vector<8x128xbf16> to vector<1x8x128xbf16>
    tpu.vector_store %arg6[%c0_45, %c0_46, %c0_47], %81 {strides = array<i32>} : memref<1x8x128xbf16, #tpu.memory_space<vmem>>, vector<1x8x128xbf16>,
    return
  }
  func.func @transform_0(%arg0: i32) -> (i32, i32, i32) {
    %c0_i32 = arith.constant 0 : i32
    %c0_i32_0 = arith.constant 0 : i32
    %c0_i32_1 = arith.constant 0 : i32
    return %arg0, %c0_i32, %c0_i32_0 : i32, i32, i32
  }
  func.func @transform_1(%arg0: i32) -> (i32, i32, i32) {
    %c0_i32 = arith.constant 0 : i32
    %c0_i32_0 = arith.constant 0 : i32
    %c0_i32_1 = arith.constant 0 : i32
    return %arg0, %c0_i32, %c0_i32_0 : i32, i32, i32
  }
  func.func @transform_2(%arg0: i32) -> (i32, i32) {
    %c0_i32 = arith.constant 0 : i32
    %c0_i32_0 = arith.constant 0 : i32
    %c0_i32_1 = arith.constant 0 : i32
    return %c0_i32, %c0_i32_0 : i32, i32
  }
  func.func @transform_3(%arg0: i32) -> (i32, i32) {
    %c0_i32 = arith.constant 0 : i32
    %c0_i32_0 = arith.constant 0 : i32
    %c0_i32_1 = arith.constant 0 : i32
    return %c0_i32, %c0_i32_0 : i32, i32
  }
  func.func @transform_4(%arg0: i32) -> i32 {
    %c0_i32 = arith.constant 0 : i32
    %c0_i32_0 = arith.constant 0 : i32
    return %c0_i32 : i32
  }
  func.func @transform_5(%arg0: i32) -> (i32, i32, i32) {
    %c0_i32 = arith.constant 0 : i32
    %c0_i32_0 = arith.constant 0 : i32
    %c0_i32_1 = arith.constant 0 : i32
    return %arg0, %c0_i32, %c0_i32_0 : i32, i32, i32
  }
}

module attributes {stable_mosaic.version = 11 : i64} {
  func.func @_enc_conv_prelu_kernel(%arg0: i32, %arg1: memref<1x16x79xbf16, #tpu.memory_space<vmem>>, %arg2: memref<1x16x79xbf16, #tpu.memory_space<vmem>>, %arg3: memref<16x496xbf16, #tpu.memory_space<vmem>>, %arg4: memref<16x1xf32, #tpu.memory_space<vmem>>, %arg5: memref<1xf32, #tpu.memory_space<smem>>, %arg6: memref<1x16x64xbf16, #tpu.memory_space<vmem>>, %arg7: memref<496x64xbf16, #tpu.memory_space<vmem>>) attributes {dimension_semantics = [#tpu.dimension_semantics<parallel>], iteration_bounds = array<i64: 2>, scalar_prefetch = 0 : i64, scratch_operands = 1 : i64, tpu.core_type = #tpu.core_type<tc>, window_params = [{transform_indices = @transform_0, window_bounds = array<i64: 1, 16, 79>}, {transform_indices = @transform_1, window_bounds = array<i64: 1, 16, 79>}, {pipeline_mode = #tpu.pipeline_mode<synchronous>, transform_indices = @transform_2, window_bounds = array<i64: 16, 496>}, {pipeline_mode = #tpu.pipeline_mode<synchronous>, transform_indices = @transform_3, window_bounds = array<i64: 16, 1>}, {transform_indices = @transform_4, window_bounds = array<i64: 1>}, {transform_indices = @transform_5, window_bounds = array<i64: 1, 16, 64>}]} {
    %c0 = arith.constant 0 : index
    %c0_0 = arith.constant 0 : index
    %c0_1 = arith.constant 0 : index
    %0 = vector.load %arg1[%c0, %c0_0, %c0_1] : memref<1x16x79xbf16, #tpu.memory_space<vmem>>, vector<1x16x79xbf16>
    %1 = vector.shape_cast %0 : vector<1x16x79xbf16> to vector<16x79xbf16>
    %c0_2 = arith.constant 0 : index
    %c0_3 = arith.constant 0 : index
    %c0_4 = arith.constant 0 : index
    %2 = vector.load %arg2[%c0_2, %c0_3, %c0_4] : memref<1x16x79xbf16, #tpu.memory_space<vmem>>, vector<1x16x79xbf16>
    %3 = vector.shape_cast %2 : vector<1x16x79xbf16> to vector<16x79xbf16>
    %4 = vector.extract_strided_slice %1 {offsets = [0, 0], sizes = [16, 64], strides = [1, 1]} : vector<16x79xbf16> to vector<16x64xbf16>
    %c0_5 = arith.constant 0 : index
    %c0_6 = arith.constant 0 : index
    %5 = vector.load %arg7[%c0_5, %c0_6] : memref<496x64xbf16, #tpu.memory_space<vmem>>, vector<16x64xbf16>
    tpu.vector_store %arg7[%c0_5, %c0_6], %4 {strides = array<i32>} : memref<496x64xbf16, #tpu.memory_space<vmem>>, vector<16x64xbf16>,
    %6 = vector.extract_strided_slice %1 {offsets = [0, 1], sizes = [16, 64], strides = [1, 1]} : vector<16x79xbf16> to vector<16x64xbf16>
    %c16 = arith.constant 16 : index
    %c0_7 = arith.constant 0 : index
    %7 = vector.load %arg7[%c16, %c0_7] : memref<496x64xbf16, #tpu.memory_space<vmem>>, vector<16x64xbf16>
    tpu.vector_store %arg7[%c16, %c0_7], %6 {strides = array<i32>} : memref<496x64xbf16, #tpu.memory_space<vmem>>, vector<16x64xbf16>,
    %8 = vector.extract_strided_slice %1 {offsets = [0, 2], sizes = [16, 64], strides = [1, 1]} : vector<16x79xbf16> to vector<16x64xbf16>
    %c32 = arith.constant 32 : index
    %c0_8 = arith.constant 0 : index
    %9 = vector.load %arg7[%c32, %c0_8] : memref<496x64xbf16, #tpu.memory_space<vmem>>, vector<16x64xbf16>
    tpu.vector_store %arg7[%c32, %c0_8], %8 {strides = array<i32>} : memref<496x64xbf16, #tpu.memory_space<vmem>>, vector<16x64xbf16>,
    %10 = vector.extract_strided_slice %1 {offsets = [0, 3], sizes = [16, 64], strides = [1, 1]} : vector<16x79xbf16> to vector<16x64xbf16>
    %c48 = arith.constant 48 : index
    %c0_9 = arith.constant 0 : index
    %11 = vector.load %arg7[%c48, %c0_9] : memref<496x64xbf16, #tpu.memory_space<vmem>>, vector<16x64xbf16>
    tpu.vector_store %arg7[%c48, %c0_9], %10 {strides = array<i32>} : memref<496x64xbf16, #tpu.memory_space<vmem>>, vector<16x64xbf16>,
    %12 = vector.extract_strided_slice %1 {offsets = [0, 4], sizes = [16, 64], strides = [1, 1]} : vector<16x79xbf16> to vector<16x64xbf16>
    %c64 = arith.constant 64 : index
    %c0_10 = arith.constant 0 : index
    %13 = vector.load %arg7[%c64, %c0_10] : memref<496x64xbf16, #tpu.memory_space<vmem>>, vector<16x64xbf16>
    tpu.vector_store %arg7[%c64, %c0_10], %12 {strides = array<i32>} : memref<496x64xbf16, #tpu.memory_space<vmem>>, vector<16x64xbf16>,
    %14 = vector.extract_strided_slice %1 {offsets = [0, 5], sizes = [16, 64], strides = [1, 1]} : vector<16x79xbf16> to vector<16x64xbf16>
    %c80 = arith.constant 80 : index
    %c0_11 = arith.constant 0 : index
    %15 = vector.load %arg7[%c80, %c0_11] : memref<496x64xbf16, #tpu.memory_space<vmem>>, vector<16x64xbf16>
    tpu.vector_store %arg7[%c80, %c0_11], %14 {strides = array<i32>} : memref<496x64xbf16, #tpu.memory_space<vmem>>, vector<16x64xbf16>,
    %16 = vector.extract_strided_slice %1 {offsets = [0, 6], sizes = [16, 64], strides = [1, 1]} : vector<16x79xbf16> to vector<16x64xbf16>
    %c96 = arith.constant 96 : index
    %c0_12 = arith.constant 0 : index
    %17 = vector.load %arg7[%c96, %c0_12] : memref<496x64xbf16, #tpu.memory_space<vmem>>, vector<16x64xbf16>
    tpu.vector_store %arg7[%c96, %c0_12], %16 {strides = array<i32>} : memref<496x64xbf16, #tpu.memory_space<vmem>>, vector<16x64xbf16>,
    %18 = vector.extract_strided_slice %1 {offsets = [0, 7], sizes = [16, 64], strides = [1, 1]} : vector<16x79xbf16> to vector<16x64xbf16>
    %c112 = arith.constant 112 : index
    %c0_13 = arith.constant 0 : index
    %19 = vector.load %arg7[%c112, %c0_13] : memref<496x64xbf16, #tpu.memory_space<vmem>>, vector<16x64xbf16>
    tpu.vector_store %arg7[%c112, %c0_13], %18 {strides = array<i32>} : memref<496x64xbf16, #tpu.memory_space<vmem>>, vector<16x64xbf16>,
    %20 = vector.extract_strided_slice %1 {offsets = [0, 8], sizes = [16, 64], strides = [1, 1]} : vector<16x79xbf16> to vector<16x64xbf16>
    %c128 = arith.constant 128 : index
    %c0_14 = arith.constant 0 : index
    %21 = vector.load %arg7[%c128, %c0_14] : memref<496x64xbf16, #tpu.memory_space<vmem>>, vector<16x64xbf16>
    tpu.vector_store %arg7[%c128, %c0_14], %20 {strides = array<i32>} : memref<496x64xbf16, #tpu.memory_space<vmem>>, vector<16x64xbf16>,
    %22 = vector.extract_strided_slice %1 {offsets = [0, 9], sizes = [16, 64], strides = [1, 1]} : vector<16x79xbf16> to vector<16x64xbf16>
    %c144 = arith.constant 144 : index
    %c0_15 = arith.constant 0 : index
    %23 = vector.load %arg7[%c144, %c0_15] : memref<496x64xbf16, #tpu.memory_space<vmem>>, vector<16x64xbf16>
    tpu.vector_store %arg7[%c144, %c0_15], %22 {strides = array<i32>} : memref<496x64xbf16, #tpu.memory_space<vmem>>, vector<16x64xbf16>,
    %24 = vector.extract_strided_slice %1 {offsets = [0, 10], sizes = [16, 64], strides = [1, 1]} : vector<16x79xbf16> to vector<16x64xbf16>
    %c160 = arith.constant 160 : index
    %c0_16 = arith.constant 0 : index
    %25 = vector.load %arg7[%c160, %c0_16] : memref<496x64xbf16, #tpu.memory_space<vmem>>, vector<16x64xbf16>
    tpu.vector_store %arg7[%c160, %c0_16], %24 {strides = array<i32>} : memref<496x64xbf16, #tpu.memory_space<vmem>>, vector<16x64xbf16>,
    %26 = vector.extract_strided_slice %1 {offsets = [0, 11], sizes = [16, 64], strides = [1, 1]} : vector<16x79xbf16> to vector<16x64xbf16>
    %c176 = arith.constant 176 : index
    %c0_17 = arith.constant 0 : index
    %27 = vector.load %arg7[%c176, %c0_17] : memref<496x64xbf16, #tpu.memory_space<vmem>>, vector<16x64xbf16>
    tpu.vector_store %arg7[%c176, %c0_17], %26 {strides = array<i32>} : memref<496x64xbf16, #tpu.memory_space<vmem>>, vector<16x64xbf16>,
    %28 = vector.extract_strided_slice %1 {offsets = [0, 12], sizes = [16, 64], strides = [1, 1]} : vector<16x79xbf16> to vector<16x64xbf16>
    %c192 = arith.constant 192 : index
    %c0_18 = arith.constant 0 : index
    %29 = vector.load %arg7[%c192, %c0_18] : memref<496x64xbf16, #tpu.memory_space<vmem>>, vector<16x64xbf16>
    tpu.vector_store %arg7[%c192, %c0_18], %28 {strides = array<i32>} : memref<496x64xbf16, #tpu.memory_space<vmem>>, vector<16x64xbf16>,
    %30 = vector.extract_strided_slice %1 {offsets = [0, 13], sizes = [16, 64], strides = [1, 1]} : vector<16x79xbf16> to vector<16x64xbf16>
    %c208 = arith.constant 208 : index
    %c0_19 = arith.constant 0 : index
    %31 = vector.load %arg7[%c208, %c0_19] : memref<496x64xbf16, #tpu.memory_space<vmem>>, vector<16x64xbf16>
    tpu.vector_store %arg7[%c208, %c0_19], %30 {strides = array<i32>} : memref<496x64xbf16, #tpu.memory_space<vmem>>, vector<16x64xbf16>,
    %32 = vector.extract_strided_slice %1 {offsets = [0, 14], sizes = [16, 64], strides = [1, 1]} : vector<16x79xbf16> to vector<16x64xbf16>
    %c224 = arith.constant 224 : index
    %c0_20 = arith.constant 0 : index
    %33 = vector.load %arg7[%c224, %c0_20] : memref<496x64xbf16, #tpu.memory_space<vmem>>, vector<16x64xbf16>
    tpu.vector_store %arg7[%c224, %c0_20], %32 {strides = array<i32>} : memref<496x64xbf16, #tpu.memory_space<vmem>>, vector<16x64xbf16>,
    %34 = vector.extract_strided_slice %1 {offsets = [0, 15], sizes = [16, 64], strides = [1, 1]} : vector<16x79xbf16> to vector<16x64xbf16>
    %c240 = arith.constant 240 : index
    %c0_21 = arith.constant 0 : index
    %35 = vector.load %arg7[%c240, %c0_21] : memref<496x64xbf16, #tpu.memory_space<vmem>>, vector<16x64xbf16>
    tpu.vector_store %arg7[%c240, %c0_21], %34 {strides = array<i32>} : memref<496x64xbf16, #tpu.memory_space<vmem>>, vector<16x64xbf16>,
    %36 = vector.extract_strided_slice %3 {offsets = [0, 0], sizes = [16, 64], strides = [1, 1]} : vector<16x79xbf16> to vector<16x64xbf16>
    %c256 = arith.constant 256 : index
    %c0_22 = arith.constant 0 : index
    %37 = vector.load %arg7[%c256, %c0_22] : memref<496x64xbf16, #tpu.memory_space<vmem>>, vector<16x64xbf16>
    tpu.vector_store %arg7[%c256, %c0_22], %36 {strides = array<i32>} : memref<496x64xbf16, #tpu.memory_space<vmem>>, vector<16x64xbf16>,
    %38 = vector.extract_strided_slice %3 {offsets = [0, 1], sizes = [16, 64], strides = [1, 1]} : vector<16x79xbf16> to vector<16x64xbf16>
    %c272 = arith.constant 272 : index
    %c0_23 = arith.constant 0 : index
    %39 = vector.load %arg7[%c272, %c0_23] : memref<496x64xbf16, #tpu.memory_space<vmem>>, vector<16x64xbf16>
    tpu.vector_store %arg7[%c272, %c0_23], %38 {strides = array<i32>} : memref<496x64xbf16, #tpu.memory_space<vmem>>, vector<16x64xbf16>,
    %40 = vector.extract_strided_slice %3 {offsets = [0, 2], sizes = [16, 64], strides = [1, 1]} : vector<16x79xbf16> to vector<16x64xbf16>
    %c288 = arith.constant 288 : index
    %c0_24 = arith.constant 0 : index
    %41 = vector.load %arg7[%c288, %c0_24] : memref<496x64xbf16, #tpu.memory_space<vmem>>, vector<16x64xbf16>
    tpu.vector_store %arg7[%c288, %c0_24], %40 {strides = array<i32>} : memref<496x64xbf16, #tpu.memory_space<vmem>>, vector<16x64xbf16>,
    %42 = vector.extract_strided_slice %3 {offsets = [0, 3], sizes = [16, 64], strides = [1, 1]} : vector<16x79xbf16> to vector<16x64xbf16>
    %c304 = arith.constant 304 : index
    %c0_25 = arith.constant 0 : index
    %43 = vector.load %arg7[%c304, %c0_25] : memref<496x64xbf16, #tpu.memory_space<vmem>>, vector<16x64xbf16>
    tpu.vector_store %arg7[%c304, %c0_25], %42 {strides = array<i32>} : memref<496x64xbf16, #tpu.memory_space<vmem>>, vector<16x64xbf16>,
    %44 = vector.extract_strided_slice %3 {offsets = [0, 4], sizes = [16, 64], strides = [1, 1]} : vector<16x79xbf16> to vector<16x64xbf16>
    %c320 = arith.constant 320 : index
    %c0_26 = arith.constant 0 : index
    %45 = vector.load %arg7[%c320, %c0_26] : memref<496x64xbf16, #tpu.memory_space<vmem>>, vector<16x64xbf16>
    tpu.vector_store %arg7[%c320, %c0_26], %44 {strides = array<i32>} : memref<496x64xbf16, #tpu.memory_space<vmem>>, vector<16x64xbf16>,
    %46 = vector.extract_strided_slice %3 {offsets = [0, 5], sizes = [16, 64], strides = [1, 1]} : vector<16x79xbf16> to vector<16x64xbf16>
    %c336 = arith.constant 336 : index
    %c0_27 = arith.constant 0 : index
    %47 = vector.load %arg7[%c336, %c0_27] : memref<496x64xbf16, #tpu.memory_space<vmem>>, vector<16x64xbf16>
    tpu.vector_store %arg7[%c336, %c0_27], %46 {strides = array<i32>} : memref<496x64xbf16, #tpu.memory_space<vmem>>, vector<16x64xbf16>,
    %48 = vector.extract_strided_slice %3 {offsets = [0, 6], sizes = [16, 64], strides = [1, 1]} : vector<16x79xbf16> to vector<16x64xbf16>
    %c352 = arith.constant 352 : index
    %c0_28 = arith.constant 0 : index
    %49 = vector.load %arg7[%c352, %c0_28] : memref<496x64xbf16, #tpu.memory_space<vmem>>, vector<16x64xbf16>
    tpu.vector_store %arg7[%c352, %c0_28], %48 {strides = array<i32>} : memref<496x64xbf16, #tpu.memory_space<vmem>>, vector<16x64xbf16>,
    %50 = vector.extract_strided_slice %3 {offsets = [0, 7], sizes = [16, 64], strides = [1, 1]} : vector<16x79xbf16> to vector<16x64xbf16>
    %c368 = arith.constant 368 : index
    %c0_29 = arith.constant 0 : index
    %51 = vector.load %arg7[%c368, %c0_29] : memref<496x64xbf16, #tpu.memory_space<vmem>>, vector<16x64xbf16>
    tpu.vector_store %arg7[%c368, %c0_29], %50 {strides = array<i32>} : memref<496x64xbf16, #tpu.memory_space<vmem>>, vector<16x64xbf16>,
    %52 = vector.extract_strided_slice %3 {offsets = [0, 8], sizes = [16, 64], strides = [1, 1]} : vector<16x79xbf16> to vector<16x64xbf16>
    %c384 = arith.constant 384 : index
    %c0_30 = arith.constant 0 : index
    %53 = vector.load %arg7[%c384, %c0_30] : memref<496x64xbf16, #tpu.memory_space<vmem>>, vector<16x64xbf16>
    tpu.vector_store %arg7[%c384, %c0_30], %52 {strides = array<i32>} : memref<496x64xbf16, #tpu.memory_space<vmem>>, vector<16x64xbf16>,
    %54 = vector.extract_strided_slice %3 {offsets = [0, 9], sizes = [16, 64], strides = [1, 1]} : vector<16x79xbf16> to vector<16x64xbf16>
    %c400 = arith.constant 400 : index
    %c0_31 = arith.constant 0 : index
    %55 = vector.load %arg7[%c400, %c0_31] : memref<496x64xbf16, #tpu.memory_space<vmem>>, vector<16x64xbf16>
    tpu.vector_store %arg7[%c400, %c0_31], %54 {strides = array<i32>} : memref<496x64xbf16, #tpu.memory_space<vmem>>, vector<16x64xbf16>,
    %56 = vector.extract_strided_slice %3 {offsets = [0, 10], sizes = [16, 64], strides = [1, 1]} : vector<16x79xbf16> to vector<16x64xbf16>
    %c416 = arith.constant 416 : index
    %c0_32 = arith.constant 0 : index
    %57 = vector.load %arg7[%c416, %c0_32] : memref<496x64xbf16, #tpu.memory_space<vmem>>, vector<16x64xbf16>
    tpu.vector_store %arg7[%c416, %c0_32], %56 {strides = array<i32>} : memref<496x64xbf16, #tpu.memory_space<vmem>>, vector<16x64xbf16>,
    %58 = vector.extract_strided_slice %3 {offsets = [0, 11], sizes = [16, 64], strides = [1, 1]} : vector<16x79xbf16> to vector<16x64xbf16>
    %c432 = arith.constant 432 : index
    %c0_33 = arith.constant 0 : index
    %59 = vector.load %arg7[%c432, %c0_33] : memref<496x64xbf16, #tpu.memory_space<vmem>>, vector<16x64xbf16>
    tpu.vector_store %arg7[%c432, %c0_33], %58 {strides = array<i32>} : memref<496x64xbf16, #tpu.memory_space<vmem>>, vector<16x64xbf16>,
    %60 = vector.extract_strided_slice %3 {offsets = [0, 12], sizes = [16, 64], strides = [1, 1]} : vector<16x79xbf16> to vector<16x64xbf16>
    %c448 = arith.constant 448 : index
    %c0_34 = arith.constant 0 : index
    %61 = vector.load %arg7[%c448, %c0_34] : memref<496x64xbf16, #tpu.memory_space<vmem>>, vector<16x64xbf16>
    tpu.vector_store %arg7[%c448, %c0_34], %60 {strides = array<i32>} : memref<496x64xbf16, #tpu.memory_space<vmem>>, vector<16x64xbf16>,
    %62 = vector.extract_strided_slice %3 {offsets = [0, 13], sizes = [16, 64], strides = [1, 1]} : vector<16x79xbf16> to vector<16x64xbf16>
    %c464 = arith.constant 464 : index
    %c0_35 = arith.constant 0 : index
    %63 = vector.load %arg7[%c464, %c0_35] : memref<496x64xbf16, #tpu.memory_space<vmem>>, vector<16x64xbf16>
    tpu.vector_store %arg7[%c464, %c0_35], %62 {strides = array<i32>} : memref<496x64xbf16, #tpu.memory_space<vmem>>, vector<16x64xbf16>,
    %64 = vector.extract_strided_slice %3 {offsets = [0, 14], sizes = [16, 64], strides = [1, 1]} : vector<16x79xbf16> to vector<16x64xbf16>
    %c480 = arith.constant 480 : index
    %c0_36 = arith.constant 0 : index
    %65 = vector.load %arg7[%c480, %c0_36] : memref<496x64xbf16, #tpu.memory_space<vmem>>, vector<16x64xbf16>
    tpu.vector_store %arg7[%c480, %c0_36], %64 {strides = array<i32>} : memref<496x64xbf16, #tpu.memory_space<vmem>>, vector<16x64xbf16>,
    %c0_37 = arith.constant 0 : index
    %c0_38 = arith.constant 0 : index
    %66 = vector.load %arg3[%c0_37, %c0_38] : memref<16x496xbf16, #tpu.memory_space<vmem>>, vector<16x496xbf16>
    %c0_39 = arith.constant 0 : index
    %c0_40 = arith.constant 0 : index
    %67 = vector.load %arg7[%c0_39, %c0_40] : memref<496x64xbf16, #tpu.memory_space<vmem>>, vector<496x64xbf16>
    %cst = arith.constant dense<0.000000e+00> : vector<16x64xf32>
    %68 = tpu.matmul %66, %67, %cst {dimension_numbers = #tpu.dot_dimension_numbers<[1], [0], [0], [1], [0, 0, 1, 1], [], []>} : vector<16x496xbf16>, vector<496x64xbf16>, vector<16x64xf32> -> vector<16x64xf32>
    %c0_41 = arith.constant 0 : index
    %c0_42 = arith.constant 0 : index
    %69 = vector.load %arg4[%c0_41, %c0_42] : memref<16x1xf32, #tpu.memory_space<vmem>>, vector<16x1xf32>
    %70 = vector.broadcast %69 : vector<16x1xf32> to vector<16x64xf32>
    %71 = arith.addf %68, %70 : vector<16x64xf32>
    %c0_43 = arith.constant 0 : index
    %72 = memref.load %arg5[%c0_43] : memref<1xf32, #tpu.memory_space<smem>>
    %cst_44 = arith.constant 0.000000e+00 : f32
    %73 = vector.broadcast %cst_44 : f32 to vector<16x64xf32>
    %74 = arith.cmpf ogt, %71, %73 : vector<16x64xf32>
    %75 = vector.broadcast %72 : f32 to vector<16x64xf32>
    %76 = arith.mulf %75, %71 : vector<16x64xf32>
    %77 = arith.select %74, %71, %76 : vector<16x64xi1>, vector<16x64xf32>
    %78 = arith.truncf %77 : vector<16x64xf32> to vector<16x64xbf16>
    %c0_45 = arith.constant 0 : index
    %c0_46 = arith.constant 0 : index
    %c0_47 = arith.constant 0 : index
    %79 = vector.load %arg6[%c0_45, %c0_46, %c0_47] : memref<1x16x64xbf16, #tpu.memory_space<vmem>>, vector<1x16x64xbf16>
    %80 = vector.shape_cast %79 : vector<1x16x64xbf16> to vector<16x64xbf16>
    %81 = vector.shape_cast %78 : vector<16x64xbf16> to vector<1x16x64xbf16>
    tpu.vector_store %arg6[%c0_45, %c0_46, %c0_47], %81 {strides = array<i32>} : memref<1x16x64xbf16, #tpu.memory_space<vmem>>, vector<1x16x64xbf16>,
    return
  }
  func.func @transform_0(%arg0: i32) -> (i32, i32, i32) {
    %c0_i32 = arith.constant 0 : i32
    %c0_i32_0 = arith.constant 0 : i32
    %c0_i32_1 = arith.constant 0 : i32
    return %arg0, %c0_i32, %c0_i32_0 : i32, i32, i32
  }
  func.func @transform_1(%arg0: i32) -> (i32, i32, i32) {
    %c0_i32 = arith.constant 0 : i32
    %c0_i32_0 = arith.constant 0 : i32
    %c0_i32_1 = arith.constant 0 : i32
    return %arg0, %c0_i32, %c0_i32_0 : i32, i32, i32
  }
  func.func @transform_2(%arg0: i32) -> (i32, i32) {
    %c0_i32 = arith.constant 0 : i32
    %c0_i32_0 = arith.constant 0 : i32
    %c0_i32_1 = arith.constant 0 : i32
    return %c0_i32, %c0_i32_0 : i32, i32
  }
  func.func @transform_3(%arg0: i32) -> (i32, i32) {
    %c0_i32 = arith.constant 0 : i32
    %c0_i32_0 = arith.constant 0 : i32
    %c0_i32_1 = arith.constant 0 : i32
    return %c0_i32, %c0_i32_0 : i32, i32
  }
  func.func @transform_4(%arg0: i32) -> i32 {
    %c0_i32 = arith.constant 0 : i32
    %c0_i32_0 = arith.constant 0 : i32
    return %c0_i32 : i32
  }
  func.func @transform_5(%arg0: i32) -> (i32, i32, i32) {
    %c0_i32 = arith.constant 0 : i32
    %c0_i32_0 = arith.constant 0 : i32
    %c0_i32_1 = arith.constant 0 : i32
    return %arg0, %c0_i32, %c0_i32_0 : i32, i32, i32
  }
}

module attributes {stable_mosaic.version = 11 : i64} {
  func.func @_enc_conv_prelu_kernel(%arg0: i32, %arg1: memref<1x16x47xbf16, #tpu.memory_space<vmem>>, %arg2: memref<1x16x47xbf16, #tpu.memory_space<vmem>>, %arg3: memref<32x496xbf16, #tpu.memory_space<vmem>>, %arg4: memref<32x1xf32, #tpu.memory_space<vmem>>, %arg5: memref<1xf32, #tpu.memory_space<smem>>, %arg6: memref<1x32x32xbf16, #tpu.memory_space<vmem>>, %arg7: memref<496x32xbf16, #tpu.memory_space<vmem>>) attributes {dimension_semantics = [#tpu.dimension_semantics<parallel>], iteration_bounds = array<i64: 2>, scalar_prefetch = 0 : i64, scratch_operands = 1 : i64, tpu.core_type = #tpu.core_type<tc>, window_params = [{transform_indices = @transform_0, window_bounds = array<i64: 1, 16, 47>}, {transform_indices = @transform_1, window_bounds = array<i64: 1, 16, 47>}, {pipeline_mode = #tpu.pipeline_mode<synchronous>, transform_indices = @transform_2, window_bounds = array<i64: 32, 496>}, {pipeline_mode = #tpu.pipeline_mode<synchronous>, transform_indices = @transform_3, window_bounds = array<i64: 32, 1>}, {transform_indices = @transform_4, window_bounds = array<i64: 1>}, {transform_indices = @transform_5, window_bounds = array<i64: 1, 32, 32>}]} {
    %c0 = arith.constant 0 : index
    %c0_0 = arith.constant 0 : index
    %c0_1 = arith.constant 0 : index
    %0 = vector.load %arg1[%c0, %c0_0, %c0_1] : memref<1x16x47xbf16, #tpu.memory_space<vmem>>, vector<1x16x47xbf16>
    %1 = vector.shape_cast %0 : vector<1x16x47xbf16> to vector<16x47xbf16>
    %c0_2 = arith.constant 0 : index
    %c0_3 = arith.constant 0 : index
    %c0_4 = arith.constant 0 : index
    %2 = vector.load %arg2[%c0_2, %c0_3, %c0_4] : memref<1x16x47xbf16, #tpu.memory_space<vmem>>, vector<1x16x47xbf16>
    %3 = vector.shape_cast %2 : vector<1x16x47xbf16> to vector<16x47xbf16>
    %4 = vector.extract_strided_slice %1 {offsets = [0, 0], sizes = [16, 32], strides = [1, 1]} : vector<16x47xbf16> to vector<16x32xbf16>
    %c0_5 = arith.constant 0 : index
    %c0_6 = arith.constant 0 : index
    %5 = vector.load %arg7[%c0_5, %c0_6] : memref<496x32xbf16, #tpu.memory_space<vmem>>, vector<16x32xbf16>
    tpu.vector_store %arg7[%c0_5, %c0_6], %4 {strides = array<i32>} : memref<496x32xbf16, #tpu.memory_space<vmem>>, vector<16x32xbf16>,
    %6 = vector.extract_strided_slice %1 {offsets = [0, 1], sizes = [16, 32], strides = [1, 1]} : vector<16x47xbf16> to vector<16x32xbf16>
    %c16 = arith.constant 16 : index
    %c0_7 = arith.constant 0 : index
    %7 = vector.load %arg7[%c16, %c0_7] : memref<496x32xbf16, #tpu.memory_space<vmem>>, vector<16x32xbf16>
    tpu.vector_store %arg7[%c16, %c0_7], %6 {strides = array<i32>} : memref<496x32xbf16, #tpu.memory_space<vmem>>, vector<16x32xbf16>,
    %8 = vector.extract_strided_slice %1 {offsets = [0, 2], sizes = [16, 32], strides = [1, 1]} : vector<16x47xbf16> to vector<16x32xbf16>
    %c32 = arith.constant 32 : index
    %c0_8 = arith.constant 0 : index
    %9 = vector.load %arg7[%c32, %c0_8] : memref<496x32xbf16, #tpu.memory_space<vmem>>, vector<16x32xbf16>
    tpu.vector_store %arg7[%c32, %c0_8], %8 {strides = array<i32>} : memref<496x32xbf16, #tpu.memory_space<vmem>>, vector<16x32xbf16>,
    %10 = vector.extract_strided_slice %1 {offsets = [0, 3], sizes = [16, 32], strides = [1, 1]} : vector<16x47xbf16> to vector<16x32xbf16>
    %c48 = arith.constant 48 : index
    %c0_9 = arith.constant 0 : index
    %11 = vector.load %arg7[%c48, %c0_9] : memref<496x32xbf16, #tpu.memory_space<vmem>>, vector<16x32xbf16>
    tpu.vector_store %arg7[%c48, %c0_9], %10 {strides = array<i32>} : memref<496x32xbf16, #tpu.memory_space<vmem>>, vector<16x32xbf16>,
    %12 = vector.extract_strided_slice %1 {offsets = [0, 4], sizes = [16, 32], strides = [1, 1]} : vector<16x47xbf16> to vector<16x32xbf16>
    %c64 = arith.constant 64 : index
    %c0_10 = arith.constant 0 : index
    %13 = vector.load %arg7[%c64, %c0_10] : memref<496x32xbf16, #tpu.memory_space<vmem>>, vector<16x32xbf16>
    tpu.vector_store %arg7[%c64, %c0_10], %12 {strides = array<i32>} : memref<496x32xbf16, #tpu.memory_space<vmem>>, vector<16x32xbf16>,
    %14 = vector.extract_strided_slice %1 {offsets = [0, 5], sizes = [16, 32], strides = [1, 1]} : vector<16x47xbf16> to vector<16x32xbf16>
    %c80 = arith.constant 80 : index
    %c0_11 = arith.constant 0 : index
    %15 = vector.load %arg7[%c80, %c0_11] : memref<496x32xbf16, #tpu.memory_space<vmem>>, vector<16x32xbf16>
    tpu.vector_store %arg7[%c80, %c0_11], %14 {strides = array<i32>} : memref<496x32xbf16, #tpu.memory_space<vmem>>, vector<16x32xbf16>,
    %16 = vector.extract_strided_slice %1 {offsets = [0, 6], sizes = [16, 32], strides = [1, 1]} : vector<16x47xbf16> to vector<16x32xbf16>
    %c96 = arith.constant 96 : index
    %c0_12 = arith.constant 0 : index
    %17 = vector.load %arg7[%c96, %c0_12] : memref<496x32xbf16, #tpu.memory_space<vmem>>, vector<16x32xbf16>
    tpu.vector_store %arg7[%c96, %c0_12], %16 {strides = array<i32>} : memref<496x32xbf16, #tpu.memory_space<vmem>>, vector<16x32xbf16>,
    %18 = vector.extract_strided_slice %1 {offsets = [0, 7], sizes = [16, 32], strides = [1, 1]} : vector<16x47xbf16> to vector<16x32xbf16>
    %c112 = arith.constant 112 : index
    %c0_13 = arith.constant 0 : index
    %19 = vector.load %arg7[%c112, %c0_13] : memref<496x32xbf16, #tpu.memory_space<vmem>>, vector<16x32xbf16>
    tpu.vector_store %arg7[%c112, %c0_13], %18 {strides = array<i32>} : memref<496x32xbf16, #tpu.memory_space<vmem>>, vector<16x32xbf16>,
    %20 = vector.extract_strided_slice %1 {offsets = [0, 8], sizes = [16, 32], strides = [1, 1]} : vector<16x47xbf16> to vector<16x32xbf16>
    %c128 = arith.constant 128 : index
    %c0_14 = arith.constant 0 : index
    %21 = vector.load %arg7[%c128, %c0_14] : memref<496x32xbf16, #tpu.memory_space<vmem>>, vector<16x32xbf16>
    tpu.vector_store %arg7[%c128, %c0_14], %20 {strides = array<i32>} : memref<496x32xbf16, #tpu.memory_space<vmem>>, vector<16x32xbf16>,
    %22 = vector.extract_strided_slice %1 {offsets = [0, 9], sizes = [16, 32], strides = [1, 1]} : vector<16x47xbf16> to vector<16x32xbf16>
    %c144 = arith.constant 144 : index
    %c0_15 = arith.constant 0 : index
    %23 = vector.load %arg7[%c144, %c0_15] : memref<496x32xbf16, #tpu.memory_space<vmem>>, vector<16x32xbf16>
    tpu.vector_store %arg7[%c144, %c0_15], %22 {strides = array<i32>} : memref<496x32xbf16, #tpu.memory_space<vmem>>, vector<16x32xbf16>,
    %24 = vector.extract_strided_slice %1 {offsets = [0, 10], sizes = [16, 32], strides = [1, 1]} : vector<16x47xbf16> to vector<16x32xbf16>
    %c160 = arith.constant 160 : index
    %c0_16 = arith.constant 0 : index
    %25 = vector.load %arg7[%c160, %c0_16] : memref<496x32xbf16, #tpu.memory_space<vmem>>, vector<16x32xbf16>
    tpu.vector_store %arg7[%c160, %c0_16], %24 {strides = array<i32>} : memref<496x32xbf16, #tpu.memory_space<vmem>>, vector<16x32xbf16>,
    %26 = vector.extract_strided_slice %1 {offsets = [0, 11], sizes = [16, 32], strides = [1, 1]} : vector<16x47xbf16> to vector<16x32xbf16>
    %c176 = arith.constant 176 : index
    %c0_17 = arith.constant 0 : index
    %27 = vector.load %arg7[%c176, %c0_17] : memref<496x32xbf16, #tpu.memory_space<vmem>>, vector<16x32xbf16>
    tpu.vector_store %arg7[%c176, %c0_17], %26 {strides = array<i32>} : memref<496x32xbf16, #tpu.memory_space<vmem>>, vector<16x32xbf16>,
    %28 = vector.extract_strided_slice %1 {offsets = [0, 12], sizes = [16, 32], strides = [1, 1]} : vector<16x47xbf16> to vector<16x32xbf16>
    %c192 = arith.constant 192 : index
    %c0_18 = arith.constant 0 : index
    %29 = vector.load %arg7[%c192, %c0_18] : memref<496x32xbf16, #tpu.memory_space<vmem>>, vector<16x32xbf16>
    tpu.vector_store %arg7[%c192, %c0_18], %28 {strides = array<i32>} : memref<496x32xbf16, #tpu.memory_space<vmem>>, vector<16x32xbf16>,
    %30 = vector.extract_strided_slice %1 {offsets = [0, 13], sizes = [16, 32], strides = [1, 1]} : vector<16x47xbf16> to vector<16x32xbf16>
    %c208 = arith.constant 208 : index
    %c0_19 = arith.constant 0 : index
    %31 = vector.load %arg7[%c208, %c0_19] : memref<496x32xbf16, #tpu.memory_space<vmem>>, vector<16x32xbf16>
    tpu.vector_store %arg7[%c208, %c0_19], %30 {strides = array<i32>} : memref<496x32xbf16, #tpu.memory_space<vmem>>, vector<16x32xbf16>,
    %32 = vector.extract_strided_slice %1 {offsets = [0, 14], sizes = [16, 32], strides = [1, 1]} : vector<16x47xbf16> to vector<16x32xbf16>
    %c224 = arith.constant 224 : index
    %c0_20 = arith.constant 0 : index
    %33 = vector.load %arg7[%c224, %c0_20] : memref<496x32xbf16, #tpu.memory_space<vmem>>, vector<16x32xbf16>
    tpu.vector_store %arg7[%c224, %c0_20], %32 {strides = array<i32>} : memref<496x32xbf16, #tpu.memory_space<vmem>>, vector<16x32xbf16>,
    %34 = vector.extract_strided_slice %1 {offsets = [0, 15], sizes = [16, 32], strides = [1, 1]} : vector<16x47xbf16> to vector<16x32xbf16>
    %c240 = arith.constant 240 : index
    %c0_21 = arith.constant 0 : index
    %35 = vector.load %arg7[%c240, %c0_21] : memref<496x32xbf16, #tpu.memory_space<vmem>>, vector<16x32xbf16>
    tpu.vector_store %arg7[%c240, %c0_21], %34 {strides = array<i32>} : memref<496x32xbf16, #tpu.memory_space<vmem>>, vector<16x32xbf16>,
    %36 = vector.extract_strided_slice %3 {offsets = [0, 0], sizes = [16, 32], strides = [1, 1]} : vector<16x47xbf16> to vector<16x32xbf16>
    %c256 = arith.constant 256 : index
    %c0_22 = arith.constant 0 : index
    %37 = vector.load %arg7[%c256, %c0_22] : memref<496x32xbf16, #tpu.memory_space<vmem>>, vector<16x32xbf16>
    tpu.vector_store %arg7[%c256, %c0_22], %36 {strides = array<i32>} : memref<496x32xbf16, #tpu.memory_space<vmem>>, vector<16x32xbf16>,
    %38 = vector.extract_strided_slice %3 {offsets = [0, 1], sizes = [16, 32], strides = [1, 1]} : vector<16x47xbf16> to vector<16x32xbf16>
    %c272 = arith.constant 272 : index
    %c0_23 = arith.constant 0 : index
    %39 = vector.load %arg7[%c272, %c0_23] : memref<496x32xbf16, #tpu.memory_space<vmem>>, vector<16x32xbf16>
    tpu.vector_store %arg7[%c272, %c0_23], %38 {strides = array<i32>} : memref<496x32xbf16, #tpu.memory_space<vmem>>, vector<16x32xbf16>,
    %40 = vector.extract_strided_slice %3 {offsets = [0, 2], sizes = [16, 32], strides = [1, 1]} : vector<16x47xbf16> to vector<16x32xbf16>
    %c288 = arith.constant 288 : index
    %c0_24 = arith.constant 0 : index
    %41 = vector.load %arg7[%c288, %c0_24] : memref<496x32xbf16, #tpu.memory_space<vmem>>, vector<16x32xbf16>
    tpu.vector_store %arg7[%c288, %c0_24], %40 {strides = array<i32>} : memref<496x32xbf16, #tpu.memory_space<vmem>>, vector<16x32xbf16>,
    %42 = vector.extract_strided_slice %3 {offsets = [0, 3], sizes = [16, 32], strides = [1, 1]} : vector<16x47xbf16> to vector<16x32xbf16>
    %c304 = arith.constant 304 : index
    %c0_25 = arith.constant 0 : index
    %43 = vector.load %arg7[%c304, %c0_25] : memref<496x32xbf16, #tpu.memory_space<vmem>>, vector<16x32xbf16>
    tpu.vector_store %arg7[%c304, %c0_25], %42 {strides = array<i32>} : memref<496x32xbf16, #tpu.memory_space<vmem>>, vector<16x32xbf16>,
    %44 = vector.extract_strided_slice %3 {offsets = [0, 4], sizes = [16, 32], strides = [1, 1]} : vector<16x47xbf16> to vector<16x32xbf16>
    %c320 = arith.constant 320 : index
    %c0_26 = arith.constant 0 : index
    %45 = vector.load %arg7[%c320, %c0_26] : memref<496x32xbf16, #tpu.memory_space<vmem>>, vector<16x32xbf16>
    tpu.vector_store %arg7[%c320, %c0_26], %44 {strides = array<i32>} : memref<496x32xbf16, #tpu.memory_space<vmem>>, vector<16x32xbf16>,
    %46 = vector.extract_strided_slice %3 {offsets = [0, 5], sizes = [16, 32], strides = [1, 1]} : vector<16x47xbf16> to vector<16x32xbf16>
    %c336 = arith.constant 336 : index
    %c0_27 = arith.constant 0 : index
    %47 = vector.load %arg7[%c336, %c0_27] : memref<496x32xbf16, #tpu.memory_space<vmem>>, vector<16x32xbf16>
    tpu.vector_store %arg7[%c336, %c0_27], %46 {strides = array<i32>} : memref<496x32xbf16, #tpu.memory_space<vmem>>, vector<16x32xbf16>,
    %48 = vector.extract_strided_slice %3 {offsets = [0, 6], sizes = [16, 32], strides = [1, 1]} : vector<16x47xbf16> to vector<16x32xbf16>
    %c352 = arith.constant 352 : index
    %c0_28 = arith.constant 0 : index
    %49 = vector.load %arg7[%c352, %c0_28] : memref<496x32xbf16, #tpu.memory_space<vmem>>, vector<16x32xbf16>
    tpu.vector_store %arg7[%c352, %c0_28], %48 {strides = array<i32>} : memref<496x32xbf16, #tpu.memory_space<vmem>>, vector<16x32xbf16>,
    %50 = vector.extract_strided_slice %3 {offsets = [0, 7], sizes = [16, 32], strides = [1, 1]} : vector<16x47xbf16> to vector<16x32xbf16>
    %c368 = arith.constant 368 : index
    %c0_29 = arith.constant 0 : index
    %51 = vector.load %arg7[%c368, %c0_29] : memref<496x32xbf16, #tpu.memory_space<vmem>>, vector<16x32xbf16>
    tpu.vector_store %arg7[%c368, %c0_29], %50 {strides = array<i32>} : memref<496x32xbf16, #tpu.memory_space<vmem>>, vector<16x32xbf16>,
    %52 = vector.extract_strided_slice %3 {offsets = [0, 8], sizes = [16, 32], strides = [1, 1]} : vector<16x47xbf16> to vector<16x32xbf16>
    %c384 = arith.constant 384 : index
    %c0_30 = arith.constant 0 : index
    %53 = vector.load %arg7[%c384, %c0_30] : memref<496x32xbf16, #tpu.memory_space<vmem>>, vector<16x32xbf16>
    tpu.vector_store %arg7[%c384, %c0_30], %52 {strides = array<i32>} : memref<496x32xbf16, #tpu.memory_space<vmem>>, vector<16x32xbf16>,
    %54 = vector.extract_strided_slice %3 {offsets = [0, 9], sizes = [16, 32], strides = [1, 1]} : vector<16x47xbf16> to vector<16x32xbf16>
    %c400 = arith.constant 400 : index
    %c0_31 = arith.constant 0 : index
    %55 = vector.load %arg7[%c400, %c0_31] : memref<496x32xbf16, #tpu.memory_space<vmem>>, vector<16x32xbf16>
    tpu.vector_store %arg7[%c400, %c0_31], %54 {strides = array<i32>} : memref<496x32xbf16, #tpu.memory_space<vmem>>, vector<16x32xbf16>,
    %56 = vector.extract_strided_slice %3 {offsets = [0, 10], sizes = [16, 32], strides = [1, 1]} : vector<16x47xbf16> to vector<16x32xbf16>
    %c416 = arith.constant 416 : index
    %c0_32 = arith.constant 0 : index
    %57 = vector.load %arg7[%c416, %c0_32] : memref<496x32xbf16, #tpu.memory_space<vmem>>, vector<16x32xbf16>
    tpu.vector_store %arg7[%c416, %c0_32], %56 {strides = array<i32>} : memref<496x32xbf16, #tpu.memory_space<vmem>>, vector<16x32xbf16>,
    %58 = vector.extract_strided_slice %3 {offsets = [0, 11], sizes = [16, 32], strides = [1, 1]} : vector<16x47xbf16> to vector<16x32xbf16>
    %c432 = arith.constant 432 : index
    %c0_33 = arith.constant 0 : index
    %59 = vector.load %arg7[%c432, %c0_33] : memref<496x32xbf16, #tpu.memory_space<vmem>>, vector<16x32xbf16>
    tpu.vector_store %arg7[%c432, %c0_33], %58 {strides = array<i32>} : memref<496x32xbf16, #tpu.memory_space<vmem>>, vector<16x32xbf16>,
    %60 = vector.extract_strided_slice %3 {offsets = [0, 12], sizes = [16, 32], strides = [1, 1]} : vector<16x47xbf16> to vector<16x32xbf16>
    %c448 = arith.constant 448 : index
    %c0_34 = arith.constant 0 : index
    %61 = vector.load %arg7[%c448, %c0_34] : memref<496x32xbf16, #tpu.memory_space<vmem>>, vector<16x32xbf16>
    tpu.vector_store %arg7[%c448, %c0_34], %60 {strides = array<i32>} : memref<496x32xbf16, #tpu.memory_space<vmem>>, vector<16x32xbf16>,
    %62 = vector.extract_strided_slice %3 {offsets = [0, 13], sizes = [16, 32], strides = [1, 1]} : vector<16x47xbf16> to vector<16x32xbf16>
    %c464 = arith.constant 464 : index
    %c0_35 = arith.constant 0 : index
    %63 = vector.load %arg7[%c464, %c0_35] : memref<496x32xbf16, #tpu.memory_space<vmem>>, vector<16x32xbf16>
    tpu.vector_store %arg7[%c464, %c0_35], %62 {strides = array<i32>} : memref<496x32xbf16, #tpu.memory_space<vmem>>, vector<16x32xbf16>,
    %64 = vector.extract_strided_slice %3 {offsets = [0, 14], sizes = [16, 32], strides = [1, 1]} : vector<16x47xbf16> to vector<16x32xbf16>
    %c480 = arith.constant 480 : index
    %c0_36 = arith.constant 0 : index
    %65 = vector.load %arg7[%c480, %c0_36] : memref<496x32xbf16, #tpu.memory_space<vmem>>, vector<16x32xbf16>
    tpu.vector_store %arg7[%c480, %c0_36], %64 {strides = array<i32>} : memref<496x32xbf16, #tpu.memory_space<vmem>>, vector<16x32xbf16>,
    %c0_37 = arith.constant 0 : index
    %c0_38 = arith.constant 0 : index
    %66 = vector.load %arg3[%c0_37, %c0_38] : memref<32x496xbf16, #tpu.memory_space<vmem>>, vector<32x496xbf16>
    %c0_39 = arith.constant 0 : index
    %c0_40 = arith.constant 0 : index
    %67 = vector.load %arg7[%c0_39, %c0_40] : memref<496x32xbf16, #tpu.memory_space<vmem>>, vector<496x32xbf16>
    %cst = arith.constant dense<0.000000e+00> : vector<32x32xf32>
    %68 = tpu.matmul %66, %67, %cst {dimension_numbers = #tpu.dot_dimension_numbers<[1], [0], [0], [1], [0, 0, 1, 1], [], []>} : vector<32x496xbf16>, vector<496x32xbf16>, vector<32x32xf32> -> vector<32x32xf32>
    %c0_41 = arith.constant 0 : index
    %c0_42 = arith.constant 0 : index
    %69 = vector.load %arg4[%c0_41, %c0_42] : memref<32x1xf32, #tpu.memory_space<vmem>>, vector<32x1xf32>
    %70 = vector.broadcast %69 : vector<32x1xf32> to vector<32x32xf32>
    %71 = arith.addf %68, %70 : vector<32x32xf32>
    %c0_43 = arith.constant 0 : index
    %72 = memref.load %arg5[%c0_43] : memref<1xf32, #tpu.memory_space<smem>>
    %cst_44 = arith.constant 0.000000e+00 : f32
    %73 = vector.broadcast %cst_44 : f32 to vector<32x32xf32>
    %74 = arith.cmpf ogt, %71, %73 : vector<32x32xf32>
    %75 = vector.broadcast %72 : f32 to vector<32x32xf32>
    %76 = arith.mulf %75, %71 : vector<32x32xf32>
    %77 = arith.select %74, %71, %76 : vector<32x32xi1>, vector<32x32xf32>
    %78 = arith.truncf %77 : vector<32x32xf32> to vector<32x32xbf16>
    %c0_45 = arith.constant 0 : index
    %c0_46 = arith.constant 0 : index
    %c0_47 = arith.constant 0 : index
    %79 = vector.load %arg6[%c0_45, %c0_46, %c0_47] : memref<1x32x32xbf16, #tpu.memory_space<vmem>>, vector<1x32x32xbf16>
    %80 = vector.shape_cast %79 : vector<1x32x32xbf16> to vector<32x32xbf16>
    %81 = vector.shape_cast %78 : vector<32x32xbf16> to vector<1x32x32xbf16>
    tpu.vector_store %arg6[%c0_45, %c0_46, %c0_47], %81 {strides = array<i32>} : memref<1x32x32xbf16, #tpu.memory_space<vmem>>, vector<1x32x32xbf16>,
    return
  }
  func.func @transform_0(%arg0: i32) -> (i32, i32, i32) {
    %c0_i32 = arith.constant 0 : i32
    %c0_i32_0 = arith.constant 0 : i32
    %c0_i32_1 = arith.constant 0 : i32
    return %arg0, %c0_i32, %c0_i32_0 : i32, i32, i32
  }
  func.func @transform_1(%arg0: i32) -> (i32, i32, i32) {
    %c0_i32 = arith.constant 0 : i32
    %c0_i32_0 = arith.constant 0 : i32
    %c0_i32_1 = arith.constant 0 : i32
    return %arg0, %c0_i32, %c0_i32_0 : i32, i32, i32
  }
  func.func @transform_2(%arg0: i32) -> (i32, i32) {
    %c0_i32 = arith.constant 0 : i32
    %c0_i32_0 = arith.constant 0 : i32
    %c0_i32_1 = arith.constant 0 : i32
    return %c0_i32, %c0_i32_0 : i32, i32
  }
  func.func @transform_3(%arg0: i32) -> (i32, i32) {
    %c0_i32 = arith.constant 0 : i32
    %c0_i32_0 = arith.constant 0 : i32
    %c0_i32_1 = arith.constant 0 : i32
    return %c0_i32, %c0_i32_0 : i32, i32
  }
  func.func @transform_4(%arg0: i32) -> i32 {
    %c0_i32 = arith.constant 0 : i32
    %c0_i32_0 = arith.constant 0 : i32
    return %c0_i32 : i32
  }
  func.func @transform_5(%arg0: i32) -> (i32, i32, i32) {
    %c0_i32 = arith.constant 0 : i32
    %c0_i32_0 = arith.constant 0 : i32
    %c0_i32_1 = arith.constant 0 : i32
    return %arg0, %c0_i32, %c0_i32_0 : i32, i32, i32
  }
}

module attributes {stable_mosaic.version = 11 : i64} {
  func.func @_dec_convt_prelu_kernel(%arg0: i32, %arg1: memref<1x64x47xbf16, #tpu.memory_space<vmem>>, %arg2: memref<32x1024xbf16, #tpu.memory_space<vmem>>, %arg3: memref<32x1xf32, #tpu.memory_space<vmem>>, %arg4: memref<1xf32, #tpu.memory_space<smem>>, %arg5: memref<1x32x32xbf16, #tpu.memory_space<vmem>>, %arg6: memref<1024x32xbf16, #tpu.memory_space<vmem>>) attributes {dimension_semantics = [#tpu.dimension_semantics<parallel>], iteration_bounds = array<i64: 2>, scalar_prefetch = 0 : i64, scratch_operands = 1 : i64, tpu.core_type = #tpu.core_type<tc>, window_params = [{transform_indices = @transform_0, window_bounds = array<i64: 1, 64, 47>}, {pipeline_mode = #tpu.pipeline_mode<synchronous>, transform_indices = @transform_1, window_bounds = array<i64: 32, 1024>}, {pipeline_mode = #tpu.pipeline_mode<synchronous>, transform_indices = @transform_2, window_bounds = array<i64: 32, 1>}, {transform_indices = @transform_3, window_bounds = array<i64: 1>}, {transform_indices = @transform_4, window_bounds = array<i64: 1, 32, 32>}]} {
    %c0 = arith.constant 0 : index
    %c0_0 = arith.constant 0 : index
    %c0_1 = arith.constant 0 : index
    %0 = vector.load %arg1[%c0, %c0_0, %c0_1] : memref<1x64x47xbf16, #tpu.memory_space<vmem>>, vector<1x64x47xbf16>
    %1 = vector.shape_cast %0 : vector<1x64x47xbf16> to vector<64x47xbf16>
    %2 = vector.extract_strided_slice %1 {offsets = [0, 0], sizes = [64, 32], strides = [1, 1]} : vector<64x47xbf16> to vector<64x32xbf16>
    %c0_2 = arith.constant 0 : index
    %c0_3 = arith.constant 0 : index
    %3 = vector.load %arg6[%c0_2, %c0_3] : memref<1024x32xbf16, #tpu.memory_space<vmem>>, vector<64x32xbf16>
    tpu.vector_store %arg6[%c0_2, %c0_3], %2 {strides = array<i32>} : memref<1024x32xbf16, #tpu.memory_space<vmem>>, vector<64x32xbf16>,
    %4 = vector.extract_strided_slice %1 {offsets = [0, 1], sizes = [64, 32], strides = [1, 1]} : vector<64x47xbf16> to vector<64x32xbf16>
    %c64 = arith.constant 64 : index
    %c0_4 = arith.constant 0 : index
    %5 = vector.load %arg6[%c64, %c0_4] : memref<1024x32xbf16, #tpu.memory_space<vmem>>, vector<64x32xbf16>
    tpu.vector_store %arg6[%c64, %c0_4], %4 {strides = array<i32>} : memref<1024x32xbf16, #tpu.memory_space<vmem>>, vector<64x32xbf16>,
    %6 = vector.extract_strided_slice %1 {offsets = [0, 2], sizes = [64, 32], strides = [1, 1]} : vector<64x47xbf16> to vector<64x32xbf16>
    %c128 = arith.constant 128 : index
    %c0_5 = arith.constant 0 : index
    %7 = vector.load %arg6[%c128, %c0_5] : memref<1024x32xbf16, #tpu.memory_space<vmem>>, vector<64x32xbf16>
    tpu.vector_store %arg6[%c128, %c0_5], %6 {strides = array<i32>} : memref<1024x32xbf16, #tpu.memory_space<vmem>>, vector<64x32xbf16>,
    %8 = vector.extract_strided_slice %1 {offsets = [0, 3], sizes = [64, 32], strides = [1, 1]} : vector<64x47xbf16> to vector<64x32xbf16>
    %c192 = arith.constant 192 : index
    %c0_6 = arith.constant 0 : index
    %9 = vector.load %arg6[%c192, %c0_6] : memref<1024x32xbf16, #tpu.memory_space<vmem>>, vector<64x32xbf16>
    tpu.vector_store %arg6[%c192, %c0_6], %8 {strides = array<i32>} : memref<1024x32xbf16, #tpu.memory_space<vmem>>, vector<64x32xbf16>,
    %10 = vector.extract_strided_slice %1 {offsets = [0, 4], sizes = [64, 32], strides = [1, 1]} : vector<64x47xbf16> to vector<64x32xbf16>
    %c256 = arith.constant 256 : index
    %c0_7 = arith.constant 0 : index
    %11 = vector.load %arg6[%c256, %c0_7] : memref<1024x32xbf16, #tpu.memory_space<vmem>>, vector<64x32xbf16>
    tpu.vector_store %arg6[%c256, %c0_7], %10 {strides = array<i32>} : memref<1024x32xbf16, #tpu.memory_space<vmem>>, vector<64x32xbf16>,
    %12 = vector.extract_strided_slice %1 {offsets = [0, 5], sizes = [64, 32], strides = [1, 1]} : vector<64x47xbf16> to vector<64x32xbf16>
    %c320 = arith.constant 320 : index
    %c0_8 = arith.constant 0 : index
    %13 = vector.load %arg6[%c320, %c0_8] : memref<1024x32xbf16, #tpu.memory_space<vmem>>, vector<64x32xbf16>
    tpu.vector_store %arg6[%c320, %c0_8], %12 {strides = array<i32>} : memref<1024x32xbf16, #tpu.memory_space<vmem>>, vector<64x32xbf16>,
    %14 = vector.extract_strided_slice %1 {offsets = [0, 6], sizes = [64, 32], strides = [1, 1]} : vector<64x47xbf16> to vector<64x32xbf16>
    %c384 = arith.constant 384 : index
    %c0_9 = arith.constant 0 : index
    %15 = vector.load %arg6[%c384, %c0_9] : memref<1024x32xbf16, #tpu.memory_space<vmem>>, vector<64x32xbf16>
    tpu.vector_store %arg6[%c384, %c0_9], %14 {strides = array<i32>} : memref<1024x32xbf16, #tpu.memory_space<vmem>>, vector<64x32xbf16>,
    %16 = vector.extract_strided_slice %1 {offsets = [0, 7], sizes = [64, 32], strides = [1, 1]} : vector<64x47xbf16> to vector<64x32xbf16>
    %c448 = arith.constant 448 : index
    %c0_10 = arith.constant 0 : index
    %17 = vector.load %arg6[%c448, %c0_10] : memref<1024x32xbf16, #tpu.memory_space<vmem>>, vector<64x32xbf16>
    tpu.vector_store %arg6[%c448, %c0_10], %16 {strides = array<i32>} : memref<1024x32xbf16, #tpu.memory_space<vmem>>, vector<64x32xbf16>,
    %18 = vector.extract_strided_slice %1 {offsets = [0, 8], sizes = [64, 32], strides = [1, 1]} : vector<64x47xbf16> to vector<64x32xbf16>
    %c512 = arith.constant 512 : index
    %c0_11 = arith.constant 0 : index
    %19 = vector.load %arg6[%c512, %c0_11] : memref<1024x32xbf16, #tpu.memory_space<vmem>>, vector<64x32xbf16>
    tpu.vector_store %arg6[%c512, %c0_11], %18 {strides = array<i32>} : memref<1024x32xbf16, #tpu.memory_space<vmem>>, vector<64x32xbf16>,
    %20 = vector.extract_strided_slice %1 {offsets = [0, 9], sizes = [64, 32], strides = [1, 1]} : vector<64x47xbf16> to vector<64x32xbf16>
    %c576 = arith.constant 576 : index
    %c0_12 = arith.constant 0 : index
    %21 = vector.load %arg6[%c576, %c0_12] : memref<1024x32xbf16, #tpu.memory_space<vmem>>, vector<64x32xbf16>
    tpu.vector_store %arg6[%c576, %c0_12], %20 {strides = array<i32>} : memref<1024x32xbf16, #tpu.memory_space<vmem>>, vector<64x32xbf16>,
    %22 = vector.extract_strided_slice %1 {offsets = [0, 10], sizes = [64, 32], strides = [1, 1]} : vector<64x47xbf16> to vector<64x32xbf16>
    %c640 = arith.constant 640 : index
    %c0_13 = arith.constant 0 : index
    %23 = vector.load %arg6[%c640, %c0_13] : memref<1024x32xbf16, #tpu.memory_space<vmem>>, vector<64x32xbf16>
    tpu.vector_store %arg6[%c640, %c0_13], %22 {strides = array<i32>} : memref<1024x32xbf16, #tpu.memory_space<vmem>>, vector<64x32xbf16>,
    %24 = vector.extract_strided_slice %1 {offsets = [0, 11], sizes = [64, 32], strides = [1, 1]} : vector<64x47xbf16> to vector<64x32xbf16>
    %c704 = arith.constant 704 : index
    %c0_14 = arith.constant 0 : index
    %25 = vector.load %arg6[%c704, %c0_14] : memref<1024x32xbf16, #tpu.memory_space<vmem>>, vector<64x32xbf16>
    tpu.vector_store %arg6[%c704, %c0_14], %24 {strides = array<i32>} : memref<1024x32xbf16, #tpu.memory_space<vmem>>, vector<64x32xbf16>,
    %26 = vector.extract_strided_slice %1 {offsets = [0, 12], sizes = [64, 32], strides = [1, 1]} : vector<64x47xbf16> to vector<64x32xbf16>
    %c768 = arith.constant 768 : index
    %c0_15 = arith.constant 0 : index
    %27 = vector.load %arg6[%c768, %c0_15] : memref<1024x32xbf16, #tpu.memory_space<vmem>>, vector<64x32xbf16>
    tpu.vector_store %arg6[%c768, %c0_15], %26 {strides = array<i32>} : memref<1024x32xbf16, #tpu.memory_space<vmem>>, vector<64x32xbf16>,
    %28 = vector.extract_strided_slice %1 {offsets = [0, 13], sizes = [64, 32], strides = [1, 1]} : vector<64x47xbf16> to vector<64x32xbf16>
    %c832 = arith.constant 832 : index
    %c0_16 = arith.constant 0 : index
    %29 = vector.load %arg6[%c832, %c0_16] : memref<1024x32xbf16, #tpu.memory_space<vmem>>, vector<64x32xbf16>
    tpu.vector_store %arg6[%c832, %c0_16], %28 {strides = array<i32>} : memref<1024x32xbf16, #tpu.memory_space<vmem>>, vector<64x32xbf16>,
    %30 = vector.extract_strided_slice %1 {offsets = [0, 14], sizes = [64, 32], strides = [1, 1]} : vector<64x47xbf16> to vector<64x32xbf16>
    %c896 = arith.constant 896 : index
    %c0_17 = arith.constant 0 : index
    %31 = vector.load %arg6[%c896, %c0_17] : memref<1024x32xbf16, #tpu.memory_space<vmem>>, vector<64x32xbf16>
    tpu.vector_store %arg6[%c896, %c0_17], %30 {strides = array<i32>} : memref<1024x32xbf16, #tpu.memory_space<vmem>>, vector<64x32xbf16>,
    %32 = vector.extract_strided_slice %1 {offsets = [0, 15], sizes = [64, 32], strides = [1, 1]} : vector<64x47xbf16> to vector<64x32xbf16>
    %c960 = arith.constant 960 : index
    %c0_18 = arith.constant 0 : index
    %33 = vector.load %arg6[%c960, %c0_18] : memref<1024x32xbf16, #tpu.memory_space<vmem>>, vector<64x32xbf16>
    tpu.vector_store %arg6[%c960, %c0_18], %32 {strides = array<i32>} : memref<1024x32xbf16, #tpu.memory_space<vmem>>, vector<64x32xbf16>,
    %c0_19 = arith.constant 0 : index
    %c0_20 = arith.constant 0 : index
    %34 = vector.load %arg2[%c0_19, %c0_20] : memref<32x1024xbf16, #tpu.memory_space<vmem>>, vector<32x1024xbf16>
    %c0_21 = arith.constant 0 : index
    %c0_22 = arith.constant 0 : index
    %35 = vector.load %arg6[%c0_21, %c0_22] : memref<1024x32xbf16, #tpu.memory_space<vmem>>, vector<1024x32xbf16>
    %cst = arith.constant dense<0.000000e+00> : vector<32x32xf32>
    %36 = tpu.matmul %34, %35, %cst {dimension_numbers = #tpu.dot_dimension_numbers<[1], [0], [0], [1], [0, 0, 1, 1], [], []>} : vector<32x1024xbf16>, vector<1024x32xbf16>, vector<32x32xf32> -> vector<32x32xf32>
    %c0_23 = arith.constant 0 : index
    %c0_24 = arith.constant 0 : index
    %37 = vector.load %arg3[%c0_23, %c0_24] : memref<32x1xf32, #tpu.memory_space<vmem>>, vector<32x1xf32>
    %38 = vector.broadcast %37 : vector<32x1xf32> to vector<32x32xf32>
    %39 = arith.addf %36, %38 : vector<32x32xf32>
    %c0_25 = arith.constant 0 : index
    %40 = memref.load %arg4[%c0_25] : memref<1xf32, #tpu.memory_space<smem>>
    %cst_26 = arith.constant 0.000000e+00 : f32
    %41 = vector.broadcast %cst_26 : f32 to vector<32x32xf32>
    %42 = arith.cmpf ogt, %39, %41 : vector<32x32xf32>
    %43 = vector.broadcast %40 : f32 to vector<32x32xf32>
    %44 = arith.mulf %43, %39 : vector<32x32xf32>
    %45 = arith.select %42, %39, %44 : vector<32x32xi1>, vector<32x32xf32>
    %46 = arith.truncf %45 : vector<32x32xf32> to vector<32x32xbf16>
    %c0_27 = arith.constant 0 : index
    %c0_28 = arith.constant 0 : index
    %c0_29 = arith.constant 0 : index
    %47 = vector.load %arg5[%c0_27, %c0_28, %c0_29] : memref<1x32x32xbf16, #tpu.memory_space<vmem>>, vector<1x32x32xbf16>
    %48 = vector.shape_cast %47 : vector<1x32x32xbf16> to vector<32x32xbf16>
    %49 = vector.shape_cast %46 : vector<32x32xbf16> to vector<1x32x32xbf16>
    tpu.vector_store %arg5[%c0_27, %c0_28, %c0_29], %49 {strides = array<i32>} : memref<1x32x32xbf16, #tpu.memory_space<vmem>>, vector<1x32x32xbf16>,
    return
  }
  func.func @transform_0(%arg0: i32) -> (i32, i32, i32) {
    %c0_i32 = arith.constant 0 : i32
    %c0_i32_0 = arith.constant 0 : i32
    %c0_i32_1 = arith.constant 0 : i32
    return %arg0, %c0_i32, %c0_i32_0 : i32, i32, i32
  }
  func.func @transform_1(%arg0: i32) -> (i32, i32) {
    %c0_i32 = arith.constant 0 : i32
    %c0_i32_0 = arith.constant 0 : i32
    %c0_i32_1 = arith.constant 0 : i32
    return %c0_i32, %c0_i32_0 : i32, i32
  }
  func.func @transform_2(%arg0: i32) -> (i32, i32) {
    %c0_i32 = arith.constant 0 : i32
    %c0_i32_0 = arith.constant 0 : i32
    %c0_i32_1 = arith.constant 0 : i32
    return %c0_i32, %c0_i32_0 : i32, i32
  }
  func.func @transform_3(%arg0: i32) -> i32 {
    %c0_i32 = arith.constant 0 : i32
    %c0_i32_0 = arith.constant 0 : i32
    return %c0_i32 : i32
  }
  func.func @transform_4(%arg0: i32) -> (i32, i32, i32) {
    %c0_i32 = arith.constant 0 : i32
    %c0_i32_0 = arith.constant 0 : i32
    %c0_i32_1 = arith.constant 0 : i32
    return %arg0, %c0_i32, %c0_i32_0 : i32, i32, i32
  }
}

module attributes {stable_mosaic.version = 11 : i64} {
  func.func @_dec_convt_prelu_kernel(%arg0: i32, %arg1: memref<1x32x79xbf16, #tpu.memory_space<vmem>>, %arg2: memref<16x512xbf16, #tpu.memory_space<vmem>>, %arg3: memref<16x1xf32, #tpu.memory_space<vmem>>, %arg4: memref<1xf32, #tpu.memory_space<smem>>, %arg5: memref<1x16x64xbf16, #tpu.memory_space<vmem>>, %arg6: memref<512x64xbf16, #tpu.memory_space<vmem>>) attributes {dimension_semantics = [#tpu.dimension_semantics<parallel>], iteration_bounds = array<i64: 2>, scalar_prefetch = 0 : i64, scratch_operands = 1 : i64, tpu.core_type = #tpu.core_type<tc>, window_params = [{transform_indices = @transform_0, window_bounds = array<i64: 1, 32, 79>}, {pipeline_mode = #tpu.pipeline_mode<synchronous>, transform_indices = @transform_1, window_bounds = array<i64: 16, 512>}, {pipeline_mode = #tpu.pipeline_mode<synchronous>, transform_indices = @transform_2, window_bounds = array<i64: 16, 1>}, {transform_indices = @transform_3, window_bounds = array<i64: 1>}, {transform_indices = @transform_4, window_bounds = array<i64: 1, 16, 64>}]} {
    %c0 = arith.constant 0 : index
    %c0_0 = arith.constant 0 : index
    %c0_1 = arith.constant 0 : index
    %0 = vector.load %arg1[%c0, %c0_0, %c0_1] : memref<1x32x79xbf16, #tpu.memory_space<vmem>>, vector<1x32x79xbf16>
    %1 = vector.shape_cast %0 : vector<1x32x79xbf16> to vector<32x79xbf16>
    %2 = vector.extract_strided_slice %1 {offsets = [0, 0], sizes = [32, 64], strides = [1, 1]} : vector<32x79xbf16> to vector<32x64xbf16>
    %c0_2 = arith.constant 0 : index
    %c0_3 = arith.constant 0 : index
    %3 = vector.load %arg6[%c0_2, %c0_3] : memref<512x64xbf16, #tpu.memory_space<vmem>>, vector<32x64xbf16>
    tpu.vector_store %arg6[%c0_2, %c0_3], %2 {strides = array<i32>} : memref<512x64xbf16, #tpu.memory_space<vmem>>, vector<32x64xbf16>,
    %4 = vector.extract_strided_slice %1 {offsets = [0, 1], sizes = [32, 64], strides = [1, 1]} : vector<32x79xbf16> to vector<32x64xbf16>
    %c32 = arith.constant 32 : index
    %c0_4 = arith.constant 0 : index
    %5 = vector.load %arg6[%c32, %c0_4] : memref<512x64xbf16, #tpu.memory_space<vmem>>, vector<32x64xbf16>
    tpu.vector_store %arg6[%c32, %c0_4], %4 {strides = array<i32>} : memref<512x64xbf16, #tpu.memory_space<vmem>>, vector<32x64xbf16>,
    %6 = vector.extract_strided_slice %1 {offsets = [0, 2], sizes = [32, 64], strides = [1, 1]} : vector<32x79xbf16> to vector<32x64xbf16>
    %c64 = arith.constant 64 : index
    %c0_5 = arith.constant 0 : index
    %7 = vector.load %arg6[%c64, %c0_5] : memref<512x64xbf16, #tpu.memory_space<vmem>>, vector<32x64xbf16>
    tpu.vector_store %arg6[%c64, %c0_5], %6 {strides = array<i32>} : memref<512x64xbf16, #tpu.memory_space<vmem>>, vector<32x64xbf16>,
    %8 = vector.extract_strided_slice %1 {offsets = [0, 3], sizes = [32, 64], strides = [1, 1]} : vector<32x79xbf16> to vector<32x64xbf16>
    %c96 = arith.constant 96 : index
    %c0_6 = arith.constant 0 : index
    %9 = vector.load %arg6[%c96, %c0_6] : memref<512x64xbf16, #tpu.memory_space<vmem>>, vector<32x64xbf16>
    tpu.vector_store %arg6[%c96, %c0_6], %8 {strides = array<i32>} : memref<512x64xbf16, #tpu.memory_space<vmem>>, vector<32x64xbf16>,
    %10 = vector.extract_strided_slice %1 {offsets = [0, 4], sizes = [32, 64], strides = [1, 1]} : vector<32x79xbf16> to vector<32x64xbf16>
    %c128 = arith.constant 128 : index
    %c0_7 = arith.constant 0 : index
    %11 = vector.load %arg6[%c128, %c0_7] : memref<512x64xbf16, #tpu.memory_space<vmem>>, vector<32x64xbf16>
    tpu.vector_store %arg6[%c128, %c0_7], %10 {strides = array<i32>} : memref<512x64xbf16, #tpu.memory_space<vmem>>, vector<32x64xbf16>,
    %12 = vector.extract_strided_slice %1 {offsets = [0, 5], sizes = [32, 64], strides = [1, 1]} : vector<32x79xbf16> to vector<32x64xbf16>
    %c160 = arith.constant 160 : index
    %c0_8 = arith.constant 0 : index
    %13 = vector.load %arg6[%c160, %c0_8] : memref<512x64xbf16, #tpu.memory_space<vmem>>, vector<32x64xbf16>
    tpu.vector_store %arg6[%c160, %c0_8], %12 {strides = array<i32>} : memref<512x64xbf16, #tpu.memory_space<vmem>>, vector<32x64xbf16>,
    %14 = vector.extract_strided_slice %1 {offsets = [0, 6], sizes = [32, 64], strides = [1, 1]} : vector<32x79xbf16> to vector<32x64xbf16>
    %c192 = arith.constant 192 : index
    %c0_9 = arith.constant 0 : index
    %15 = vector.load %arg6[%c192, %c0_9] : memref<512x64xbf16, #tpu.memory_space<vmem>>, vector<32x64xbf16>
    tpu.vector_store %arg6[%c192, %c0_9], %14 {strides = array<i32>} : memref<512x64xbf16, #tpu.memory_space<vmem>>, vector<32x64xbf16>,
    %16 = vector.extract_strided_slice %1 {offsets = [0, 7], sizes = [32, 64], strides = [1, 1]} : vector<32x79xbf16> to vector<32x64xbf16>
    %c224 = arith.constant 224 : index
    %c0_10 = arith.constant 0 : index
    %17 = vector.load %arg6[%c224, %c0_10] : memref<512x64xbf16, #tpu.memory_space<vmem>>, vector<32x64xbf16>
    tpu.vector_store %arg6[%c224, %c0_10], %16 {strides = array<i32>} : memref<512x64xbf16, #tpu.memory_space<vmem>>, vector<32x64xbf16>,
    %18 = vector.extract_strided_slice %1 {offsets = [0, 8], sizes = [32, 64], strides = [1, 1]} : vector<32x79xbf16> to vector<32x64xbf16>
    %c256 = arith.constant 256 : index
    %c0_11 = arith.constant 0 : index
    %19 = vector.load %arg6[%c256, %c0_11] : memref<512x64xbf16, #tpu.memory_space<vmem>>, vector<32x64xbf16>
    tpu.vector_store %arg6[%c256, %c0_11], %18 {strides = array<i32>} : memref<512x64xbf16, #tpu.memory_space<vmem>>, vector<32x64xbf16>,
    %20 = vector.extract_strided_slice %1 {offsets = [0, 9], sizes = [32, 64], strides = [1, 1]} : vector<32x79xbf16> to vector<32x64xbf16>
    %c288 = arith.constant 288 : index
    %c0_12 = arith.constant 0 : index
    %21 = vector.load %arg6[%c288, %c0_12] : memref<512x64xbf16, #tpu.memory_space<vmem>>, vector<32x64xbf16>
    tpu.vector_store %arg6[%c288, %c0_12], %20 {strides = array<i32>} : memref<512x64xbf16, #tpu.memory_space<vmem>>, vector<32x64xbf16>,
    %22 = vector.extract_strided_slice %1 {offsets = [0, 10], sizes = [32, 64], strides = [1, 1]} : vector<32x79xbf16> to vector<32x64xbf16>
    %c320 = arith.constant 320 : index
    %c0_13 = arith.constant 0 : index
    %23 = vector.load %arg6[%c320, %c0_13] : memref<512x64xbf16, #tpu.memory_space<vmem>>, vector<32x64xbf16>
    tpu.vector_store %arg6[%c320, %c0_13], %22 {strides = array<i32>} : memref<512x64xbf16, #tpu.memory_space<vmem>>, vector<32x64xbf16>,
    %24 = vector.extract_strided_slice %1 {offsets = [0, 11], sizes = [32, 64], strides = [1, 1]} : vector<32x79xbf16> to vector<32x64xbf16>
    %c352 = arith.constant 352 : index
    %c0_14 = arith.constant 0 : index
    %25 = vector.load %arg6[%c352, %c0_14] : memref<512x64xbf16, #tpu.memory_space<vmem>>, vector<32x64xbf16>
    tpu.vector_store %arg6[%c352, %c0_14], %24 {strides = array<i32>} : memref<512x64xbf16, #tpu.memory_space<vmem>>, vector<32x64xbf16>,
    %26 = vector.extract_strided_slice %1 {offsets = [0, 12], sizes = [32, 64], strides = [1, 1]} : vector<32x79xbf16> to vector<32x64xbf16>
    %c384 = arith.constant 384 : index
    %c0_15 = arith.constant 0 : index
    %27 = vector.load %arg6[%c384, %c0_15] : memref<512x64xbf16, #tpu.memory_space<vmem>>, vector<32x64xbf16>
    tpu.vector_store %arg6[%c384, %c0_15], %26 {strides = array<i32>} : memref<512x64xbf16, #tpu.memory_space<vmem>>, vector<32x64xbf16>,
    %28 = vector.extract_strided_slice %1 {offsets = [0, 13], sizes = [32, 64], strides = [1, 1]} : vector<32x79xbf16> to vector<32x64xbf16>
    %c416 = arith.constant 416 : index
    %c0_16 = arith.constant 0 : index
    %29 = vector.load %arg6[%c416, %c0_16] : memref<512x64xbf16, #tpu.memory_space<vmem>>, vector<32x64xbf16>
    tpu.vector_store %arg6[%c416, %c0_16], %28 {strides = array<i32>} : memref<512x64xbf16, #tpu.memory_space<vmem>>, vector<32x64xbf16>,
    %30 = vector.extract_strided_slice %1 {offsets = [0, 14], sizes = [32, 64], strides = [1, 1]} : vector<32x79xbf16> to vector<32x64xbf16>
    %c448 = arith.constant 448 : index
    %c0_17 = arith.constant 0 : index
    %31 = vector.load %arg6[%c448, %c0_17] : memref<512x64xbf16, #tpu.memory_space<vmem>>, vector<32x64xbf16>
    tpu.vector_store %arg6[%c448, %c0_17], %30 {strides = array<i32>} : memref<512x64xbf16, #tpu.memory_space<vmem>>, vector<32x64xbf16>,
    %32 = vector.extract_strided_slice %1 {offsets = [0, 15], sizes = [32, 64], strides = [1, 1]} : vector<32x79xbf16> to vector<32x64xbf16>
    %c480 = arith.constant 480 : index
    %c0_18 = arith.constant 0 : index
    %33 = vector.load %arg6[%c480, %c0_18] : memref<512x64xbf16, #tpu.memory_space<vmem>>, vector<32x64xbf16>
    tpu.vector_store %arg6[%c480, %c0_18], %32 {strides = array<i32>} : memref<512x64xbf16, #tpu.memory_space<vmem>>, vector<32x64xbf16>,
    %c0_19 = arith.constant 0 : index
    %c0_20 = arith.constant 0 : index
    %34 = vector.load %arg2[%c0_19, %c0_20] : memref<16x512xbf16, #tpu.memory_space<vmem>>, vector<16x512xbf16>
    %c0_21 = arith.constant 0 : index
    %c0_22 = arith.constant 0 : index
    %35 = vector.load %arg6[%c0_21, %c0_22] : memref<512x64xbf16, #tpu.memory_space<vmem>>, vector<512x64xbf16>
    %cst = arith.constant dense<0.000000e+00> : vector<16x64xf32>
    %36 = tpu.matmul %34, %35, %cst {dimension_numbers = #tpu.dot_dimension_numbers<[1], [0], [0], [1], [0, 0, 1, 1], [], []>} : vector<16x512xbf16>, vector<512x64xbf16>, vector<16x64xf32> -> vector<16x64xf32>
    %c0_23 = arith.constant 0 : index
    %c0_24 = arith.constant 0 : index
    %37 = vector.load %arg3[%c0_23, %c0_24] : memref<16x1xf32, #tpu.memory_space<vmem>>, vector<16x1xf32>
    %38 = vector.broadcast %37 : vector<16x1xf32> to vector<16x64xf32>
    %39 = arith.addf %36, %38 : vector<16x64xf32>
    %c0_25 = arith.constant 0 : index
    %40 = memref.load %arg4[%c0_25] : memref<1xf32, #tpu.memory_space<smem>>
    %cst_26 = arith.constant 0.000000e+00 : f32
    %41 = vector.broadcast %cst_26 : f32 to vector<16x64xf32>
    %42 = arith.cmpf ogt, %39, %41 : vector<16x64xf32>
    %43 = vector.broadcast %40 : f32 to vector<16x64xf32>
    %44 = arith.mulf %43, %39 : vector<16x64xf32>
    %45 = arith.select %42, %39, %44 : vector<16x64xi1>, vector<16x64xf32>
    %46 = arith.truncf %45 : vector<16x64xf32> to vector<16x64xbf16>
    %c0_27 = arith.constant 0 : index
    %c0_28 = arith.constant 0 : index
    %c0_29 = arith.constant 0 : index
    %47 = vector.load %arg5[%c0_27, %c0_28, %c0_29] : memref<1x16x64xbf16, #tpu.memory_space<vmem>>, vector<1x16x64xbf16>
    %48 = vector.shape_cast %47 : vector<1x16x64xbf16> to vector<16x64xbf16>
    %49 = vector.shape_cast %46 : vector<16x64xbf16> to vector<1x16x64xbf16>
    tpu.vector_store %arg5[%c0_27, %c0_28, %c0_29], %49 {strides = array<i32>} : memref<1x16x64xbf16, #tpu.memory_space<vmem>>, vector<1x16x64xbf16>,
    return
  }
  func.func @transform_0(%arg0: i32) -> (i32, i32, i32) {
    %c0_i32 = arith.constant 0 : i32
    %c0_i32_0 = arith.constant 0 : i32
    %c0_i32_1 = arith.constant 0 : i32
    return %arg0, %c0_i32, %c0_i32_0 : i32, i32, i32
  }
  func.func @transform_1(%arg0: i32) -> (i32, i32) {
    %c0_i32 = arith.constant 0 : i32
    %c0_i32_0 = arith.constant 0 : i32
    %c0_i32_1 = arith.constant 0 : i32
    return %c0_i32, %c0_i32_0 : i32, i32
  }
  func.func @transform_2(%arg0: i32) -> (i32, i32) {
    %c0_i32 = arith.constant 0 : i32
    %c0_i32_0 = arith.constant 0 : i32
    %c0_i32_1 = arith.constant 0 : i32
    return %c0_i32, %c0_i32_0 : i32, i32
  }
  func.func @transform_3(%arg0: i32) -> i32 {
    %c0_i32 = arith.constant 0 : i32
    %c0_i32_0 = arith.constant 0 : i32
    return %c0_i32 : i32
  }
  func.func @transform_4(%arg0: i32) -> (i32, i32, i32) {
    %c0_i32 = arith.constant 0 : i32
    %c0_i32_0 = arith.constant 0 : i32
    %c0_i32_1 = arith.constant 0 : i32
    return %arg0, %c0_i32, %c0_i32_0 : i32, i32, i32
  }
}

module attributes {stable_mosaic.version = 11 : i64} {
  func.func @_dec_convt_prelu_kernel(%arg0: i32, %arg1: memref<1x16x143xbf16, #tpu.memory_space<vmem>>, %arg2: memref<2x256xbf16, #tpu.memory_space<vmem>>, %arg3: memref<2x1xf32, #tpu.memory_space<vmem>>, %arg4: memref<1xf32, #tpu.memory_space<smem>>, %arg5: memref<1x2x128xbf16, #tpu.memory_space<vmem>>, %arg6: memref<256x128xbf16, #tpu.memory_space<vmem>>) attributes {dimension_semantics = [#tpu.dimension_semantics<parallel>], iteration_bounds = array<i64: 2>, scalar_prefetch = 0 : i64, scratch_operands = 1 : i64, tpu.core_type = #tpu.core_type<tc>, window_params = [{transform_indices = @transform_0, window_bounds = array<i64: 1, 16, 143>}, {pipeline_mode = #tpu.pipeline_mode<synchronous>, transform_indices = @transform_1, window_bounds = array<i64: 2, 256>}, {pipeline_mode = #tpu.pipeline_mode<synchronous>, transform_indices = @transform_2, window_bounds = array<i64: 2, 1>}, {transform_indices = @transform_3, window_bounds = array<i64: 1>}, {transform_indices = @transform_4, window_bounds = array<i64: 1, 2, 128>}]} {
    %c0 = arith.constant 0 : index
    %c0_0 = arith.constant 0 : index
    %c0_1 = arith.constant 0 : index
    %0 = vector.load %arg1[%c0, %c0_0, %c0_1] : memref<1x16x143xbf16, #tpu.memory_space<vmem>>, vector<1x16x143xbf16>
    %1 = vector.shape_cast %0 : vector<1x16x143xbf16> to vector<16x143xbf16>
    %2 = vector.extract_strided_slice %1 {offsets = [0, 0], sizes = [16, 128], strides = [1, 1]} : vector<16x143xbf16> to vector<16x128xbf16>
    %c0_2 = arith.constant 0 : index
    %c0_3 = arith.constant 0 : index
    %3 = vector.load %arg6[%c0_2, %c0_3] : memref<256x128xbf16, #tpu.memory_space<vmem>>, vector<16x128xbf16>
    tpu.vector_store %arg6[%c0_2, %c0_3], %2 {strides = array<i32>} : memref<256x128xbf16, #tpu.memory_space<vmem>>, vector<16x128xbf16>,
    %4 = vector.extract_strided_slice %1 {offsets = [0, 1], sizes = [16, 128], strides = [1, 1]} : vector<16x143xbf16> to vector<16x128xbf16>
    %c16 = arith.constant 16 : index
    %c0_4 = arith.constant 0 : index
    %5 = vector.load %arg6[%c16, %c0_4] : memref<256x128xbf16, #tpu.memory_space<vmem>>, vector<16x128xbf16>
    tpu.vector_store %arg6[%c16, %c0_4], %4 {strides = array<i32>} : memref<256x128xbf16, #tpu.memory_space<vmem>>, vector<16x128xbf16>,
    %6 = vector.extract_strided_slice %1 {offsets = [0, 2], sizes = [16, 128], strides = [1, 1]} : vector<16x143xbf16> to vector<16x128xbf16>
    %c32 = arith.constant 32 : index
    %c0_5 = arith.constant 0 : index
    %7 = vector.load %arg6[%c32, %c0_5] : memref<256x128xbf16, #tpu.memory_space<vmem>>, vector<16x128xbf16>
    tpu.vector_store %arg6[%c32, %c0_5], %6 {strides = array<i32>} : memref<256x128xbf16, #tpu.memory_space<vmem>>, vector<16x128xbf16>,
    %8 = vector.extract_strided_slice %1 {offsets = [0, 3], sizes = [16, 128], strides = [1, 1]} : vector<16x143xbf16> to vector<16x128xbf16>
    %c48 = arith.constant 48 : index
    %c0_6 = arith.constant 0 : index
    %9 = vector.load %arg6[%c48, %c0_6] : memref<256x128xbf16, #tpu.memory_space<vmem>>, vector<16x128xbf16>
    tpu.vector_store %arg6[%c48, %c0_6], %8 {strides = array<i32>} : memref<256x128xbf16, #tpu.memory_space<vmem>>, vector<16x128xbf16>,
    %10 = vector.extract_strided_slice %1 {offsets = [0, 4], sizes = [16, 128], strides = [1, 1]} : vector<16x143xbf16> to vector<16x128xbf16>
    %c64 = arith.constant 64 : index
    %c0_7 = arith.constant 0 : index
    %11 = vector.load %arg6[%c64, %c0_7] : memref<256x128xbf16, #tpu.memory_space<vmem>>, vector<16x128xbf16>
    tpu.vector_store %arg6[%c64, %c0_7], %10 {strides = array<i32>} : memref<256x128xbf16, #tpu.memory_space<vmem>>, vector<16x128xbf16>,
    %12 = vector.extract_strided_slice %1 {offsets = [0, 5], sizes = [16, 128], strides = [1, 1]} : vector<16x143xbf16> to vector<16x128xbf16>
    %c80 = arith.constant 80 : index
    %c0_8 = arith.constant 0 : index
    %13 = vector.load %arg6[%c80, %c0_8] : memref<256x128xbf16, #tpu.memory_space<vmem>>, vector<16x128xbf16>
    tpu.vector_store %arg6[%c80, %c0_8], %12 {strides = array<i32>} : memref<256x128xbf16, #tpu.memory_space<vmem>>, vector<16x128xbf16>,
    %14 = vector.extract_strided_slice %1 {offsets = [0, 6], sizes = [16, 128], strides = [1, 1]} : vector<16x143xbf16> to vector<16x128xbf16>
    %c96 = arith.constant 96 : index
    %c0_9 = arith.constant 0 : index
    %15 = vector.load %arg6[%c96, %c0_9] : memref<256x128xbf16, #tpu.memory_space<vmem>>, vector<16x128xbf16>
    tpu.vector_store %arg6[%c96, %c0_9], %14 {strides = array<i32>} : memref<256x128xbf16, #tpu.memory_space<vmem>>, vector<16x128xbf16>,
    %16 = vector.extract_strided_slice %1 {offsets = [0, 7], sizes = [16, 128], strides = [1, 1]} : vector<16x143xbf16> to vector<16x128xbf16>
    %c112 = arith.constant 112 : index
    %c0_10 = arith.constant 0 : index
    %17 = vector.load %arg6[%c112, %c0_10] : memref<256x128xbf16, #tpu.memory_space<vmem>>, vector<16x128xbf16>
    tpu.vector_store %arg6[%c112, %c0_10], %16 {strides = array<i32>} : memref<256x128xbf16, #tpu.memory_space<vmem>>, vector<16x128xbf16>,
    %18 = vector.extract_strided_slice %1 {offsets = [0, 8], sizes = [16, 128], strides = [1, 1]} : vector<16x143xbf16> to vector<16x128xbf16>
    %c128 = arith.constant 128 : index
    %c0_11 = arith.constant 0 : index
    %19 = vector.load %arg6[%c128, %c0_11] : memref<256x128xbf16, #tpu.memory_space<vmem>>, vector<16x128xbf16>
    tpu.vector_store %arg6[%c128, %c0_11], %18 {strides = array<i32>} : memref<256x128xbf16, #tpu.memory_space<vmem>>, vector<16x128xbf16>,
    %20 = vector.extract_strided_slice %1 {offsets = [0, 9], sizes = [16, 128], strides = [1, 1]} : vector<16x143xbf16> to vector<16x128xbf16>
    %c144 = arith.constant 144 : index
    %c0_12 = arith.constant 0 : index
    %21 = vector.load %arg6[%c144, %c0_12] : memref<256x128xbf16, #tpu.memory_space<vmem>>, vector<16x128xbf16>
    tpu.vector_store %arg6[%c144, %c0_12], %20 {strides = array<i32>} : memref<256x128xbf16, #tpu.memory_space<vmem>>, vector<16x128xbf16>,
    %22 = vector.extract_strided_slice %1 {offsets = [0, 10], sizes = [16, 128], strides = [1, 1]} : vector<16x143xbf16> to vector<16x128xbf16>
    %c160 = arith.constant 160 : index
    %c0_13 = arith.constant 0 : index
    %23 = vector.load %arg6[%c160, %c0_13] : memref<256x128xbf16, #tpu.memory_space<vmem>>, vector<16x128xbf16>
    tpu.vector_store %arg6[%c160, %c0_13], %22 {strides = array<i32>} : memref<256x128xbf16, #tpu.memory_space<vmem>>, vector<16x128xbf16>,
    %24 = vector.extract_strided_slice %1 {offsets = [0, 11], sizes = [16, 128], strides = [1, 1]} : vector<16x143xbf16> to vector<16x128xbf16>
    %c176 = arith.constant 176 : index
    %c0_14 = arith.constant 0 : index
    %25 = vector.load %arg6[%c176, %c0_14] : memref<256x128xbf16, #tpu.memory_space<vmem>>, vector<16x128xbf16>
    tpu.vector_store %arg6[%c176, %c0_14], %24 {strides = array<i32>} : memref<256x128xbf16, #tpu.memory_space<vmem>>, vector<16x128xbf16>,
    %26 = vector.extract_strided_slice %1 {offsets = [0, 12], sizes = [16, 128], strides = [1, 1]} : vector<16x143xbf16> to vector<16x128xbf16>
    %c192 = arith.constant 192 : index
    %c0_15 = arith.constant 0 : index
    %27 = vector.load %arg6[%c192, %c0_15] : memref<256x128xbf16, #tpu.memory_space<vmem>>, vector<16x128xbf16>
    tpu.vector_store %arg6[%c192, %c0_15], %26 {strides = array<i32>} : memref<256x128xbf16, #tpu.memory_space<vmem>>, vector<16x128xbf16>,
    %28 = vector.extract_strided_slice %1 {offsets = [0, 13], sizes = [16, 128], strides = [1, 1]} : vector<16x143xbf16> to vector<16x128xbf16>
    %c208 = arith.constant 208 : index
    %c0_16 = arith.constant 0 : index
    %29 = vector.load %arg6[%c208, %c0_16] : memref<256x128xbf16, #tpu.memory_space<vmem>>, vector<16x128xbf16>
    tpu.vector_store %arg6[%c208, %c0_16], %28 {strides = array<i32>} : memref<256x128xbf16, #tpu.memory_space<vmem>>, vector<16x128xbf16>,
    %30 = vector.extract_strided_slice %1 {offsets = [0, 14], sizes = [16, 128], strides = [1, 1]} : vector<16x143xbf16> to vector<16x128xbf16>
    %c224 = arith.constant 224 : index
    %c0_17 = arith.constant 0 : index
    %31 = vector.load %arg6[%c224, %c0_17] : memref<256x128xbf16, #tpu.memory_space<vmem>>, vector<16x128xbf16>
    tpu.vector_store %arg6[%c224, %c0_17], %30 {strides = array<i32>} : memref<256x128xbf16, #tpu.memory_space<vmem>>, vector<16x128xbf16>,
    %32 = vector.extract_strided_slice %1 {offsets = [0, 15], sizes = [16, 128], strides = [1, 1]} : vector<16x143xbf16> to vector<16x128xbf16>
    %c240 = arith.constant 240 : index
    %c0_18 = arith.constant 0 : index
    %33 = vector.load %arg6[%c240, %c0_18] : memref<256x128xbf16, #tpu.memory_space<vmem>>, vector<16x128xbf16>
    tpu.vector_store %arg6[%c240, %c0_18], %32 {strides = array<i32>} : memref<256x128xbf16, #tpu.memory_space<vmem>>, vector<16x128xbf16>,
    %c0_19 = arith.constant 0 : index
    %c0_20 = arith.constant 0 : index
    %34 = vector.load %arg2[%c0_19, %c0_20] : memref<2x256xbf16, #tpu.memory_space<vmem>>, vector<2x256xbf16>
    %c0_21 = arith.constant 0 : index
    %c0_22 = arith.constant 0 : index
    %35 = vector.load %arg6[%c0_21, %c0_22] : memref<256x128xbf16, #tpu.memory_space<vmem>>, vector<256x128xbf16>
    %cst = arith.constant dense<0.000000e+00> : vector<2x128xf32>
    %36 = tpu.matmul %34, %35, %cst {dimension_numbers = #tpu.dot_dimension_numbers<[1], [0], [0], [1], [0, 0, 1, 1], [], []>} : vector<2x256xbf16>, vector<256x128xbf16>, vector<2x128xf32> -> vector<2x128xf32>
    %c0_23 = arith.constant 0 : index
    %c0_24 = arith.constant 0 : index
    %37 = vector.load %arg3[%c0_23, %c0_24] : memref<2x1xf32, #tpu.memory_space<vmem>>, vector<2x1xf32>
    %38 = vector.broadcast %37 : vector<2x1xf32> to vector<2x128xf32>
    %39 = arith.addf %36, %38 : vector<2x128xf32>
    %c0_25 = arith.constant 0 : index
    %40 = memref.load %arg4[%c0_25] : memref<1xf32, #tpu.memory_space<smem>>
    %cst_26 = arith.constant 0.000000e+00 : f32
    %41 = vector.broadcast %cst_26 : f32 to vector<2x128xf32>
    %42 = arith.cmpf ogt, %39, %41 : vector<2x128xf32>
    %43 = vector.broadcast %40 : f32 to vector<2x128xf32>
    %44 = arith.mulf %43, %39 : vector<2x128xf32>
    %45 = arith.select %42, %39, %44 : vector<2x128xi1>, vector<2x128xf32>
    %46 = arith.truncf %45 : vector<2x128xf32> to vector<2x128xbf16>
    %c0_27 = arith.constant 0 : index
    %c0_28 = arith.constant 0 : index
    %c0_29 = arith.constant 0 : index
    %47 = vector.load %arg5[%c0_27, %c0_28, %c0_29] : memref<1x2x128xbf16, #tpu.memory_space<vmem>>, vector<1x2x128xbf16>
    %48 = vector.shape_cast %47 : vector<1x2x128xbf16> to vector<2x128xbf16>
    %49 = vector.shape_cast %46 : vector<2x128xbf16> to vector<1x2x128xbf16>
    tpu.vector_store %arg5[%c0_27, %c0_28, %c0_29], %49 {strides = array<i32>} : memref<1x2x128xbf16, #tpu.memory_space<vmem>>, vector<1x2x128xbf16>,
    return
  }
  func.func @transform_0(%arg0: i32) -> (i32, i32, i32) {
    %c0_i32 = arith.constant 0 : i32
    %c0_i32_0 = arith.constant 0 : i32
    %c0_i32_1 = arith.constant 0 : i32
    return %arg0, %c0_i32, %c0_i32_0 : i32, i32, i32
  }
  func.func @transform_1(%arg0: i32) -> (i32, i32) {
    %c0_i32 = arith.constant 0 : i32
    %c0_i32_0 = arith.constant 0 : i32
    %c0_i32_1 = arith.constant 0 : i32
    return %c0_i32, %c0_i32_0 : i32, i32
  }
  func.func @transform_2(%arg0: i32) -> (i32, i32) {
    %c0_i32 = arith.constant 0 : i32
    %c0_i32_0 = arith.constant 0 : i32
    %c0_i32_1 = arith.constant 0 : i32
    return %c0_i32, %c0_i32_0 : i32, i32
  }
  func.func @transform_3(%arg0: i32) -> i32 {
    %c0_i32 = arith.constant 0 : i32
    %c0_i32_0 = arith.constant 0 : i32
    return %c0_i32 : i32
  }
  func.func @transform_4(%arg0: i32) -> (i32, i32, i32) {
    %c0_i32 = arith.constant 0 : i32
    %c0_i32_0 = arith.constant 0 : i32
    %c0_i32_1 = arith.constant 0 : i32
    return %arg0, %c0_i32, %c0_i32_0 : i32, i32, i32
  }
}

</mosaic_0001>

<bundles_post_ra>
// kernel: generator_forward.6
= control target key start
LH: loop header
LB: loop body
LE: loop exit
PB: predicated region body
PF: predicated region fallthrough
CT: control target
= control target key end

     0   :  { %s1234_s20 = smov 0   ;;  %s1441_s0 = inlined_call_operand.vmem [shape: bf16[2,16,143], index: 0, kind: input, shape index: {}]   ;;  %s1442_s1 = inlined_call_operand.vmem [shape: bf16[2,16,143], index: 1, kind: input, shape index: {}]   ;;  %s1443_s2 = inlined_call_operand.vmem [shape: bf16[8,496], index: 2, kind: input, shape index: {}]   ;;  %s1444_s3 = inlined_call_operand.vmem [shape: f32[8,1], index: 3, kind: input, shape index: {}]   ;;  %s1445_s4 = inlined_call_operand.<no memory space> [shape: f32[1], index: 4, kind: input, shape index: {}]   ;;  %s1446_s5 = inlined_call_operand.vmem [shape: bf16[2,8,128], index: 5, kind: output, shape index: {}]  }
   0x1   :  { %10 = sst [smem:[#allocation3]] %s1445_s4 }
   0x2 LB: > { %s1045_s21 = sadd.s32 4294967295, %s1183_s20   ;;  %p1049_p0 = scmp.ge.s32.totalorder %s1183_s20, 1  ;;  %s1183_s20 = sphi %s1234_s20, %s16_s20  }
   0x3   : > { %p198_p1 = scmp.lt.s32.totalorder %s1183_s20, 3 }
   0x5   : > { %p199_p2 = pnand %p1049_p0, %p198_p1 }
   0x6   : > { %p230_p3 = scmp.lt.s32.totalorder (!%p199_p2), %s1045_s21, 1  ;;  %s1185_s28 = smov (!%p199_p2), 122  }
   0x7   : > { %202 = sbr.rel (%p199_p2) target bundleno = 458 (0x1ca), region = 40  ;;  %s1186_s29 = smov (!%p199_p2), 121  }
   0x8   : > { %s1188_s30 = smov (!%p199_p2), 123   ;;  %s1189_s6 = smov (!%p199_p2), 124  }
   0x9   : > { %s1190_s7 = smov (!%p199_p2), 125   ;;  %s1191_s8 = smov (!%p199_p2), 126  }
   0xa   : > { %s1192_s9 = smov (!%p199_p2), 113   ;;  %s1193_s10 = smov (!%p199_p2), 127  }
   0xb   : > { %s1194_s11 = smov (!%p199_p2), 114   ;;  %s1195_s12 = smov (!%p199_p2), 115  }
   0xc   : > { %s1448_s21 = smov (!%p230_p3, %s1045_s21), 1  ;;  %v1187_v4 = vmov 0   ;;  %s1196_s13 = smov 116   ;;  %v1342_v5 = vld [vmem:[%s1443_s2] sm:$0xff]  ;;  %v1351_v7 = vld [vmem:[%s1443_s2 + $0x8] sm:$0xff]  ;;  %vm889_vm0 = vcmask 916480  }
   0xd   : > { %s1093_s4 = sshll.u32 %s1448_s21, 4  ;;  %933 = vmatprep.subr.bf16.mxu1 %v1187_v4  ;;  %1141 = vset.pattern.permute.xlu0 %v1187_v4  ;;  %s1197_s14 = smov 117   ;;  %v1056_v6 = vcombine.high %v1342_v5, %v1342_v5  ;;  %v1058_v8 = vcombine.high %v1351_v7, %v1351_v7  ;;  %vm324_vm1 = vcmask 998400   ;;  %vm337_vm2 = vcmask 990208   ;;  %v684_v11 = vld [vmem:[%s1444_s3] sm:$0xff] }
   0xe   : > { %s239_s24 = scalar_lea.vmem %s1442_s1, %s1093_s4  ;;  %s234_s27 = scalar_lea.vmem %s1441_s0, %s1093_s4  ;;  %vm311_vm3 = vcmask 1006592   ;;  %vm298_vm4 = vcmask 1014784   ;;  %vm285_vm5 = vcmask 1022976   ;;  %vm272_vm6 = vcmask 1031168  }
   0xf   : > { %v1251_v0 = vld [vmem:[%s239_s24] sm:$0xff]  ;;  %v1255_v2 = vld [vmem:[%s234_s27 + $0x8] sm:$0xff]  ;;  %s1198_s15 = smov 118   ;;  %s1199_s16 = smov 119   ;;  %925 = vmatprep.mubr.bf16.mxu0 %v1056_v6  ;;  %1090 = vmatprep.mubr.msk.bf16.mxu1 %vm889_vm0, %v1058_v8  ;;  %vm441_vm7 = vcmask 924672   ;;  %vm259_vm8 = vcmask 1039360  }
  0x10   : > { %v1253_v1 = vld [vmem:[%s234_s27] sm:$0xff]  ;;  %512 = vrot.lane.b32.xlu1 %v1251_v0, %s1185_s28  ;;  %250 = vst [vmem:[#allocation2 + $0x4] sm:$0xf] %v1255_v2  ;;  %448 = vst [vmem:[#allocation2 + $0x80] sm:$0xf] %v1251_v0  ;;  %524 = vrot.lane.b32.xlu0 %v1251_v0, %s1186_s29  ;;  %v1263_v3 = vld [vmem:[%s239_s24 + $0x8] sm:$0xff] }
  0x11   : > { %249 = vst [vmem:[#allocation2] sm:$0xf] %v1253_v1  ;;  %449 = vst [vmem:[#allocation2 + $0x84] sm:$0xf] %v1263_v3  ;;  %s1200_s17 = smov 120   ;;  %vm428_vm9 = vcmask 932864  }
  0x12   : > { %vm415_vm10 = vcmask 941056   ;;  %vm402_vm11 = vcmask 949248   ;;  %vm389_vm12 = vcmask 957440   ;;  %vm376_vm13 = vcmask 965632   ;;  %s973_s25 = sld [smem:[#allocation3]]  ;;  %s1054_s26 = sshll.u32 %s1448_s21, 2 }
  0x13   : > { %vm363_vm14 = vcmask 973824   ;;  %vm350_vm15 = vcmask 982016  }
  0x14   : > { %514 = vrot.lane.b32.xlu1 %v1263_v3, %s1185_s28  ;;  %526 = vrot.lane.b32.xlu0 %v1263_v3, %s1186_s29 }
  0x18   : > { %502 = vrot.lane.b32.xlu1 %v1263_v3, %s1188_s30  ;;  %500 = vrot.lane.b32.xlu0 %v1251_v0, %s1188_s30 }
  0x1c   : > { %490 = vrot.lane.b32.xlu1 %v1263_v3, %s1189_s6  ;;  %488 = vrot.lane.b32.xlu0 %v1251_v0, %s1189_s6 }
  0x20   : > { %478 = vrot.lane.b32.xlu1 %v1263_v3, %s1190_s7  ;;  %476 = vrot.lane.b32.xlu0 %v1251_v0, %s1190_s7 }
  0x24   : > { %466 = vrot.lane.b32.xlu1 %v1263_v3, %s1191_s8  ;;  %464 = vrot.lane.b32.xlu0 %v1251_v0, %s1191_s8 }
  0x28   : > { %437 = vrot.lane.b32.xlu1 %v1255_v2, %s1192_s9  ;;  %435 = vrot.lane.b32.xlu0 %v1253_v1, %s1192_s9 }
  0x2c   : > { %333 = vrot.lane.b32.xlu1 %v1255_v2, %s1186_s29  ;;  %331 = vrot.lane.b32.xlu0 %v1253_v1, %s1186_s29  ;;  %s243_s29 = scalar_lea.vmem %s1446_s5, %s1054_s26 }
  0x30   : > { %454 = vrot.lane.b32.xlu1 %v1263_v3, %s1193_s10  ;;  %452 = vrot.lane.b32.xlu0 %v1251_v0, %s1193_s10 }
  0x34   : > { %424 = vrot.lane.b32.xlu1 %v1255_v2, %s1194_s11  ;;  %422 = vrot.lane.b32.xlu0 %v1253_v1, %s1194_s11 }
  0x38   : > { %320 = vrot.lane.b32.xlu1 %v1255_v2, %s1185_s28  ;;  %318 = vrot.lane.b32.xlu0 %v1253_v1, %s1185_s28 }
  0x3c   : > { %411 = vrot.lane.b32.xlu1 %v1255_v2, %s1195_s12  ;;  %409 = vrot.lane.b32.xlu0 %v1253_v1, %s1195_s12 }
  0x40   : > { %307 = vrot.lane.b32.xlu1 %v1255_v2, %s1188_s30  ;;  %305 = vrot.lane.b32.xlu0 %v1253_v1, %s1188_s30 }
  0x44   : > { %610 = vrot.lane.b32.xlu1 %v1263_v3, %s1194_s11  ;;  %608 = vrot.lane.b32.xlu0 %v1251_v0, %s1194_s11 }
  0x48   : > { %398 = vrot.lane.b32.xlu1 %v1255_v2, %s1196_s13  ;;  %396 = vrot.lane.b32.xlu0 %v1253_v1, %s1196_s13 }
  0x4c   : > { %294 = vrot.lane.b32.xlu1 %v1255_v2, %s1189_s6  ;;  %292 = vrot.lane.b32.xlu0 %v1253_v1, %s1189_s6 }
  0x50   : > { %598 = vrot.lane.b32.xlu1 %v1263_v3, %s1195_s12  ;;  %596 = vrot.lane.b32.xlu0 %v1251_v0, %s1195_s12 }
  0x54   : > { %385 = vrot.lane.b32.xlu1 %v1255_v2, %s1197_s14  ;;  %383 = vrot.lane.b32.xlu0 %v1253_v1, %s1197_s14 }
  0x58   : > { %281 = vrot.lane.b32.xlu1 %v1255_v2, %s1190_s7  ;;  %279 = vrot.lane.b32.xlu0 %v1253_v1, %s1190_s7 }
  0x5c   : > { %586 = vrot.lane.b32.xlu1 %v1263_v3, %s1196_s13  ;;  %584 = vrot.lane.b32.xlu0 %v1251_v0, %s1196_s13 }
  0x60   : > { %372 = vrot.lane.b32.xlu1 %v1255_v2, %s1198_s15  ;;  %370 = vrot.lane.b32.xlu0 %v1253_v1, %s1198_s15 }
  0x64   : > { %268 = vrot.lane.b32.xlu1 %v1255_v2, %s1191_s8  ;;  %266 = vrot.lane.b32.xlu0 %v1253_v1, %s1191_s8 }
  0x68   : > { %574 = vrot.lane.b32.xlu1 %v1263_v3, %s1197_s14  ;;  %572 = vrot.lane.b32.xlu0 %v1251_v0, %s1197_s14 }
  0x6c   : > { %359 = vrot.lane.b32.xlu1 %v1255_v2, %s1199_s16  ;;  %357 = vrot.lane.b32.xlu0 %v1253_v1, %s1199_s16 }
  0x70   : > { %255 = vrot.lane.b32.xlu1 %v1255_v2, %s1193_s10  ;;  %253 = vrot.lane.b32.xlu0 %v1253_v1, %s1193_s10 }
  0x74   : > { %562 = vrot.lane.b32.xlu1 %v1263_v3, %s1198_s15  ;;  %560 = vrot.lane.b32.xlu0 %v1251_v0, %s1198_s15 }
  0x78   : > { %346 = vrot.lane.b32.xlu1 %v1255_v2, %s1200_s17  ;;  %344 = vrot.lane.b32.xlu0 %v1253_v1, %s1200_s17 }
  0x7c   : > { %550 = vrot.lane.b32.xlu1 %v1263_v3, %s1199_s16  ;;  %548 = vrot.lane.b32.xlu0 %v1251_v0, %s1199_s16 }
  0x80   : > { %538 = vrot.lane.b32.xlu1 %v1263_v3, %s1200_s17  ;;  %536 = vrot.lane.b32.xlu0 %v1251_v0, %s1200_s17 }
  0x82   : > { %v513_v9 = vpop.permute.xlu1 %512  ;;  %v525_v10 = vpop.permute.xlu0 %524 }
  0x83   : > { %v516_v12 = vrot.slane %v513_v9, 4  ;;  %v528_v13 = vrot.slane %v525_v10, 4 }
  0x84   : > { %687 = vperm.xlu0 %1141, %v684_v11  }
  0x85   : > { %v518_v14 = vsel %vm324_vm1, %v513_v9, %v516_v12  ;;  %v530_v15 = vsel %vm337_vm2, %v525_v10, %v528_v13 }
  0x86   : > { %522 = vst [vmem:[#allocation2 + $0xb0] sm:$0xf] %v518_v14  ;;  %534 = vst [vmem:[#allocation2 + $0xb8] sm:$0xf] %v530_v15  ;;  %v515_v16 = vpop.permute.xlu1 %514  ;;  %v527_v17 = vpop.permute.xlu0 %526 }
  0x87   : > { %v517_v18 = vrot.slane %v515_v16, 4  ;;  %v529_v19 = vrot.slane %v527_v17, 4 }
  0x89   : > { %v519_v20 = vsel %vm324_vm1, %v515_v16, %v517_v18  ;;  %v531_v21 = vsel %vm337_vm2, %v527_v17, %v529_v19 }
  0x8a   : > { %523 = vst [vmem:[#allocation2 + $0xb4] sm:$0xf] %v519_v20  ;;  %535 = vst [vmem:[#allocation2 + $0xbc] sm:$0xf] %v531_v21  ;;  %v503_v22 = vpop.permute.xlu1 %502  ;;  %v501_v23 = vpop.permute.xlu0 %500 }
  0x8b   : > { %v505_v24 = vrot.slane %v503_v22, 4  ;;  %v504_v25 = vrot.slane %v501_v23, 4 }
  0x8d   : > { %v507_v26 = vsel %vm311_vm3, %v503_v22, %v505_v24  ;;  %v506_v27 = vsel %vm311_vm3, %v501_v23, %v504_v25 }
  0x8e   : > { %511 = vst [vmem:[#allocation2 + $0xac] sm:$0xf] %v507_v26  ;;  %510 = vst [vmem:[#allocation2 + $0xa8] sm:$0xf] %v506_v27  ;;  %v491_v28 = vpop.permute.xlu1 %490  ;;  %v489_v29 = vpop.permute.xlu0 %488 }
  0x8f   : > { %v493_v30 = vrot.slane %v491_v28, 4  ;;  %v492_v31 = vrot.slane %v489_v29, 4 }
  0x91   : > { %v495_v32 = vsel %vm298_vm4, %v491_v28, %v493_v30  ;;  %v494_v33 = vsel %vm298_vm4, %v489_v29, %v492_v31  ;;  %v1142_v34 = vld [vmem:[#allocation2 + $0xb8] sm:$0xff]   ;;  %v1143_v41 = vld [vmem:[#allocation2 + $0xb0] sm:$0xff]   ;;  %v1155_v28 = vld [vmem:[#allocation2 + $0x80] sm:$0xff]  }
  0x92   : > { %499 = vst [vmem:[#allocation2 + $0xa4] sm:$0xf] %v495_v32  ;;  %498 = vst [vmem:[#allocation2 + $0xa0] sm:$0xf] %v494_v33  ;;  %v479_v35 = vpop.permute.xlu1 %478  ;;  %v477_v36 = vpop.permute.xlu0 %476  ;;  %934 = vmatpush1.bf16.msra.mxu1 %v1142_v34 }
  0x93   : > { %v481_v37 = vrot.slane %v479_v35, 4  ;;  %v480_v38 = vrot.slane %v477_v36, 4  ;;  %935 = vmatprep.subr.bf16.mxu1 %v1187_v4 }
  0x95   : > { %v483_v39 = vsel %vm285_vm5, %v479_v35, %v481_v37  ;;  %v482_v40 = vsel %vm285_vm5, %v477_v36, %v480_v38  ;;  %v1144_v48 = vld [vmem:[#allocation2 + $0xa8] sm:$0xff]  }
  0x96   : > { %487 = vst [vmem:[#allocation2 + $0x9c] sm:$0xf] %v483_v39  ;;  %486 = vst [vmem:[#allocation2 + $0x98] sm:$0xf] %v482_v40  ;;  %v467_v42 = vpop.permute.xlu1 %466  ;;  %v465_v43 = vpop.permute.xlu0 %464  ;;  %936 = vmatpush1.bf16.msra.mxu1 %v1143_v41 }
  0x97   : > { %v469_v44 = vrot.slane %v467_v42, 4  ;;  %v468_v45 = vrot.slane %v465_v43, 4  ;;  %937 = vmatprep.subr.bf16.mxu1 %v1187_v4 }
  0x99   : > { %v471_v46 = vsel %vm272_vm6, %v467_v42, %v469_v44  ;;  %v470_v47 = vsel %vm272_vm6, %v465_v43, %v468_v45  ;;  %v1145_v55 = vld [vmem:[#allocation2 + $0xa0] sm:$0xff]  }
  0x9a   : > { %475 = vst [vmem:[#allocation2 + $0x94] sm:$0xf] %v471_v46  ;;  %474 = vst [vmem:[#allocation2 + $0x90] sm:$0xf] %v470_v47  ;;  %v438_v49 = vpop.permute.xlu1 %437  ;;  %v436_v50 = vpop.permute.xlu0 %435  ;;  %938 = vmatpush1.bf16.msra.mxu1 %v1144_v48 }
  0x9b   : > { %v440_v51 = vrot.slane %v438_v49, 4  ;;  %v439_v52 = vrot.slane %v436_v50, 4  ;;  %939 = vmatprep.subr.bf16.mxu1 %v1187_v4 }
  0x9d   : > { %v443_v53 = vsel %vm441_vm7, %v438_v49, %v440_v51  ;;  %v442_v54 = vsel %vm441_vm7, %v436_v50, %v439_v52  ;;  %v1146_v62 = vld [vmem:[#allocation2 + $0x98] sm:$0xff]  }
  0x9e   : > { %447 = vst [vmem:[#allocation2 + $0x7c] sm:$0xf] %v443_v53  ;;  %446 = vst [vmem:[#allocation2 + $0x78] sm:$0xf] %v442_v54  ;;  %v334_v56 = vpop.permute.xlu1 %333  ;;  %v332_v57 = vpop.permute.xlu0 %331  ;;  %940 = vmatpush1.bf16.msra.mxu1 %v1145_v55 }
  0x9f   : > { %v336_v58 = vrot.slane %v334_v56, 4  ;;  %v335_v59 = vrot.slane %v332_v57, 4  ;;  %941 = vmatprep.subr.bf16.mxu1 %v1187_v4 }
  0xa1   : > { %v339_v60 = vsel %vm337_vm2, %v334_v56, %v336_v58  ;;  %v338_v61 = vsel %vm337_vm2, %v332_v57, %v335_v59  ;;  %v1148_v3 = vld [vmem:[#allocation2 + $0x90] sm:$0xff]  }
  0xa2   : > { %343 = vst [vmem:[#allocation2 + $0x3c] sm:$0xf] %v339_v60  ;;  %342 = vst [vmem:[#allocation2 + $0x38] sm:$0xf] %v338_v61  ;;  %v455_v63 = vpop.permute.xlu1 %454  ;;  %v453_v0 = vpop.permute.xlu0 %452  ;;  %942 = vmatpush1.bf16.msra.mxu1 %v1146_v62 }
  0xa3   : > { %v457_v1 = vrot.slane %v455_v63, 4  ;;  %v456_v2 = vrot.slane %v453_v0, 4  ;;  %943 = vmatprep.subr.bf16.mxu1 %v1187_v4 }
  0xa5   : > { %v459_v6 = vsel %vm259_vm8, %v455_v63, %v457_v1  ;;  %v458_v8 = vsel %vm259_vm8, %v453_v0, %v456_v2  ;;  %v1147_v9 = vld [vmem:[#allocation2 + $0x78] sm:$0xff]  }
  0xa6   : > { %463 = vst [vmem:[#allocation2 + $0x8c] sm:$0xf] %v459_v6  ;;  %462 = vst [vmem:[#allocation2 + $0x88] sm:$0xf] %v458_v8  ;;  %v425_v10 = vpop.permute.xlu1 %424  ;;  %v423_v11 = vpop.permute.xlu0 %422  ;;  %1095 = vmatprep.subr.bf16.mxu0 %v1147_v9  ;;  %944 = vmatpush1.bf16.msra.mxu1 %v1148_v3 }
  0xa7   : > { %v427_v12 = vrot.slane %v425_v10, 4  ;;  %v426_v13 = vrot.slane %v423_v11, 4  ;;  %945 = vmatprep.subr.bf16.mxu1 %v1187_v4 }
  0xa9   : > { %v430_v14 = vsel %vm428_vm9, %v425_v10, %v427_v12  ;;  %v429_v15 = vsel %vm428_vm9, %v423_v11, %v426_v13  ;;  %v1149_v16 = vld [vmem:[#allocation2 + $0x38] sm:$0xff]  }
  0xaa   : > { %434 = vst [vmem:[#allocation2 + $0x74] sm:$0xf] %v430_v14  ;;  %433 = vst [vmem:[#allocation2 + $0x70] sm:$0xf] %v429_v15  ;;  %v321_v17 = vpop.permute.xlu1 %320  ;;  %v319_v18 = vpop.permute.xlu0 %318  ;;  %1096 = vmatpush3.bf16.msra.mxu0 %v1149_v16 }
  0xab   : > { %v323_v19 = vrot.slane %v321_v17, 4  ;;  %v322_v20 = vrot.slane %v319_v18, 4 }
  0xad   : > { %v326_v21 = vsel %vm324_vm1, %v321_v17, %v323_v19  ;;  %v325_v22 = vsel %vm324_vm1, %v319_v18, %v322_v20  ;;  %v1150_v23 = vld [vmem:[#allocation2 + $0x88] sm:$0xff]  }
  0xae   : > { %330 = vst [vmem:[#allocation2 + $0x34] sm:$0xf] %v326_v21  ;;  %329 = vst [vmem:[#allocation2 + $0x30] sm:$0xf] %v325_v22  ;;  %v412_v24 = vpop.permute.xlu1 %411  ;;  %v410_v25 = vpop.permute.xlu0 %409  ;;  %946 = vmatpush1.bf16.msra.mxu1 %v1150_v23 }
  0xaf   : > { %v414_v26 = vrot.slane %v412_v24, 4  ;;  %v413_v27 = vrot.slane %v410_v25, 4  ;;  %947 = vmatprep.subr.bf16.mxu1 %v1187_v4 }
  0xb1   : > { %v417_v29 = vsel %vm415_vm10, %v412_v24, %v414_v26  ;;  %v416_v30 = vsel %vm415_vm10, %v410_v25, %v413_v27  ;;  %v1151_v31 = vld [vmem:[#allocation2 + $0x70] sm:$0xff]  }
  0xb2   : > { %421 = vst [vmem:[#allocation2 + $0x6c] sm:$0xf] %v417_v29  ;;  %420 = vst [vmem:[#allocation2 + $0x68] sm:$0xf] %v416_v30  ;;  %v308_v32 = vpop.permute.xlu1 %307  ;;  %v306_v33 = vpop.permute.xlu0 %305  ;;  %1097 = vmatprep.subr.bf16.mxu0 %v1151_v31  ;;  %948 = vmatpush1.bf16.msra.mxu1 %v1155_v28 }
  0xb3   : > { %v310_v34 = vrot.slane %v308_v32, 4  ;;  %v309_v35 = vrot.slane %v306_v33, 4  ;;  %951 = vmatprep.subr.bf16.mxu1 %v1187_v4 }
  0xb5   : > { %v313_v36 = vsel %vm311_vm3, %v308_v32, %v310_v34  ;;  %v312_v37 = vsel %vm311_vm3, %v306_v33, %v309_v35  ;;  %v1152_v38 = vld [vmem:[#allocation2 + $0x30] sm:$0xff]  }
  0xb6   : > { %317 = vst [vmem:[#allocation2 + $0x2c] sm:$0xf] %v313_v36  ;;  %316 = vst [vmem:[#allocation2 + $0x28] sm:$0xf] %v312_v37  ;;  %v611_v39 = vpop.permute.xlu1 %610  ;;  %v609_v40 = vpop.permute.xlu0 %608  ;;  %1098 = vmatpush3.bf16.msra.mxu0 %v1152_v38 }
  0xb7   : > { %v613_v41 = vrot.slane %v611_v39, 4  ;;  %v612_v42 = vrot.slane %v609_v40, 4 }
  0xb9   : > { %v615_v43 = vsel %vm428_vm9, %v611_v39, %v613_v41  ;;  %v614_v44 = vsel %vm428_vm9, %v609_v40, %v612_v42  ;;  %v1153_v45 = vld [vmem:[#allocation2 + $0x68] sm:$0xff]  }
  0xba   : > { %619 = vst [vmem:[#allocation2 + $0xf4] sm:$0xf] %v615_v43  ;;  %618 = vst [vmem:[#allocation2 + $0xf0] sm:$0xf] %v614_v44  ;;  %v399_v46 = vpop.permute.xlu1 %398  ;;  %v397_v47 = vpop.permute.xlu0 %396  ;;  %1099 = vmatprep.subr.bf16.mxu0 %v1153_v45 }
  0xbb   : > { %v401_v48 = vrot.slane %v399_v46, 4  ;;  %v400_v49 = vrot.slane %v397_v47, 4 }
  0xbd   : > { %v404_v50 = vsel %vm402_vm11, %v399_v46, %v401_v48  ;;  %v403_v51 = vsel %vm402_vm11, %v397_v47, %v400_v49  ;;  %v1154_v52 = vld [vmem:[#allocation2 + $0x28] sm:$0xff]  }
  0xbe   : > { %408 = vst [vmem:[#allocation2 + $0x64] sm:$0xf] %v404_v50  ;;  %407 = vst [vmem:[#allocation2 + $0x60] sm:$0xf] %v403_v51  ;;  %v295_v53 = vpop.permute.xlu1 %294  ;;  %v293_v54 = vpop.permute.xlu0 %292  ;;  %1100 = vmatpush3.bf16.msra.mxu0 %v1154_v52 }
  0xbf   : > { %v297_v55 = vrot.slane %v295_v53, 4  ;;  %v296_v56 = vrot.slane %v293_v54, 4 }
  0xc1   : > { %v300_v57 = vsel %vm298_vm4, %v295_v53, %v297_v55  ;;  %v299_v58 = vsel %vm298_vm4, %v293_v54, %v296_v56  ;;  %v1156_v59 = vld [vmem:[#allocation2 + $0xf0] sm:$0xff]  }
  0xc2   : > { %304 = vst [vmem:[#allocation2 + $0x24] sm:$0xf] %v300_v57  ;;  %303 = vst [vmem:[#allocation2 + $0x20] sm:$0xf] %v299_v58  ;;  %v599_v60 = vpop.permute.xlu1 %598  ;;  %v597_v61 = vpop.permute.xlu0 %596  ;;  %952 = vmatpush2.bf16.msra.mxu1 %v1156_v59 }
  0xc3   : > { %v601_v62 = vrot.slane %v599_v60, 4  ;;  %v600_v63 = vrot.slane %v597_v61, 4  ;;  %953 = vmatprep.subr.bf16.mxu1 %v1187_v4 }
  0xc5   : > { %v603_v0 = vsel %vm415_vm10, %v599_v60, %v601_v62  ;;  %v602_v1 = vsel %vm415_vm10, %v597_v61, %v600_v63  ;;  %v1157_v2 = vld [vmem:[#allocation2 + $0x60] sm:$0xff]  }
  0xc6   : > { %607 = vst [vmem:[#allocation2 + $0xec] sm:$0xf] %v603_v0  ;;  %606 = vst [vmem:[#allocation2 + $0xe8] sm:$0xf] %v602_v1  ;;  %v386_v3 = vpop.permute.xlu1 %385  ;;  %v384_v6 = vpop.permute.xlu0 %383  ;;  %1101 = vmatprep.subr.bf16.mxu0 %v1157_v2 }
  0xc7   : > { %v388_v8 = vrot.slane %v386_v3, 4  ;;  %v387_v9 = vrot.slane %v384_v6, 4 }
  0xc9   : > { %v391_v10 = vsel %vm389_vm12, %v386_v3, %v388_v8  ;;  %v390_v11 = vsel %vm389_vm12, %v384_v6, %v387_v9  ;;  %v1158_v12 = vld [vmem:[#allocation2 + $0x20] sm:$0xff]  }
  0xca   : > { %395 = vst [vmem:[#allocation2 + $0x5c] sm:$0xf] %v391_v10  ;;  %394 = vst [vmem:[#allocation2 + $0x58] sm:$0xf] %v390_v11  ;;  %v282_v13 = vpop.permute.xlu1 %281  ;;  %v280_v14 = vpop.permute.xlu0 %279  ;;  %1102 = vmatpush3.bf16.msra.mxu0 %v1158_v12 }
  0xcb   : > { %v284_v15 = vrot.slane %v282_v13, 4  ;;  %v283_v16 = vrot.slane %v280_v14, 4 }
  0xcd   : > { %v287_v17 = vsel %vm285_vm5, %v282_v13, %v284_v15  ;;  %v286_v18 = vsel %vm285_vm5, %v280_v14, %v283_v16  ;;  %v1159_v19 = vld [vmem:[#allocation2 + $0xe8] sm:$0xff]  }
  0xce   : > { %291 = vst [vmem:[#allocation2 + $0x1c] sm:$0xf] %v287_v17  ;;  %290 = vst [vmem:[#allocation2 + $0x18] sm:$0xf] %v286_v18  ;;  %v587_v20 = vpop.permute.xlu1 %586  ;;  %v585_v21 = vpop.permute.xlu0 %584  ;;  %954 = vmatpush2.bf16.msra.mxu1 %v1159_v19 }
  0xcf   : > { %v589_v22 = vrot.slane %v587_v20, 4  ;;  %v588_v23 = vrot.slane %v585_v21, 4  ;;  %955 = vmatprep.subr.bf16.mxu1 %v1187_v4 }
  0xd1   : > { %v591_v24 = vsel %vm402_vm11, %v587_v20, %v589_v22  ;;  %v590_v25 = vsel %vm402_vm11, %v585_v21, %v588_v23  ;;  %v1160_v26 = vld [vmem:[#allocation2 + $0x58] sm:$0xff]  }
  0xd2   : > { %595 = vst [vmem:[#allocation2 + $0xe4] sm:$0xf] %v591_v24  ;;  %594 = vst [vmem:[#allocation2 + $0xe0] sm:$0xf] %v590_v25  ;;  %v373_v27 = vpop.permute.xlu1 %372  ;;  %v371_v28 = vpop.permute.xlu0 %370  ;;  %1103 = vmatprep.subr.bf16.mxu0 %v1160_v26  ;;  %v1170_v26 = vld [vmem:[#allocation2] sm:$0xff]  }
  0xd3   : > { %v375_v29 = vrot.slane %v373_v27, 4  ;;  %v374_v30 = vrot.slane %v371_v28, 4 }
  0xd5   : > { %v378_v31 = vsel %vm376_vm13, %v373_v27, %v375_v29  ;;  %v377_v32 = vsel %vm376_vm13, %v371_v28, %v374_v30  ;;  %v1161_v33 = vld [vmem:[#allocation2 + $0x18] sm:$0xff]   ;;  %v1055_v30 = vcombine.low %v1342_v5, %v1342_v5 }
  0xd6   : > { %382 = vst [vmem:[#allocation2 + $0x54] sm:$0xf] %v378_v31  ;;  %381 = vst [vmem:[#allocation2 + $0x50] sm:$0xf] %v377_v32  ;;  %v269_v34 = vpop.permute.xlu1 %268  ;;  %v267_v35 = vpop.permute.xlu0 %266  ;;  %1104 = vmatpush3.bf16.msra.mxu0 %v1161_v33  ;;  %v1057_v33 = vcombine.low %v1351_v7, %v1351_v7 }
  0xd7   : > { %v271_v36 = vrot.slane %v269_v34, 4  ;;  %v270_v37 = vrot.slane %v267_v35, 4 }
  0xd9   : > { %v274_v38 = vsel %vm272_vm6, %v269_v34, %v271_v36  ;;  %v273_v39 = vsel %vm272_vm6, %v267_v35, %v270_v37  ;;  %v1162_v40 = vld [vmem:[#allocation2 + $0xe0] sm:$0xff]  }
  0xda   : > { %278 = vst [vmem:[#allocation2 + $0x14] sm:$0xf] %v274_v38  ;;  %277 = vst [vmem:[#allocation2 + $0x10] sm:$0xf] %v273_v39  ;;  %v575_v41 = vpop.permute.xlu1 %574  ;;  %v573_v42 = vpop.permute.xlu0 %572  ;;  %956 = vmatpush2.bf16.msra.mxu1 %v1162_v40 }
  0xdb   : > { %v577_v43 = vrot.slane %v575_v41, 4  ;;  %v576_v44 = vrot.slane %v573_v42, 4  ;;  %957 = vmatprep.subr.bf16.mxu1 %v1187_v4 }
  0xdd   : > { %v579_v45 = vsel %vm389_vm12, %v575_v41, %v577_v43  ;;  %v578_v46 = vsel %vm389_vm12, %v573_v42, %v576_v44  ;;  %v1163_v47 = vld [vmem:[#allocation2 + $0x50] sm:$0xff]   ;;  %v975_v41 = vstv %s973_s25 }
  0xde   : > { %583 = vst [vmem:[#allocation2 + $0xdc] sm:$0xf] %v579_v45  ;;  %582 = vst [vmem:[#allocation2 + $0xd8] sm:$0xf] %v578_v46  ;;  %v360_v48 = vpop.permute.xlu1 %359  ;;  %v358_v49 = vpop.permute.xlu0 %357  ;;  %1105 = vmatprep.subr.bf16.mxu0 %v1163_v47 }
  0xdf   : > { %v362_v50 = vrot.slane %v360_v48, 4  ;;  %v361_v51 = vrot.slane %v358_v49, 4 }
  0xe1   : > { %v365_v52 = vsel %vm363_vm14, %v360_v48, %v362_v50  ;;  %v364_v53 = vsel %vm363_vm14, %v358_v49, %v361_v51  ;;  %v1164_v54 = vld [vmem:[#allocation2 + $0x10] sm:$0xff]  }
  0xe2   : > { %369 = vst [vmem:[#allocation2 + $0x4c] sm:$0xf] %v365_v52  ;;  %368 = vst [vmem:[#allocation2 + $0x48] sm:$0xf] %v364_v53  ;;  %v256_v55 = vpop.permute.xlu1 %255  ;;  %v254_v56 = vpop.permute.xlu0 %253  ;;  %1106 = vmatpush3.bf16.msra.mxu0 %v1164_v54 }
  0xe3   : > { %v258_v57 = vrot.slane %v256_v55, 4  ;;  %v257_v58 = vrot.slane %v254_v56, 4 }
  0xe5   : > { %v261_v59 = vsel %vm259_vm8, %v256_v55, %v258_v57  ;;  %v260_v60 = vsel %vm259_vm8, %v254_v56, %v257_v58  ;;  %v1165_v61 = vld [vmem:[#allocation2 + $0xd8] sm:$0xff]  }
  0xe6   : > { %265 = vst [vmem:[#allocation2 + $0xc] sm:$0xf] %v261_v59  ;;  %264 = vst [vmem:[#allocation2 + $0x8] sm:$0xf] %v260_v60  ;;  %v563_v62 = vpop.permute.xlu1 %562  ;;  %v561_v63 = vpop.permute.xlu0 %560  ;;  %958 = vmatpush2.bf16.msra.mxu1 %v1165_v61 }
  0xe7   : > { %v565_v0 = vrot.slane %v563_v62, 4  ;;  %v564_v1 = vrot.slane %v561_v63, 4  ;;  %959 = vmatprep.subr.bf16.mxu1 %v1187_v4 }
  0xe9   : > { %v567_v2 = vsel %vm376_vm13, %v563_v62, %v565_v0  ;;  %v566_v3 = vsel %vm376_vm13, %v561_v63, %v564_v1  ;;  %v1166_v6 = vld [vmem:[#allocation2 + $0x48] sm:$0xff]  }
  0xea   : > { %571 = vst [vmem:[#allocation2 + $0xd4] sm:$0xf] %v567_v2  ;;  %570 = vst [vmem:[#allocation2 + $0xd0] sm:$0xf] %v566_v3  ;;  %v347_v8 = vpop.permute.xlu1 %346  ;;  %v345_v9 = vpop.permute.xlu0 %344  ;;  %1107 = vmatprep.subr.bf16.mxu0 %v1166_v6 }
  0xeb   : > { %v349_v10 = vrot.slane %v347_v8, 4  ;;  %v348_v11 = vrot.slane %v345_v9, 4 }
  0xed   : > { %v352_v12 = vsel %vm350_vm15, %v347_v8, %v349_v10  ;;  %v351_v13 = vsel %vm350_vm15, %v345_v9, %v348_v11  ;;  %v1167_v14 = vld [vmem:[#allocation2 + $0x8] sm:$0xff]  }
  0xee   : > { %356 = vst [vmem:[#allocation2 + $0x44] sm:$0xf] %v352_v12  ;;  %355 = vst [vmem:[#allocation2 + $0x40] sm:$0xf] %v351_v13  ;;  %v551_v15 = vpop.permute.xlu1 %550  ;;  %v549_v16 = vpop.permute.xlu0 %548  ;;  %1108 = vmatpush3.bf16.msra.mxu0 %v1167_v14 }
  0xef   : > { %v553_v17 = vrot.slane %v551_v15, 4  ;;  %v552_v18 = vrot.slane %v549_v16, 4 }
  0xf1   : > { %v555_v19 = vsel %vm363_vm14, %v551_v15, %v553_v17  ;;  %v554_v20 = vsel %vm363_vm14, %v549_v16, %v552_v18  ;;  %v1168_v21 = vld [vmem:[#allocation2 + $0xd0] sm:$0xff]  }
  0xf2   : > { %559 = vst [vmem:[#allocation2 + $0xcc] sm:$0xf] %v555_v19  ;;  %558 = vst [vmem:[#allocation2 + $0xc8] sm:$0xf] %v554_v20  ;;  %v539_v22 = vpop.permute.xlu1 %538  ;;  %v537_v23 = vpop.permute.xlu0 %536  ;;  %960 = vmatpush2.bf16.msra.mxu1 %v1168_v21 }
  0xf3   : > { %v541_v24 = vrot.slane %v539_v22, 4  ;;  %v540_v25 = vrot.slane %v537_v23, 4  ;;  %961 = vmatprep.subr.bf16.mxu1 %v1187_v4 }
  0xf5   : > { %v543_v27 = vsel %vm350_vm15, %v539_v22, %v541_v24  ;;  %v542_v28 = vsel %vm350_vm15, %v537_v23, %v540_v25  ;;  %v1169_v29 = vld [vmem:[#allocation2 + $0x40] sm:$0xff]  }
  0xf6   : > { %547 = vst [vmem:[#allocation2 + $0xc4] sm:$0xf] %v543_v27  ;;  %546 = vst [vmem:[#allocation2 + $0xc0] sm:$0xf] %v542_v28  ;;  %1109 = vmatprep.subr.bf16.mxu0 %v1169_v29 }
  0xf7   : > { %1110 = vmatpush3.bf16.msra.mxu0 %v1170_v26 }
  0xf9   : > { %v1173_v31 = vld [vmem:[#allocation2 + $0xc8] sm:$0xff]  }
  0xfa   : > { %926 = vmatmul.mubr.bf16.vlgmr.msra.gmra.mxu0 %v1055_v30  ;;  %962 = vmatpush2.bf16.msra.mxu1 %v1173_v31 }
  0xfb   : > { %963 = vmatprep.subr.bf16.mxu1 %v1187_v4 }
  0xfd   : > { %v1174_v32 = vld [vmem:[#allocation2 + $0xc0] sm:$0xff]  }
  0xfe   : > { %964 = vmatpush2.bf16.msra.mxu1 %v1174_v32 }
  0xff   : > { %v688_v36 = vpop.permute.xlu0 %687 }
 0x101   : > { %966 = vmatmul.mubr.bf16.vlgmr.msra.gmra.mxu1 %v1057_v33 }
 0x1ba   : > { %v1111_v34 = vpop.f32.mrf.mxu0 }
 0x1bc   : > { %v1112_v35 = vpop.f32.mrf.mxu0 }
 0x1bd   : > { %v1113_v37 = vadd.f32 %v1112_v35, %v1111_v34 }
 0x1be   : > { %v1114_v38 = vpop.f32.mrf.mxu0 }
 0x1bf   : > { %v928_v5 = vadd.f32 %v1113_v37, %v688_v36 }
 0x1c0   : > { %v1115_v39 = vpop.f32.mrf.mxu0 }
 0x1c1   : > { %v967_v40 = vpop.f32.mrf.mxu1 }
 0x1c2   : > { %v968_v42 = vadd.f32 %v967_v40, %v928_v5 }
 0x1c3   : > { %v969_v4 = vpop.f32.mrf.mxu1 }
 0x1c4   : > { %vm974_vm0 = vcmp.gt.f32.partialorder %v968_v42, 0.0  ;;  %v976_v43 = vmul.f32 %v975_v41, %v968_v42 }
 0x1c5   : > { %v970_v44 = vpop.f32.mrf.mxu1 }
 0x1c6   : > { %v977_v7 = vsel %vm974_vm0, %v968_v42, %v976_v43 }
 0x1c7   : > { %v978_v45 = vpack.c.bf16 %v977_v7, %v977_v7  ;;  %v971_v46 = vpop.f32.mrf.mxu1 }
 0x1c9   : > { %979 = vst [vmem:[%s243_s29] sm:$0xf] %v978_v45 }
 0x1ca PF: > { %s16_s20 = sadd.s32 1, %s1183_s20  }
 0x1cb   : > { %p13_p4 = scmp.ge.s32.totalorder %s16_s20, 4  }
 0x1cd   :  { %15 = sbr.rel (!%p13_p4) target bundleno = 2 (0x2), region = 73 }

// kernel: generator_forward.7
= control target key start
LH: loop header
LB: loop body
LE: loop exit
PB: predicated region body
PF: predicated region fallthrough
CT: control target
= control target key end

     0   :  { %s1144_s20 = smov 0   ;;  %s1358_s0 = inlined_call_operand.vmem [shape: bf16[2,16,79], index: 0, kind: input, shape index: {}]   ;;  %s1359_s1 = inlined_call_operand.vmem [shape: bf16[2,16,79], index: 1, kind: input, shape index: {}]   ;;  %s1360_s2 = inlined_call_operand.vmem [shape: bf16[16,496], index: 2, kind: input, shape index: {}]   ;;  %s1361_s3 = inlined_call_operand.vmem [shape: f32[16,1], index: 3, kind: input, shape index: {}]   ;;  %s1362_s4 = inlined_call_operand.<no memory space> [shape: f32[1], index: 4, kind: input, shape index: {}]   ;;  %s1363_s5 = inlined_call_operand.vmem [shape: bf16[2,16,64], index: 5, kind: output, shape index: {}]  }
   0x1   :  { %10 = sst [smem:[#allocation3]] %s1362_s4 }
   0x2 LB: > { %s946_s21 = sadd.s32 4294967295, %s1093_s20   ;;  %p950_p0 = scmp.ge.s32.totalorder %s1093_s20, 1  ;;  %s1093_s20 = sphi %s1144_s20, %s16_s20  }
   0x3   : > { %p198_p1 = scmp.lt.s32.totalorder %s1093_s20, 3 }
   0x5   : > { %p199_p2 = pnand %p950_p0, %p198_p1 }
   0x6   : > { %p231_p3 = scmp.lt.s32.totalorder (!%p199_p2), %s946_s21, 1  ;;  %s1096_s28 = smov (!%p199_p2), 122  }
   0x7   : > { %202 = sbr.rel (%p199_p2) target bundleno = 459 (0x1cb), region = 40  ;;  %s1097_s29 = smov (!%p199_p2), 121  }
   0x8   : > { %s1098_s30 = smov (!%p199_p2), 123   ;;  %s1099_s6 = smov (!%p199_p2), 124  }
   0x9   : > { %s1100_s7 = smov (!%p199_p2), 125   ;;  %s1101_s8 = smov (!%p199_p2), 126  }
   0xa   : > { %s1102_s9 = smov (!%p199_p2), 113   ;;  %s1103_s10 = smov (!%p199_p2), 127  }
   0xb   : > { %s1104_s11 = smov (!%p199_p2), 114   ;;  %s1105_s12 = smov (!%p199_p2), 115  }
   0xc   : > { %s1365_s21 = smov (!%p231_p3, %s946_s21), 1  ;;  %vm251_vm0 = vcmask 519168   ;;  %v1095_v3 = vmov 0   ;;  %s1106_s13 = smov 116   ;;  %v1081_v5 = vld [vmem:[%s1360_s2 + $0x4] ss:$16 sps:$4 sm:$0xff]  }
   0xd   : > { %s1152_s22 = sshll.u32 %s1365_s21, 3  ;;  %820 = vmatprep.subr.bf16.mxu1 %v1095_v3  ;;  %1048 = vset.pattern.permute.xlu0 %v1095_v3  ;;  %s1107_s14 = smov 117   ;;  %v1086_v6 = vld [vmem:[%s1360_s2 + $0xc] ss:$16 sps:$4 sm:$0xff]   ;;  %vm775_vm1 = vcmask 916480   ;;  %v558_v7 = vld [vmem:[%s1361_s3] sm:$0xff] }
   0xe   : > { %s240_s24 = scalar_lea.vmem %s1359_s1, %s1152_s22  ;;  %s235_s27 = scalar_lea.vmem %s1358_s0, %s1152_s22  ;;  %1049 = vset.pattern.permute.xlu1 %v1095_v3  ;;  %811 = vmatprep.mubr.bf16.mxu0 %v1081_v5  ;;  %v559_v8 = vld [vmem:[%s1361_s3 + $0x8] sm:$0xff] }
   0xf   : > { %v1162_v0 = vld [vmem:[%s240_s24] sm:$0xf]  ;;  %v1166_v2 = vld [vmem:[%s235_s27 + $0x4] sm:$0xf]  ;;  %s1108_s15 = smov 118   ;;  %s1109_s16 = smov 119   ;;  %992 = vmatprep.mubr.msk.bf16.mxu1 %vm775_vm1, %v1086_v6 }
  0x10   : > { %v1164_v1 = vld [vmem:[%s235_s27] sm:$0xf]  ;;  %420 = vrot.lane.b32.xlu1 %v1162_v0, %s1096_s28  ;;  %428 = vrot.lane.b32.xlu0 %v1162_v0, %s1097_s29  ;;  %v1173_v4 = vld [vmem:[%s240_s24 + $0x4] sm:$0xf]  ;;  %253 = vst.msk [vmem:[#allocation2 + $0x4] sm:$0xf] %vm251_vm0, %v1166_v2 }
  0x11   : > { %252 = vst.msk [vmem:[#allocation2] sm:$0xf] %vm251_vm0, %v1164_v1  ;;  %376 = vst.msk [vmem:[#allocation2 + $0x80] sm:$0xf] %vm251_vm0, %v1162_v0  ;;  %s1110_s19 = smov 120  }
  0x12   : > { %377 = vst.msk [vmem:[#allocation2 + $0x84] sm:$0xf] %vm251_vm0, %v1173_v4 }
  0x14   : > { %422 = vrot.lane.b32.xlu1 %v1173_v4, %s1096_s28  ;;  %430 = vrot.lane.b32.xlu0 %v1173_v4, %s1097_s29 }
  0x18   : > { %414 = vrot.lane.b32.xlu1 %v1173_v4, %s1098_s30  ;;  %412 = vrot.lane.b32.xlu0 %v1162_v0, %s1098_s30 }
  0x19   : > { %v1063_v40 = vld [vmem:[#allocation2 + $0x80] sm:$0xff]  }
  0x1c   : > { %406 = vrot.lane.b32.xlu1 %v1173_v4, %s1099_s6  ;;  %404 = vrot.lane.b32.xlu0 %v1162_v0, %s1099_s6 }
  0x20   : > { %398 = vrot.lane.b32.xlu1 %v1173_v4, %s1100_s7  ;;  %396 = vrot.lane.b32.xlu0 %v1162_v0, %s1100_s7 }
  0x24   : > { %390 = vrot.lane.b32.xlu1 %v1173_v4, %s1101_s8  ;;  %388 = vrot.lane.b32.xlu0 %v1162_v0, %s1101_s8 }
  0x28   : > { %370 = vrot.lane.b32.xlu1 %v1166_v2, %s1102_s9  ;;  %368 = vrot.lane.b32.xlu0 %v1164_v1, %s1102_s9  ;;  %s245_s9 = scalar_lea.vmem %s1363_s5, %s1152_s22 }
  0x2c   : > { %306 = vrot.lane.b32.xlu1 %v1166_v2, %s1097_s29  ;;  %304 = vrot.lane.b32.xlu0 %v1164_v1, %s1097_s29 }
  0x30   : > { %382 = vrot.lane.b32.xlu1 %v1173_v4, %s1103_s10  ;;  %380 = vrot.lane.b32.xlu0 %v1162_v0, %s1103_s10 }
  0x34   : > { %362 = vrot.lane.b32.xlu1 %v1166_v2, %s1104_s11  ;;  %360 = vrot.lane.b32.xlu0 %v1164_v1, %s1104_s11 }
  0x38   : > { %298 = vrot.lane.b32.xlu1 %v1166_v2, %s1096_s28  ;;  %296 = vrot.lane.b32.xlu0 %v1164_v1, %s1096_s28 }
  0x3c   : > { %354 = vrot.lane.b32.xlu1 %v1166_v2, %s1105_s12  ;;  %352 = vrot.lane.b32.xlu0 %v1164_v1, %s1105_s12 }
  0x40   : > { %290 = vrot.lane.b32.xlu1 %v1166_v2, %s1098_s30  ;;  %288 = vrot.lane.b32.xlu0 %v1164_v1, %s1098_s30 }
  0x44   : > { %486 = vrot.lane.b32.xlu1 %v1173_v4, %s1104_s11  ;;  %484 = vrot.lane.b32.xlu0 %v1162_v0, %s1104_s11 }
  0x48   : > { %346 = vrot.lane.b32.xlu1 %v1166_v2, %s1106_s13  ;;  %344 = vrot.lane.b32.xlu0 %v1164_v1, %s1106_s13 }
  0x4c   : > { %282 = vrot.lane.b32.xlu1 %v1166_v2, %s1099_s6  ;;  %280 = vrot.lane.b32.xlu0 %v1164_v1, %s1099_s6  ;;  %s861_s6 = sld [smem:[#allocation3]] }
  0x50   : > { %478 = vrot.lane.b32.xlu1 %v1173_v4, %s1105_s12  ;;  %476 = vrot.lane.b32.xlu0 %v1162_v0, %s1105_s12 }
  0x54   : > { %338 = vrot.lane.b32.xlu1 %v1166_v2, %s1107_s14  ;;  %336 = vrot.lane.b32.xlu0 %v1164_v1, %s1107_s14 }
  0x58   : > { %274 = vrot.lane.b32.xlu1 %v1166_v2, %s1100_s7  ;;  %272 = vrot.lane.b32.xlu0 %v1164_v1, %s1100_s7 }
  0x5c   : > { %470 = vrot.lane.b32.xlu1 %v1173_v4, %s1106_s13  ;;  %468 = vrot.lane.b32.xlu0 %v1162_v0, %s1106_s13 }
  0x60   : > { %330 = vrot.lane.b32.xlu1 %v1166_v2, %s1108_s15  ;;  %328 = vrot.lane.b32.xlu0 %v1164_v1, %s1108_s15 }
  0x64   : > { %266 = vrot.lane.b32.xlu1 %v1166_v2, %s1101_s8  ;;  %264 = vrot.lane.b32.xlu0 %v1164_v1, %s1101_s8 }
  0x68   : > { %462 = vrot.lane.b32.xlu1 %v1173_v4, %s1107_s14  ;;  %460 = vrot.lane.b32.xlu0 %v1162_v0, %s1107_s14 }
  0x6c   : > { %322 = vrot.lane.b32.xlu1 %v1166_v2, %s1109_s16  ;;  %320 = vrot.lane.b32.xlu0 %v1164_v1, %s1109_s16 }
  0x70   : > { %258 = vrot.lane.b32.xlu1 %v1166_v2, %s1103_s10  ;;  %256 = vrot.lane.b32.xlu0 %v1164_v1, %s1103_s10 }
  0x74   : > { %454 = vrot.lane.b32.xlu1 %v1173_v4, %s1108_s15  ;;  %452 = vrot.lane.b32.xlu0 %v1162_v0, %s1108_s15 }
  0x78   : > { %314 = vrot.lane.b32.xlu1 %v1166_v2, %s1110_s19  ;;  %312 = vrot.lane.b32.xlu0 %v1164_v1, %s1110_s19 }
  0x7c   : > { %446 = vrot.lane.b32.xlu1 %v1173_v4, %s1109_s16  ;;  %444 = vrot.lane.b32.xlu0 %v1162_v0, %s1109_s16 }
  0x80   : > { %438 = vrot.lane.b32.xlu1 %v1173_v4, %s1110_s19  ;;  %436 = vrot.lane.b32.xlu0 %v1162_v0, %s1110_s19 }
  0x82   : > { %v421_v9 = vpop.permute.xlu1 %420  ;;  %v429_v10 = vpop.permute.xlu0 %428 }
  0x83   : > { %426 = vst.msk [vmem:[#allocation2 + $0xb0] sm:$0xf] %vm251_vm0, %v421_v9  ;;  %434 = vst.msk [vmem:[#allocation2 + $0xb8] sm:$0xf] %vm251_vm0, %v429_v10 }
  0x84   : > { %562 = vperm.xlu0 %1048, %v558_v7   ;;  %567 = vperm.xlu1 %1049, %v559_v8  }
  0x86   : > { %v423_v11 = vpop.permute.xlu1 %422  ;;  %v431_v12 = vpop.permute.xlu0 %430 }
  0x87   : > { %427 = vst.msk [vmem:[#allocation2 + $0xb4] sm:$0xf] %vm251_vm0, %v423_v11  ;;  %435 = vst.msk [vmem:[#allocation2 + $0xbc] sm:$0xf] %vm251_vm0, %v431_v12 }
  0x8a   : > { %v415_v13 = vpop.permute.xlu1 %414  ;;  %v413_v14 = vpop.permute.xlu0 %412 }
  0x8b   : > { %419 = vst.msk [vmem:[#allocation2 + $0xac] sm:$0xf] %vm251_vm0, %v415_v13  ;;  %418 = vst.msk [vmem:[#allocation2 + $0xa8] sm:$0xf] %vm251_vm0, %v413_v14 }
  0x8e   : > { %v407_v15 = vpop.permute.xlu1 %406  ;;  %v405_v16 = vpop.permute.xlu0 %404  ;;  %v1050_v17 = vld [vmem:[#allocation2 + $0xb8] sm:$0xff]   ;;  %v1051_v20 = vld [vmem:[#allocation2 + $0xb0] sm:$0xff]  }
  0x8f   : > { %411 = vst.msk [vmem:[#allocation2 + $0xa4] sm:$0xf] %vm251_vm0, %v407_v15  ;;  %410 = vst.msk [vmem:[#allocation2 + $0xa0] sm:$0xf] %vm251_vm0, %v405_v16  ;;  %821 = vmatpush1.bf16.msra.mxu1 %v1050_v17 }
  0x90   : > { %822 = vmatprep.subr.bf16.mxu1 %v1095_v3 }
  0x92   : > { %v399_v18 = vpop.permute.xlu1 %398  ;;  %v397_v19 = vpop.permute.xlu0 %396  ;;  %v1052_v23 = vld [vmem:[#allocation2 + $0xa8] sm:$0xff]  }
  0x93   : > { %403 = vst.msk [vmem:[#allocation2 + $0x9c] sm:$0xf] %vm251_vm0, %v399_v18  ;;  %402 = vst.msk [vmem:[#allocation2 + $0x98] sm:$0xf] %vm251_vm0, %v397_v19  ;;  %823 = vmatpush1.bf16.msra.mxu1 %v1051_v20 }
  0x94   : > { %824 = vmatprep.subr.bf16.mxu1 %v1095_v3 }
  0x96   : > { %v391_v21 = vpop.permute.xlu1 %390  ;;  %v389_v22 = vpop.permute.xlu0 %388  ;;  %v1053_v26 = vld [vmem:[#allocation2 + $0xa0] sm:$0xff]  }
  0x97   : > { %395 = vst.msk [vmem:[#allocation2 + $0x94] sm:$0xf] %vm251_vm0, %v391_v21  ;;  %394 = vst.msk [vmem:[#allocation2 + $0x90] sm:$0xf] %vm251_vm0, %v389_v22  ;;  %825 = vmatpush1.bf16.msra.mxu1 %v1052_v23 }
  0x98   : > { %826 = vmatprep.subr.bf16.mxu1 %v1095_v3 }
  0x9a   : > { %v371_v24 = vpop.permute.xlu1 %370  ;;  %v369_v25 = vpop.permute.xlu0 %368  ;;  %v1054_v29 = vld [vmem:[#allocation2 + $0x98] sm:$0xff]  }
  0x9b   : > { %375 = vst.msk [vmem:[#allocation2 + $0x7c] sm:$0xf] %vm251_vm0, %v371_v24  ;;  %374 = vst.msk [vmem:[#allocation2 + $0x78] sm:$0xf] %vm251_vm0, %v369_v25  ;;  %827 = vmatpush1.bf16.msra.mxu1 %v1053_v26 }
  0x9c   : > { %828 = vmatprep.subr.bf16.mxu1 %v1095_v3 }
  0x9e   : > { %v307_v27 = vpop.permute.xlu1 %306  ;;  %v305_v28 = vpop.permute.xlu0 %304  ;;  %v1056_v30 = vld [vmem:[#allocation2 + $0x90] sm:$0xff]  }
  0x9f   : > { %311 = vst.msk [vmem:[#allocation2 + $0x3c] sm:$0xf] %vm251_vm0, %v307_v27  ;;  %310 = vst.msk [vmem:[#allocation2 + $0x38] sm:$0xf] %vm251_vm0, %v305_v28  ;;  %829 = vmatpush1.bf16.msra.mxu1 %v1054_v29  ;;  %v1078_v29 = vld [vmem:[#allocation2] sm:$0xff]  }
  0xa0   : > { %830 = vmatprep.subr.bf16.mxu1 %v1095_v3 }
  0xa2   : > { %v383_v31 = vpop.permute.xlu1 %382  ;;  %v381_v32 = vpop.permute.xlu0 %380  ;;  %v1055_v33 = vld [vmem:[#allocation2 + $0x78] sm:$0xff]  }
  0xa3   : > { %387 = vst.msk [vmem:[#allocation2 + $0x8c] sm:$0xf] %vm251_vm0, %v383_v31  ;;  %386 = vst.msk [vmem:[#allocation2 + $0x88] sm:$0xf] %vm251_vm0, %v381_v32  ;;  %1002 = vmatprep.subr.bf16.mxu0 %v1055_v33  ;;  %831 = vmatpush1.bf16.msra.mxu1 %v1056_v30  ;;  %v1079_v33 = vld [vmem:[%s1360_s2] ss:$16 sps:$4 sm:$0xff]  }
  0xa4   : > { %832 = vmatprep.subr.bf16.mxu1 %v1095_v3 }
  0xa6   : > { %v363_v34 = vpop.permute.xlu1 %362  ;;  %v361_v35 = vpop.permute.xlu0 %360  ;;  %v1057_v36 = vld [vmem:[#allocation2 + $0x38] sm:$0xff]  }
  0xa7   : > { %367 = vst.msk [vmem:[#allocation2 + $0x74] sm:$0xf] %vm251_vm0, %v363_v34  ;;  %366 = vst.msk [vmem:[#allocation2 + $0x70] sm:$0xf] %vm251_vm0, %v361_v35  ;;  %1003 = vmatpush3.bf16.msra.mxu0 %v1057_v36  ;;  %v1084_v36 = vld [vmem:[%s1360_s2 + $0x8] ss:$16 sps:$4 sm:$0xff]  }
  0xaa   : > { %v299_v37 = vpop.permute.xlu1 %298  ;;  %v297_v38 = vpop.permute.xlu0 %296  ;;  %v1058_v39 = vld [vmem:[#allocation2 + $0x88] sm:$0xff]  }
  0xab   : > { %303 = vst.msk [vmem:[#allocation2 + $0x34] sm:$0xf] %vm251_vm0, %v299_v37  ;;  %302 = vst.msk [vmem:[#allocation2 + $0x30] sm:$0xf] %vm251_vm0, %v297_v38  ;;  %833 = vmatpush1.bf16.msra.mxu1 %v1058_v39 }
  0xac   : > { %834 = vmatprep.subr.bf16.mxu1 %v1095_v3 }
  0xae   : > { %v355_v41 = vpop.permute.xlu1 %354  ;;  %v353_v42 = vpop.permute.xlu0 %352  ;;  %v1059_v43 = vld [vmem:[#allocation2 + $0x70] sm:$0xff]  }
  0xaf   : > { %359 = vst.msk [vmem:[#allocation2 + $0x6c] sm:$0xf] %vm251_vm0, %v355_v41  ;;  %358 = vst.msk [vmem:[#allocation2 + $0x68] sm:$0xf] %vm251_vm0, %v353_v42  ;;  %1004 = vmatprep.subr.bf16.mxu0 %v1059_v43  ;;  %835 = vmatpush1.bf16.msra.mxu1 %v1063_v40 }
  0xb0   : > { %838 = vmatprep.subr.bf16.mxu1 %v1095_v3 }
  0xb2   : > { %v291_v44 = vpop.permute.xlu1 %290  ;;  %v289_v45 = vpop.permute.xlu0 %288  ;;  %v1060_v46 = vld [vmem:[#allocation2 + $0x30] sm:$0xff]  }
  0xb3   : > { %295 = vst.msk [vmem:[#allocation2 + $0x2c] sm:$0xf] %vm251_vm0, %v291_v44  ;;  %294 = vst.msk [vmem:[#allocation2 + $0x28] sm:$0xf] %vm251_vm0, %v289_v45  ;;  %1005 = vmatpush3.bf16.msra.mxu0 %v1060_v46 }
  0xb6   : > { %v487_v47 = vpop.permute.xlu1 %486  ;;  %v485_v48 = vpop.permute.xlu0 %484  ;;  %v1061_v49 = vld [vmem:[#allocation2 + $0x68] sm:$0xff]  }
  0xb7   : > { %491 = vst.msk [vmem:[#allocation2 + $0xf4] sm:$0xf] %vm251_vm0, %v487_v47  ;;  %490 = vst.msk [vmem:[#allocation2 + $0xf0] sm:$0xf] %vm251_vm0, %v485_v48  ;;  %1006 = vmatprep.subr.bf16.mxu0 %v1061_v49 }
  0xba   : > { %v347_v50 = vpop.permute.xlu1 %346  ;;  %v345_v51 = vpop.permute.xlu0 %344  ;;  %v1062_v52 = vld [vmem:[#allocation2 + $0x28] sm:$0xff]  }
  0xbb   : > { %351 = vst.msk [vmem:[#allocation2 + $0x64] sm:$0xf] %vm251_vm0, %v347_v50  ;;  %350 = vst.msk [vmem:[#allocation2 + $0x60] sm:$0xf] %vm251_vm0, %v345_v51  ;;  %1007 = vmatpush3.bf16.msra.mxu0 %v1062_v52 }
  0xbe   : > { %v283_v53 = vpop.permute.xlu1 %282  ;;  %v281_v54 = vpop.permute.xlu0 %280  ;;  %v1064_v55 = vld [vmem:[#allocation2 + $0xf0] sm:$0xff]  }
  0xbf   : > { %287 = vst.msk [vmem:[#allocation2 + $0x24] sm:$0xf] %vm251_vm0, %v283_v53  ;;  %286 = vst.msk [vmem:[#allocation2 + $0x20] sm:$0xf] %vm251_vm0, %v281_v54  ;;  %839 = vmatpush2.bf16.msra.mxu1 %v1064_v55 }
  0xc0   : > { %840 = vmatprep.subr.bf16.mxu1 %v1095_v3 }
  0xc2   : > { %v479_v56 = vpop.permute.xlu1 %478  ;;  %v477_v57 = vpop.permute.xlu0 %476  ;;  %v1065_v58 = vld [vmem:[#allocation2 + $0x60] sm:$0xff]  }
  0xc3   : > { %483 = vst.msk [vmem:[#allocation2 + $0xec] sm:$0xf] %vm251_vm0, %v479_v56  ;;  %482 = vst.msk [vmem:[#allocation2 + $0xe8] sm:$0xf] %vm251_vm0, %v477_v57  ;;  %1008 = vmatprep.subr.bf16.mxu0 %v1065_v58 }
  0xc6   : > { %v339_v59 = vpop.permute.xlu1 %338  ;;  %v337_v60 = vpop.permute.xlu0 %336  ;;  %v1066_v61 = vld [vmem:[#allocation2 + $0x20] sm:$0xff]  }
  0xc7   : > { %343 = vst.msk [vmem:[#allocation2 + $0x5c] sm:$0xf] %vm251_vm0, %v339_v59  ;;  %342 = vst.msk [vmem:[#allocation2 + $0x58] sm:$0xf] %vm251_vm0, %v337_v60  ;;  %1009 = vmatpush3.bf16.msra.mxu0 %v1066_v61 }
  0xca   : > { %v275_v62 = vpop.permute.xlu1 %274  ;;  %v273_v63 = vpop.permute.xlu0 %272  ;;  %v1067_v0 = vld [vmem:[#allocation2 + $0xe8] sm:$0xff]  }
  0xcb   : > { %279 = vst.msk [vmem:[#allocation2 + $0x1c] sm:$0xf] %vm251_vm0, %v275_v62  ;;  %278 = vst.msk [vmem:[#allocation2 + $0x18] sm:$0xf] %vm251_vm0, %v273_v63  ;;  %841 = vmatpush2.bf16.msra.mxu1 %v1067_v0 }
  0xcc   : > { %842 = vmatprep.subr.bf16.mxu1 %v1095_v3 }
  0xce   : > { %v471_v1 = vpop.permute.xlu1 %470  ;;  %v469_v2 = vpop.permute.xlu0 %468  ;;  %v1068_v4 = vld [vmem:[#allocation2 + $0x58] sm:$0xff]  }
  0xcf   : > { %475 = vst.msk [vmem:[#allocation2 + $0xe4] sm:$0xf] %vm251_vm0, %v471_v1  ;;  %474 = vst.msk [vmem:[#allocation2 + $0xe0] sm:$0xf] %vm251_vm0, %v469_v2  ;;  %1010 = vmatprep.subr.bf16.mxu0 %v1068_v4 }
  0xd2   : > { %v331_v5 = vpop.permute.xlu1 %330  ;;  %v329_v6 = vpop.permute.xlu0 %328  ;;  %v1069_v7 = vld [vmem:[#allocation2 + $0x18] sm:$0xff]  }
  0xd3   : > { %335 = vst.msk [vmem:[#allocation2 + $0x54] sm:$0xf] %vm251_vm0, %v331_v5  ;;  %334 = vst.msk [vmem:[#allocation2 + $0x50] sm:$0xf] %vm251_vm0, %v329_v6  ;;  %1011 = vmatpush3.bf16.msra.mxu0 %v1069_v7 }
  0xd6   : > { %v267_v8 = vpop.permute.xlu1 %266  ;;  %v265_v9 = vpop.permute.xlu0 %264  ;;  %v1070_v10 = vld [vmem:[#allocation2 + $0xe0] sm:$0xff]  }
  0xd7   : > { %271 = vst.msk [vmem:[#allocation2 + $0x14] sm:$0xf] %vm251_vm0, %v267_v8  ;;  %270 = vst.msk [vmem:[#allocation2 + $0x10] sm:$0xf] %vm251_vm0, %v265_v9  ;;  %843 = vmatpush2.bf16.msra.mxu1 %v1070_v10 }
  0xd8   : > { %844 = vmatprep.subr.bf16.mxu1 %v1095_v3 }
  0xda   : > { %v463_v11 = vpop.permute.xlu1 %462  ;;  %v461_v12 = vpop.permute.xlu0 %460  ;;  %v1071_v13 = vld [vmem:[#allocation2 + $0x50] sm:$0xff]  }
  0xdb   : > { %467 = vst.msk [vmem:[#allocation2 + $0xdc] sm:$0xf] %vm251_vm0, %v463_v11  ;;  %466 = vst.msk [vmem:[#allocation2 + $0xd8] sm:$0xf] %vm251_vm0, %v461_v12  ;;  %1012 = vmatprep.subr.bf16.mxu0 %v1071_v13 }
  0xde   : > { %v323_v14 = vpop.permute.xlu1 %322  ;;  %v321_v15 = vpop.permute.xlu0 %320  ;;  %v1072_v16 = vld [vmem:[#allocation2 + $0x10] sm:$0xff]  }
  0xdf   : > { %327 = vst.msk [vmem:[#allocation2 + $0x4c] sm:$0xf] %vm251_vm0, %v323_v14  ;;  %326 = vst.msk [vmem:[#allocation2 + $0x48] sm:$0xf] %vm251_vm0, %v321_v15  ;;  %1013 = vmatpush3.bf16.msra.mxu0 %v1072_v16 }
  0xe2   : > { %v259_v17 = vpop.permute.xlu1 %258  ;;  %v257_v18 = vpop.permute.xlu0 %256  ;;  %v1073_v19 = vld [vmem:[#allocation2 + $0xd8] sm:$0xff]  }
  0xe3   : > { %263 = vst.msk [vmem:[#allocation2 + $0xc] sm:$0xf] %vm251_vm0, %v259_v17  ;;  %262 = vst.msk [vmem:[#allocation2 + $0x8] sm:$0xf] %vm251_vm0, %v257_v18  ;;  %845 = vmatpush2.bf16.msra.mxu1 %v1073_v19 }
  0xe4   : > { %846 = vmatprep.subr.bf16.mxu1 %v1095_v3 }
  0xe6   : > { %v455_v20 = vpop.permute.xlu1 %454  ;;  %v453_v21 = vpop.permute.xlu0 %452  ;;  %v1074_v22 = vld [vmem:[#allocation2 + $0x48] sm:$0xff]  }
  0xe7   : > { %459 = vst.msk [vmem:[#allocation2 + $0xd4] sm:$0xf] %vm251_vm0, %v455_v20  ;;  %458 = vst.msk [vmem:[#allocation2 + $0xd0] sm:$0xf] %vm251_vm0, %v453_v21  ;;  %1014 = vmatprep.subr.bf16.mxu0 %v1074_v22 }
  0xea   : > { %v315_v23 = vpop.permute.xlu1 %314  ;;  %v313_v24 = vpop.permute.xlu0 %312  ;;  %v1075_v25 = vld [vmem:[#allocation2 + $0x8] sm:$0xff]  }
  0xeb   : > { %319 = vst.msk [vmem:[#allocation2 + $0x44] sm:$0xf] %vm251_vm0, %v315_v23  ;;  %318 = vst.msk [vmem:[#allocation2 + $0x40] sm:$0xf] %vm251_vm0, %v313_v24  ;;  %1015 = vmatpush3.bf16.msra.mxu0 %v1075_v25 }
  0xee   : > { %v447_v26 = vpop.permute.xlu1 %446  ;;  %v445_v27 = vpop.permute.xlu0 %444  ;;  %v1076_v28 = vld [vmem:[#allocation2 + $0xd0] sm:$0xff]  }
  0xef   : > { %451 = vst.msk [vmem:[#allocation2 + $0xcc] sm:$0xf] %vm251_vm0, %v447_v26  ;;  %450 = vst.msk [vmem:[#allocation2 + $0xc8] sm:$0xf] %vm251_vm0, %v445_v27  ;;  %847 = vmatpush2.bf16.msra.mxu1 %v1076_v28 }
  0xf0   : > { %848 = vmatprep.subr.bf16.mxu1 %v1095_v3 }
  0xf2   : > { %v439_v30 = vpop.permute.xlu1 %438  ;;  %v437_v31 = vpop.permute.xlu0 %436  ;;  %v1077_v32 = vld [vmem:[#allocation2 + $0x40] sm:$0xff]  }
  0xf3   : > { %443 = vst.msk [vmem:[#allocation2 + $0xc4] sm:$0xf] %vm251_vm0, %v439_v30  ;;  %442 = vst.msk [vmem:[#allocation2 + $0xc0] sm:$0xf] %vm251_vm0, %v437_v31  ;;  %1016 = vmatprep.subr.bf16.mxu0 %v1077_v32 }
  0xf4   : > { %1017 = vmatpush3.bf16.msra.mxu0 %v1078_v29 }
  0xf6   : > { %v1082_v34 = vld [vmem:[#allocation2 + $0xc8] sm:$0xff]  }
  0xf7   : > { %812 = vmatmul.mubr.bf16.vlgmr.msra.gmra.mxu0 %v1079_v33  ;;  %849 = vmatpush2.bf16.msra.mxu1 %v1082_v34 }
  0xf8   : > { %850 = vmatprep.subr.bf16.mxu1 %v1095_v3  ;;  %v864_v3 = vstv %s861_s6 }
  0xfa   : > { %v1083_v35 = vld [vmem:[#allocation2 + $0xc0] sm:$0xff]  }
  0xfb   : > { %851 = vmatpush2.bf16.msra.mxu1 %v1083_v35 }
  0xfe   : > { %853 = vmatmul.mubr.bf16.vlgmr.msra.gmra.mxu1 %v1084_v36 }
  0xff   : > { %v563_v39 = vpop.permute.xlu0 %562  ;;  %v568_v44 = vpop.permute.xlu1 %567 }
 0x1b7   : > { %v1018_v37 = vpop.f32.mrf.mxu0 }
 0x1b9   : > { %v1019_v38 = vpop.f32.mrf.mxu0 }
 0x1ba   : > { %v1020_v40 = vadd.f32 %v1019_v38, %v1018_v37 }
 0x1bb   : > { %v1021_v41 = vpop.f32.mrf.mxu0 }
 0x1bc   : > { %v814_v42 = vadd.f32 %v1020_v40, %v563_v39 }
 0x1bd   : > { %v1022_v43 = vpop.f32.mrf.mxu0 }
 0x1be   : > { %v1023_v45 = vadd.f32 %v1022_v43, %v1021_v41  ;;  %v854_v46 = vpop.f32.mrf.mxu1 }
 0x1bf   : > { %v855_v47 = vadd.f32 %v854_v46, %v814_v42 }
 0x1c0   : > { %v817_v48 = vadd.f32 %v1023_v45, %v568_v44  ;;  %v856_v49 = vpop.f32.mrf.mxu1 }
 0x1c1   : > { %vm862_vm2 = vcmp.gt.f32.partialorder %v855_v47, 0.0  ;;  %v865_v50 = vmul.f32 %v864_v3, %v855_v47 }
 0x1c2   : > { %v857_v51 = vpop.f32.mrf.mxu1 }
 0x1c3   : > { %v867_v52 = vsel %vm862_vm2, %v855_v47, %v865_v50  ;;  %v858_v53 = vadd.f32 %v857_v51, %v817_v48 }
 0x1c4   : > { %v1000_v54 = vpack.c.bf16 %v867_v52, %v867_v52  ;;  %v859_v55 = vpop.f32.mrf.mxu1 }
 0x1c5   : > { %vm863_vm3 = vcmp.gt.f32.partialorder %v858_v53, 0.0  ;;  %v866_v56 = vmul.f32 %v864_v3, %v858_v53 }
 0x1c6   : > { %877 = vst.msk [vmem:[%s245_s9] sm:$0xf] %vm251_vm0, %v1000_v54 }
 0x1c7   : > { %v868_v57 = vsel %vm863_vm3, %v858_v53, %v866_v56 }
 0x1c8   : > { %v1001_v58 = vpack.c.bf16 %v868_v57, %v868_v57 }
 0x1ca   : > { %878 = vst.msk [vmem:[%s245_s9 + $0x4] sm:$0xf] %vm251_vm0, %v1001_v58 }
 0x1cb PF: > { %s16_s20 = sadd.s32 1, %s1093_s20  }
 0x1cc   : > { %p13_p4 = scmp.ge.s32.totalorder %s16_s20, 4  }
 0x1ce   :  { %15 = sbr.rel (!%p13_p4) target bundleno = 2 (0x2), region = 73 }

// kernel: generator_forward.8
= control target key start
LH: loop header
LB: loop body
LE: loop exit
PB: predicated region body
PF: predicated region fallthrough
CT: control target
= control target key end

     0   :  { %s1235_s20 = smov 0   ;;  %s1476_s0 = inlined_call_operand.vmem [shape: bf16[2,16,47], index: 0, kind: input, shape index: {}]   ;;  %s1477_s1 = inlined_call_operand.vmem [shape: bf16[2,16,47], index: 1, kind: input, shape index: {}]   ;;  %s1478_s2 = inlined_call_operand.vmem [shape: bf16[32,496], index: 2, kind: input, shape index: {}]   ;;  %s1479_s3 = inlined_call_operand.vmem [shape: f32[32,1], index: 3, kind: input, shape index: {}]   ;;  %s1480_s4 = inlined_call_operand.<no memory space> [shape: f32[1], index: 4, kind: input, shape index: {}]   ;;  %s1481_s5 = inlined_call_operand.vmem [shape: bf16[2,32,32], index: 5, kind: output, shape index: {}]  }
   0x1   :  { %10 = sst [smem:[#allocation3]] %s1480_s4 }
   0x2 LB: > { %s1016_s21 = sadd.s32 4294967295, %s1184_s20   ;;  %p1020_p0 = scmp.ge.s32.totalorder %s1184_s20, 1  ;;  %s1184_s20 = sphi %s1235_s20, %s16_s20  }
   0x3   : > { %p198_p1 = scmp.lt.s32.totalorder %s1184_s20, 3 }
   0x5   : > { %p199_p2 = pnand %p1020_p0, %p198_p1 }
   0x6   : > { %p231_p3 = scmp.lt.s32.totalorder (!%p199_p2), %s1016_s21, 1  ;;  %s1187_s28 = smov (!%p199_p2), 122  }
   0x7   : > { %202 = sbr.rel (%p199_p2) target bundleno = 467 (0x1d3), region = 40  ;;  %s1188_s29 = smov (!%p199_p2), 121  }
   0x8   : > { %s1189_s30 = smov (!%p199_p2), 123   ;;  %s1190_s6 = smov (!%p199_p2), 124  }
   0x9   : > { %s1191_s7 = smov (!%p199_p2), 125   ;;  %s1192_s8 = smov (!%p199_p2), 126  }
   0xa   : > { %s1193_s9 = smov (!%p199_p2), 113   ;;  %s1194_s10 = smov (!%p199_p2), 127  }
   0xb   : > { %s1195_s11 = smov (!%p199_p2), 114   ;;  %s1196_s12 = smov (!%p199_p2), 115  }
   0xc   : > { %s1483_s21 = smov (!%p231_p3, %s1016_s21), 1  ;;  %vm251_vm0 = vcmask 257024   ;;  %v1186_v3 = vmov 0   ;;  %s1197_s13 = smov 116   ;;  %v1166_v5 = vld [vmem:[%s1478_s2 + $0x4] ss:$16 sps:$4 sm:$0xff]  }
   0xd   : > { %s1074_s4 = sshll.u32 %s1483_s21, 3  ;;  %866 = vmatprep.subr.bf16.mxu1 %v1186_v3  ;;  %1133 = vset.pattern.permute.xlu0 %v1186_v3  ;;  %s1198_s14 = smov 117   ;;  %v1171_v6 = vld [vmem:[%s1478_s2 + $0xc] ss:$16 sps:$4 sm:$0xff]   ;;  %vm810_vm1 = vcmask 916480   ;;  %v562_v11 = vld [vmem:[%s1479_s3] sm:$0xff] }
   0xe   : > { %s240_s24 = scalar_lea.vmem %s1477_s1, %s1074_s4  ;;  %s235_s27 = scalar_lea.vmem %s1476_s0, %s1074_s4  ;;  %1134 = vset.pattern.permute.xlu1 %v1186_v3  ;;  %849 = vmatprep.mubr.bf16.mxu0 %v1166_v5  ;;  %v563_v12 = vld [vmem:[%s1479_s3 + $0x8] sm:$0xff]  ;;  %v564_v13 = vld [vmem:[%s1479_s3 + $0x10] sm:$0xff]  ;;  %v565_v14 = vld [vmem:[%s1479_s3 + $0x18] sm:$0xff] }
   0xf   : > { %v1252_v0 = vld [vmem:[%s240_s24] sm:$0xf]  ;;  %v1256_v2 = vld [vmem:[%s235_s27 + $0x4] sm:$0xf]  ;;  %s1199_s15 = smov 118   ;;  %s1200_s16 = smov 119   ;;  %1066 = vmatprep.mubr.msk.bf16.mxu1 %vm810_vm1, %v1171_v6 }
  0x10   : > { %v1254_v1 = vld [vmem:[%s235_s27] sm:$0xf]  ;;  %420 = vrot.lane.b32.xlu1 %v1252_v0, %s1187_s28  ;;  %428 = vrot.lane.b32.xlu0 %v1252_v0, %s1188_s29  ;;  %v1263_v4 = vld [vmem:[%s240_s24 + $0x4] sm:$0xf]  ;;  %253 = vst.msk [vmem:[#allocation2 + $0x4] sm:$0xf] %vm251_vm0, %v1256_v2 }
  0x11   : > { %252 = vst.msk [vmem:[#allocation2] sm:$0xf] %vm251_vm0, %v1254_v1  ;;  %376 = vst.msk [vmem:[#allocation2 + $0x80] sm:$0xf] %vm251_vm0, %v1252_v0  ;;  %s1201_s19 = smov 120   ;;  %s915_s18 = sld [smem:[#allocation3]] }
  0x12   : > { %377 = vst.msk [vmem:[#allocation2 + $0x84] sm:$0xf] %vm251_vm0, %v1263_v4 }
  0x14   : > { %422 = vrot.lane.b32.xlu1 %v1263_v4, %s1187_s28  ;;  %430 = vrot.lane.b32.xlu0 %v1263_v4, %s1188_s29 }
  0x18   : > { %414 = vrot.lane.b32.xlu1 %v1263_v4, %s1189_s30  ;;  %412 = vrot.lane.b32.xlu0 %v1252_v0, %s1189_s30 }
  0x19   : > { %v1148_v42 = vld [vmem:[#allocation2 + $0x80] sm:$0xff]  }
  0x1c   : > { %406 = vrot.lane.b32.xlu1 %v1263_v4, %s1190_s6  ;;  %404 = vrot.lane.b32.xlu0 %v1252_v0, %s1190_s6 }
  0x20   : > { %398 = vrot.lane.b32.xlu1 %v1263_v4, %s1191_s7  ;;  %396 = vrot.lane.b32.xlu0 %v1252_v0, %s1191_s7 }
  0x24   : > { %390 = vrot.lane.b32.xlu1 %v1263_v4, %s1192_s8  ;;  %388 = vrot.lane.b32.xlu0 %v1252_v0, %s1192_s8 }
  0x28   : > { %370 = vrot.lane.b32.xlu1 %v1256_v2, %s1193_s9  ;;  %368 = vrot.lane.b32.xlu0 %v1254_v1, %s1193_s9 }
  0x2c   : > { %306 = vrot.lane.b32.xlu1 %v1256_v2, %s1188_s29  ;;  %304 = vrot.lane.b32.xlu0 %v1254_v1, %s1188_s29 }
  0x30   : > { %382 = vrot.lane.b32.xlu1 %v1263_v4, %s1194_s10  ;;  %380 = vrot.lane.b32.xlu0 %v1252_v0, %s1194_s10 }
  0x34   : > { %362 = vrot.lane.b32.xlu1 %v1256_v2, %s1195_s11  ;;  %360 = vrot.lane.b32.xlu0 %v1254_v1, %s1195_s11 }
  0x38   : > { %298 = vrot.lane.b32.xlu1 %v1256_v2, %s1187_s28  ;;  %296 = vrot.lane.b32.xlu0 %v1254_v1, %s1187_s28 }
  0x3c   : > { %354 = vrot.lane.b32.xlu1 %v1256_v2, %s1196_s12  ;;  %352 = vrot.lane.b32.xlu0 %v1254_v1, %s1196_s12 }
  0x40   : > { %290 = vrot.lane.b32.xlu1 %v1256_v2, %s1189_s30  ;;  %288 = vrot.lane.b32.xlu0 %v1254_v1, %s1189_s30 }
  0x44   : > { %486 = vrot.lane.b32.xlu1 %v1263_v4, %s1195_s11  ;;  %484 = vrot.lane.b32.xlu0 %v1252_v0, %s1195_s11 }
  0x48   : > { %346 = vrot.lane.b32.xlu1 %v1256_v2, %s1197_s13  ;;  %344 = vrot.lane.b32.xlu0 %v1254_v1, %s1197_s13 }
  0x4c   : > { %282 = vrot.lane.b32.xlu1 %v1256_v2, %s1190_s6  ;;  %280 = vrot.lane.b32.xlu0 %v1254_v1, %s1190_s6 }
  0x50   : > { %478 = vrot.lane.b32.xlu1 %v1263_v4, %s1196_s12  ;;  %476 = vrot.lane.b32.xlu0 %v1252_v0, %s1196_s12 }
  0x54   : > { %338 = vrot.lane.b32.xlu1 %v1256_v2, %s1198_s14  ;;  %336 = vrot.lane.b32.xlu0 %v1254_v1, %s1198_s14 }
  0x58   : > { %274 = vrot.lane.b32.xlu1 %v1256_v2, %s1191_s7  ;;  %272 = vrot.lane.b32.xlu0 %v1254_v1, %s1191_s7 }
  0x5c   : > { %470 = vrot.lane.b32.xlu1 %v1263_v4, %s1197_s13  ;;  %468 = vrot.lane.b32.xlu0 %v1252_v0, %s1197_s13 }
  0x60   : > { %330 = vrot.lane.b32.xlu1 %v1256_v2, %s1199_s15  ;;  %328 = vrot.lane.b32.xlu0 %v1254_v1, %s1199_s15 }
  0x64   : > { %266 = vrot.lane.b32.xlu1 %v1256_v2, %s1192_s8  ;;  %264 = vrot.lane.b32.xlu0 %v1254_v1, %s1192_s8 }
  0x68   : > { %462 = vrot.lane.b32.xlu1 %v1263_v4, %s1198_s14  ;;  %460 = vrot.lane.b32.xlu0 %v1252_v0, %s1198_s14 }
  0x6c   : > { %322 = vrot.lane.b32.xlu1 %v1256_v2, %s1200_s16  ;;  %320 = vrot.lane.b32.xlu0 %v1254_v1, %s1200_s16 }
  0x70   : > { %258 = vrot.lane.b32.xlu1 %v1256_v2, %s1194_s10  ;;  %256 = vrot.lane.b32.xlu0 %v1254_v1, %s1194_s10 }
  0x74   : > { %454 = vrot.lane.b32.xlu1 %v1263_v4, %s1199_s15  ;;  %452 = vrot.lane.b32.xlu0 %v1252_v0, %s1199_s15 }
  0x78   : > { %314 = vrot.lane.b32.xlu1 %v1256_v2, %s1201_s19  ;;  %312 = vrot.lane.b32.xlu0 %v1254_v1, %s1201_s19 }
  0x7c   : > { %446 = vrot.lane.b32.xlu1 %v1263_v4, %s1200_s16  ;;  %444 = vrot.lane.b32.xlu0 %v1252_v0, %s1200_s16 }
  0x80   : > { %438 = vrot.lane.b32.xlu1 %v1263_v4, %s1201_s19  ;;  %436 = vrot.lane.b32.xlu0 %v1252_v0, %s1201_s19  ;;  %s1076_s19 = sshll.u32 %s1483_s21, 4 }
  0x81   : > { %s1463_s23 = scalar_lea.vmem %s1481_s5, %s1076_s19 }
  0x82   : > { %v421_v7 = vpop.permute.xlu1 %420  ;;  %v429_v8 = vpop.permute.xlu0 %428 }
  0x83   : > { %426 = vst.msk [vmem:[#allocation2 + $0xb0] sm:$0xf] %vm251_vm0, %v421_v7  ;;  %434 = vst.msk [vmem:[#allocation2 + $0xb8] sm:$0xf] %vm251_vm0, %v429_v8 }
  0x84   : > { %568 = vperm.xlu0 %1133, %v562_v11   ;;  %573 = vperm.xlu1 %1134, %v563_v12  }
  0x86   : > { %v423_v9 = vpop.permute.xlu1 %422  ;;  %v431_v10 = vpop.permute.xlu0 %430 }
  0x87   : > { %427 = vst.msk [vmem:[#allocation2 + $0xb4] sm:$0xf] %vm251_vm0, %v423_v9  ;;  %435 = vst.msk [vmem:[#allocation2 + $0xbc] sm:$0xf] %vm251_vm0, %v431_v10 }
  0x88   : > { %578 = vperm.xlu1 %1134, %v564_v13   ;;  %583 = vperm.xlu0 %1133, %v565_v14  }
  0x8a   : > { %v415_v15 = vpop.permute.xlu1 %414  ;;  %v413_v16 = vpop.permute.xlu0 %412 }
  0x8b   : > { %419 = vst.msk [vmem:[#allocation2 + $0xac] sm:$0xf] %vm251_vm0, %v415_v15  ;;  %418 = vst.msk [vmem:[#allocation2 + $0xa8] sm:$0xf] %vm251_vm0, %v413_v16 }
  0x8e   : > { %v407_v17 = vpop.permute.xlu1 %406  ;;  %v405_v18 = vpop.permute.xlu0 %404  ;;  %v1135_v19 = vld [vmem:[#allocation2 + $0xb8] sm:$0xff]   ;;  %v1136_v22 = vld [vmem:[#allocation2 + $0xb0] sm:$0xff]  }
  0x8f   : > { %411 = vst.msk [vmem:[#allocation2 + $0xa4] sm:$0xf] %vm251_vm0, %v407_v17  ;;  %410 = vst.msk [vmem:[#allocation2 + $0xa0] sm:$0xf] %vm251_vm0, %v405_v18  ;;  %867 = vmatpush1.bf16.msra.mxu1 %v1135_v19 }
  0x90   : > { %868 = vmatprep.subr.bf16.mxu1 %v1186_v3 }
  0x92   : > { %v399_v20 = vpop.permute.xlu1 %398  ;;  %v397_v21 = vpop.permute.xlu0 %396  ;;  %v1137_v25 = vld [vmem:[#allocation2 + $0xa8] sm:$0xff]  }
  0x93   : > { %403 = vst.msk [vmem:[#allocation2 + $0x9c] sm:$0xf] %vm251_vm0, %v399_v20  ;;  %402 = vst.msk [vmem:[#allocation2 + $0x98] sm:$0xf] %vm251_vm0, %v397_v21  ;;  %869 = vmatpush1.bf16.msra.mxu1 %v1136_v22 }
  0x94   : > { %870 = vmatprep.subr.bf16.mxu1 %v1186_v3 }
  0x96   : > { %v391_v23 = vpop.permute.xlu1 %390  ;;  %v389_v24 = vpop.permute.xlu0 %388  ;;  %v1138_v28 = vld [vmem:[#allocation2 + $0xa0] sm:$0xff]  }
  0x97   : > { %395 = vst.msk [vmem:[#allocation2 + $0x94] sm:$0xf] %vm251_vm0, %v391_v23  ;;  %394 = vst.msk [vmem:[#allocation2 + $0x90] sm:$0xf] %vm251_vm0, %v389_v24  ;;  %871 = vmatpush1.bf16.msra.mxu1 %v1137_v25 }
  0x98   : > { %872 = vmatprep.subr.bf16.mxu1 %v1186_v3 }
  0x9a   : > { %v371_v26 = vpop.permute.xlu1 %370  ;;  %v369_v27 = vpop.permute.xlu0 %368  ;;  %v1139_v31 = vld [vmem:[#allocation2 + $0x98] sm:$0xff]  }
  0x9b   : > { %375 = vst.msk [vmem:[#allocation2 + $0x7c] sm:$0xf] %vm251_vm0, %v371_v26  ;;  %374 = vst.msk [vmem:[#allocation2 + $0x78] sm:$0xf] %vm251_vm0, %v369_v27  ;;  %873 = vmatpush1.bf16.msra.mxu1 %v1138_v28 }
  0x9c   : > { %874 = vmatprep.subr.bf16.mxu1 %v1186_v3 }
  0x9e   : > { %v307_v29 = vpop.permute.xlu1 %306  ;;  %v305_v30 = vpop.permute.xlu0 %304  ;;  %v1141_v32 = vld [vmem:[#allocation2 + $0x90] sm:$0xff]  }
  0x9f   : > { %311 = vst.msk [vmem:[#allocation2 + $0x3c] sm:$0xf] %vm251_vm0, %v307_v29  ;;  %310 = vst.msk [vmem:[#allocation2 + $0x38] sm:$0xf] %vm251_vm0, %v305_v30  ;;  %875 = vmatpush1.bf16.msra.mxu1 %v1139_v31  ;;  %v1163_v31 = vld [vmem:[#allocation2] sm:$0xff]  }
  0xa0   : > { %876 = vmatprep.subr.bf16.mxu1 %v1186_v3 }
  0xa2   : > { %v383_v33 = vpop.permute.xlu1 %382  ;;  %v381_v34 = vpop.permute.xlu0 %380  ;;  %v1140_v35 = vld [vmem:[#allocation2 + $0x78] sm:$0xff]  }
  0xa3   : > { %387 = vst.msk [vmem:[#allocation2 + $0x8c] sm:$0xf] %vm251_vm0, %v383_v33  ;;  %386 = vst.msk [vmem:[#allocation2 + $0x88] sm:$0xf] %vm251_vm0, %v381_v34  ;;  %1081 = vmatprep.subr.bf16.mxu0 %v1140_v35  ;;  %877 = vmatpush1.bf16.msra.mxu1 %v1141_v32  ;;  %v1164_v35 = vld [vmem:[%s1478_s2] ss:$16 sps:$4 sm:$0xff]  }
  0xa4   : > { %878 = vmatprep.subr.bf16.mxu1 %v1186_v3 }
  0xa6   : > { %v363_v36 = vpop.permute.xlu1 %362  ;;  %v361_v37 = vpop.permute.xlu0 %360  ;;  %v1142_v38 = vld [vmem:[#allocation2 + $0x38] sm:$0xff]  }
  0xa7   : > { %367 = vst.msk [vmem:[#allocation2 + $0x74] sm:$0xf] %vm251_vm0, %v363_v36  ;;  %366 = vst.msk [vmem:[#allocation2 + $0x70] sm:$0xf] %vm251_vm0, %v361_v37  ;;  %1082 = vmatpush3.bf16.msra.mxu0 %v1142_v38  ;;  %v1172_v36 = vld [vmem:[%s1478_s2 + $0x24] ss:$16 sps:$4 sm:$0xff]  }
  0xaa   : > { %v299_v39 = vpop.permute.xlu1 %298  ;;  %v297_v40 = vpop.permute.xlu0 %296  ;;  %v1143_v41 = vld [vmem:[#allocation2 + $0x88] sm:$0xff]  }
  0xab   : > { %303 = vst.msk [vmem:[#allocation2 + $0x34] sm:$0xf] %vm251_vm0, %v299_v39  ;;  %302 = vst.msk [vmem:[#allocation2 + $0x30] sm:$0xf] %vm251_vm0, %v297_v40  ;;  %879 = vmatpush1.bf16.msra.mxu1 %v1143_v41  ;;  %v1169_v39 = vld [vmem:[%s1478_s2 + $0x8] ss:$16 sps:$4 sm:$0xff]  }
  0xac   : > { %880 = vmatprep.subr.bf16.mxu1 %v1186_v3  ;;  %v1174_v40 = vld [vmem:[%s1478_s2 + $0x20] ss:$16 sps:$4 sm:$0xff]   ;;  %v1175_v41 = vld [vmem:[%s1478_s2 + $0x2c] ss:$16 sps:$4 sm:$0xff]  }
  0xae   : > { %v355_v43 = vpop.permute.xlu1 %354  ;;  %v353_v44 = vpop.permute.xlu0 %352  ;;  %v1144_v45 = vld [vmem:[#allocation2 + $0x70] sm:$0xff]  }
  0xaf   : > { %359 = vst.msk [vmem:[#allocation2 + $0x6c] sm:$0xf] %vm251_vm0, %v355_v43  ;;  %358 = vst.msk [vmem:[#allocation2 + $0x68] sm:$0xf] %vm251_vm0, %v353_v44  ;;  %1083 = vmatprep.subr.bf16.mxu0 %v1144_v45  ;;  %881 = vmatpush1.bf16.msra.mxu1 %v1148_v42 }
  0xb0   : > { %884 = vmatprep.subr.bf16.mxu1 %v1186_v3 }
  0xb2   : > { %v291_v46 = vpop.permute.xlu1 %290  ;;  %v289_v47 = vpop.permute.xlu0 %288  ;;  %v1145_v48 = vld [vmem:[#allocation2 + $0x30] sm:$0xff]  }
  0xb3   : > { %295 = vst.msk [vmem:[#allocation2 + $0x2c] sm:$0xf] %vm251_vm0, %v291_v46  ;;  %294 = vst.msk [vmem:[#allocation2 + $0x28] sm:$0xf] %vm251_vm0, %v289_v47  ;;  %1084 = vmatpush3.bf16.msra.mxu0 %v1145_v48 }
  0xb6   : > { %v487_v49 = vpop.permute.xlu1 %486  ;;  %v485_v50 = vpop.permute.xlu0 %484  ;;  %v1146_v51 = vld [vmem:[#allocation2 + $0x68] sm:$0xff]  }
  0xb7   : > { %491 = vst.msk [vmem:[#allocation2 + $0xf4] sm:$0xf] %vm251_vm0, %v487_v49  ;;  %490 = vst.msk [vmem:[#allocation2 + $0xf0] sm:$0xf] %vm251_vm0, %v485_v50  ;;  %1085 = vmatprep.subr.bf16.mxu0 %v1146_v51 }
  0xba   : > { %v347_v52 = vpop.permute.xlu1 %346  ;;  %v345_v53 = vpop.permute.xlu0 %344  ;;  %v1147_v54 = vld [vmem:[#allocation2 + $0x28] sm:$0xff]  }
  0xbb   : > { %351 = vst.msk [vmem:[#allocation2 + $0x64] sm:$0xf] %vm251_vm0, %v347_v52  ;;  %350 = vst.msk [vmem:[#allocation2 + $0x60] sm:$0xf] %vm251_vm0, %v345_v53  ;;  %1086 = vmatpush3.bf16.msra.mxu0 %v1147_v54  ;;  %v920_v52 = vstv %s915_s18 }
  0xbe   : > { %v283_v55 = vpop.permute.xlu1 %282  ;;  %v281_v56 = vpop.permute.xlu0 %280  ;;  %v1149_v57 = vld [vmem:[#allocation2 + $0xf0] sm:$0xff]  }
  0xbf   : > { %287 = vst.msk [vmem:[#allocation2 + $0x24] sm:$0xf] %vm251_vm0, %v283_v55  ;;  %286 = vst.msk [vmem:[#allocation2 + $0x20] sm:$0xf] %vm251_vm0, %v281_v56  ;;  %885 = vmatpush2.bf16.msra.mxu1 %v1149_v57 }
  0xc0   : > { %886 = vmatprep.subr.bf16.mxu1 %v1186_v3 }
  0xc2   : > { %v479_v58 = vpop.permute.xlu1 %478  ;;  %v477_v59 = vpop.permute.xlu0 %476  ;;  %v1150_v60 = vld [vmem:[#allocation2 + $0x60] sm:$0xff]  }
  0xc3   : > { %483 = vst.msk [vmem:[#allocation2 + $0xec] sm:$0xf] %vm251_vm0, %v479_v58  ;;  %482 = vst.msk [vmem:[#allocation2 + $0xe8] sm:$0xf] %vm251_vm0, %v477_v59  ;;  %1087 = vmatprep.subr.bf16.mxu0 %v1150_v60 }
  0xc6   : > { %v339_v61 = vpop.permute.xlu1 %338  ;;  %v337_v62 = vpop.permute.xlu0 %336  ;;  %v1151_v63 = vld [vmem:[#allocation2 + $0x20] sm:$0xff]  }
  0xc7   : > { %343 = vst.msk [vmem:[#allocation2 + $0x5c] sm:$0xf] %vm251_vm0, %v339_v61  ;;  %342 = vst.msk [vmem:[#allocation2 + $0x58] sm:$0xf] %vm251_vm0, %v337_v62  ;;  %1088 = vmatpush3.bf16.msra.mxu0 %v1151_v63 }
  0xca   : > { %v275_v0 = vpop.permute.xlu1 %274  ;;  %v273_v1 = vpop.permute.xlu0 %272  ;;  %v1152_v2 = vld [vmem:[#allocation2 + $0xe8] sm:$0xff]  }
  0xcb   : > { %279 = vst.msk [vmem:[#allocation2 + $0x1c] sm:$0xf] %vm251_vm0, %v275_v0  ;;  %278 = vst.msk [vmem:[#allocation2 + $0x18] sm:$0xf] %vm251_vm0, %v273_v1  ;;  %887 = vmatpush2.bf16.msra.mxu1 %v1152_v2 }
  0xcc   : > { %888 = vmatprep.subr.bf16.mxu1 %v1186_v3 }
  0xce   : > { %v471_v4 = vpop.permute.xlu1 %470  ;;  %v469_v5 = vpop.permute.xlu0 %468  ;;  %v1153_v6 = vld [vmem:[#allocation2 + $0x58] sm:$0xff]  }
  0xcf   : > { %475 = vst.msk [vmem:[#allocation2 + $0xe4] sm:$0xf] %vm251_vm0, %v471_v4  ;;  %474 = vst.msk [vmem:[#allocation2 + $0xe0] sm:$0xf] %vm251_vm0, %v469_v5  ;;  %1089 = vmatprep.subr.bf16.mxu0 %v1153_v6 }
  0xd2   : > { %v331_v7 = vpop.permute.xlu1 %330  ;;  %v329_v8 = vpop.permute.xlu0 %328  ;;  %v1154_v9 = vld [vmem:[#allocation2 + $0x18] sm:$0xff]  }
  0xd3   : > { %335 = vst.msk [vmem:[#allocation2 + $0x54] sm:$0xf] %vm251_vm0, %v331_v7  ;;  %334 = vst.msk [vmem:[#allocation2 + $0x50] sm:$0xf] %vm251_vm0, %v329_v8  ;;  %1090 = vmatpush3.bf16.msra.mxu0 %v1154_v9 }
  0xd6   : > { %v267_v10 = vpop.permute.xlu1 %266  ;;  %v265_v11 = vpop.permute.xlu0 %264  ;;  %v1155_v12 = vld [vmem:[#allocation2 + $0xe0] sm:$0xff]  }
  0xd7   : > { %271 = vst.msk [vmem:[#allocation2 + $0x14] sm:$0xf] %vm251_vm0, %v267_v10  ;;  %270 = vst.msk [vmem:[#allocation2 + $0x10] sm:$0xf] %vm251_vm0, %v265_v11  ;;  %889 = vmatpush2.bf16.msra.mxu1 %v1155_v12 }
  0xd8   : > { %890 = vmatprep.subr.bf16.mxu1 %v1186_v3 }
  0xda   : > { %v463_v13 = vpop.permute.xlu1 %462  ;;  %v461_v14 = vpop.permute.xlu0 %460  ;;  %v1156_v15 = vld [vmem:[#allocation2 + $0x50] sm:$0xff]  }
  0xdb   : > { %467 = vst.msk [vmem:[#allocation2 + $0xdc] sm:$0xf] %vm251_vm0, %v463_v13  ;;  %466 = vst.msk [vmem:[#allocation2 + $0xd8] sm:$0xf] %vm251_vm0, %v461_v14  ;;  %1091 = vmatprep.subr.bf16.mxu0 %v1156_v15 }
  0xde   : > { %v323_v16 = vpop.permute.xlu1 %322  ;;  %v321_v17 = vpop.permute.xlu0 %320  ;;  %v1157_v18 = vld [vmem:[#allocation2 + $0x10] sm:$0xff]  }
  0xdf   : > { %327 = vst.msk [vmem:[#allocation2 + $0x4c] sm:$0xf] %vm251_vm0, %v323_v16  ;;  %326 = vst.msk [vmem:[#allocation2 + $0x48] sm:$0xf] %vm251_vm0, %v321_v17  ;;  %1092 = vmatpush3.bf16.msra.mxu0 %v1157_v18 }
  0xe2   : > { %v259_v19 = vpop.permute.xlu1 %258  ;;  %v257_v20 = vpop.permute.xlu0 %256  ;;  %v1158_v21 = vld [vmem:[#allocation2 + $0xd8] sm:$0xff]  }
  0xe3   : > { %263 = vst.msk [vmem:[#allocation2 + $0xc] sm:$0xf] %vm251_vm0, %v259_v19  ;;  %262 = vst.msk [vmem:[#allocation2 + $0x8] sm:$0xf] %vm251_vm0, %v257_v20  ;;  %891 = vmatpush2.bf16.msra.mxu1 %v1158_v21 }
  0xe4   : > { %892 = vmatprep.subr.bf16.mxu1 %v1186_v3 }
  0xe6   : > { %v455_v22 = vpop.permute.xlu1 %454  ;;  %v453_v23 = vpop.permute.xlu0 %452  ;;  %v1159_v24 = vld [vmem:[#allocation2 + $0x48] sm:$0xff]  }
  0xe7   : > { %459 = vst.msk [vmem:[#allocation2 + $0xd4] sm:$0xf] %vm251_vm0, %v455_v22  ;;  %458 = vst.msk [vmem:[#allocation2 + $0xd0] sm:$0xf] %vm251_vm0, %v453_v23  ;;  %1093 = vmatprep.subr.bf16.mxu0 %v1159_v24 }
  0xea   : > { %v315_v25 = vpop.permute.xlu1 %314  ;;  %v313_v26 = vpop.permute.xlu0 %312  ;;  %v1160_v27 = vld [vmem:[#allocation2 + $0x8] sm:$0xff]  }
  0xeb   : > { %319 = vst.msk [vmem:[#allocation2 + $0x44] sm:$0xf] %vm251_vm0, %v315_v25  ;;  %318 = vst.msk [vmem:[#allocation2 + $0x40] sm:$0xf] %vm251_vm0, %v313_v26  ;;  %1094 = vmatpush3.bf16.msra.mxu0 %v1160_v27 }
  0xee   : > { %v447_v28 = vpop.permute.xlu1 %446  ;;  %v445_v29 = vpop.permute.xlu0 %444  ;;  %v1161_v30 = vld [vmem:[#allocation2 + $0xd0] sm:$0xff]  }
  0xef   : > { %451 = vst.msk [vmem:[#allocation2 + $0xcc] sm:$0xf] %vm251_vm0, %v447_v28  ;;  %450 = vst.msk [vmem:[#allocation2 + $0xc8] sm:$0xf] %vm251_vm0, %v445_v29  ;;  %893 = vmatpush2.bf16.msra.mxu1 %v1161_v30 }
  0xf0   : > { %894 = vmatprep.subr.bf16.mxu1 %v1186_v3 }
  0xf2   : > { %v439_v32 = vpop.permute.xlu1 %438  ;;  %v437_v33 = vpop.permute.xlu0 %436  ;;  %v1162_v34 = vld [vmem:[#allocation2 + $0x40] sm:$0xff]  }
  0xf3   : > { %443 = vst.msk [vmem:[#allocation2 + $0xc4] sm:$0xf] %vm251_vm0, %v439_v32  ;;  %442 = vst.msk [vmem:[#allocation2 + $0xc0] sm:$0xf] %vm251_vm0, %v437_v33  ;;  %1095 = vmatprep.subr.bf16.mxu0 %v1162_v34 }
  0xf4   : > { %1096 = vmatpush3.bf16.msra.mxu0 %v1163_v31 }
  0xf6   : > { %v1167_v37 = vld [vmem:[#allocation2 + $0xc8] sm:$0xff]  }
  0xf7   : > { %850 = vmatmul.mubr.bf16.vlgmr.msra.gmra.mxu0 %v1164_v35  ;;  %895 = vmatpush2.bf16.msra.mxu1 %v1167_v37 }
  0xf8   : > { %896 = vmatprep.subr.bf16.mxu1 %v1186_v3  ;;  %857 = vmatprep.mubr.bf16.mxu0 %v1172_v36  ;;  %v1177_v3 = vld [vmem:[%s1478_s2 + $0x28] ss:$16 sps:$4 sm:$0xff]  }
  0xfa   : > { %v1168_v38 = vld [vmem:[#allocation2 + $0xc0] sm:$0xff]  }
  0xfb   : > { %897 = vmatpush2.bf16.msra.mxu1 %v1168_v38 }
  0xfe   : > { %899 = vmatmul.mubr.bf16.vlgmr.msra.gmra.mxu1 %v1169_v39 }
  0xff   : > { %858 = vmatmul.mubr.bf16.gmra.mxu0 %v1174_v40  ;;  %1067 = vmatprep.mubr.msk.bf16.mxu1 %vm810_vm1, %v1175_v41  ;;  %v569_v44 = vpop.permute.xlu0 %568  ;;  %v574_v47 = vpop.permute.xlu1 %573 }
 0x103   : > { %v579_v59 = vpop.permute.xlu1 %578  ;;  %v584_v10 = vpop.permute.xlu0 %583 }
 0x106   : > { %907 = vmatmul.mubr.bf16.gmra.mxu1 %v1177_v3 }
 0x1b7   : > { %v1097_v42 = vpop.f32.mrf.mxu0 }
 0x1b9   : > { %v1098_v43 = vpop.f32.mrf.mxu0 }
 0x1ba   : > { %v1099_v45 = vadd.f32 %v1098_v43, %v1097_v42 }
 0x1bb   : > { %v1100_v46 = vpop.f32.mrf.mxu0 }
 0x1bc   : > { %v852_v48 = vadd.f32 %v1099_v45, %v569_v44 }
 0x1bd   : > { %v1101_v49 = vpop.f32.mrf.mxu0 }
 0x1be   : > { %v1102_v50 = vadd.f32 %v1101_v49, %v1100_v46  ;;  %v900_v51 = vpop.f32.mrf.mxu1 }
 0x1bf   : > { %v901_v53 = vadd.f32 %v900_v51, %v852_v48  ;;  %v1103_v54 = vpop.f32.mrf.mxu0 }
 0x1c0   : > { %v855_v55 = vadd.f32 %v1102_v50, %v574_v47  ;;  %v902_v56 = vpop.f32.mrf.mxu1 }
 0x1c1   : > { %vm916_vm2 = vcmp.gt.f32.partialorder %v901_v53, 0.0  ;;  %v921_v57 = vmul.f32 %v920_v52, %v901_v53  ;;  %v1104_v58 = vpop.f32.mrf.mxu0 }
 0x1c2   : > { %v1105_v60 = vadd.f32 %v1104_v58, %v1103_v54  ;;  %v903_v61 = vpop.f32.mrf.mxu1 }
 0x1c3   : > { %v925_v62 = vsel %vm916_vm2, %v901_v53, %v921_v57  ;;  %v904_v63 = vadd.f32 %v903_v61, %v855_v55  ;;  %v1106_v0 = vpop.f32.mrf.mxu0 }
 0x1c4   : > { %v1077_v1 = vpack.c.bf16 %v925_v62, %v925_v62  ;;  %v860_v2 = vadd.f32 %v1105_v60, %v579_v59  ;;  %v905_v4 = vpop.f32.mrf.mxu1 }
 0x1c5   : > { %vm917_vm3 = vcmp.gt.f32.partialorder %v904_v63, 0.0  ;;  %v922_v5 = vmul.f32 %v920_v52, %v904_v63  ;;  %v1107_v6 = vpop.f32.mrf.mxu0 }
 0x1c6   : > { %945 = vst.msk [vmem:[%s1463_s23] sm:$0xf] %vm251_vm0, %v1077_v1  ;;  %v1108_v7 = vadd.f32 %v1107_v6, %v1106_v0  ;;  %v908_v8 = vpop.f32.mrf.mxu1 }
 0x1c7   : > { %v926_v9 = vsel %vm917_vm3, %v904_v63, %v922_v5  ;;  %v909_v11 = vadd.f32 %v908_v8, %v860_v2 }
 0x1c8   : > { %v1078_v12 = vpack.c.bf16 %v926_v9, %v926_v9  ;;  %v910_v13 = vpop.f32.mrf.mxu1  ;;  %v863_v14 = vadd.f32 %v1108_v7, %v584_v10 }
 0x1c9   : > { %vm918_vm4 = vcmp.gt.f32.partialorder %v909_v11, 0.0  ;;  %v923_v15 = vmul.f32 %v920_v52, %v909_v11 }
 0x1ca   : > { %946 = vst.msk [vmem:[%s1463_s23 + $0x4] sm:$0xf] %vm251_vm0, %v1078_v12  ;;  %v911_v16 = vpop.f32.mrf.mxu1 }
 0x1cb   : > { %v927_v17 = vsel %vm918_vm4, %v909_v11, %v923_v15  ;;  %v912_v18 = vadd.f32 %v911_v16, %v863_v14 }
 0x1cc   : > { %v1079_v19 = vpack.c.bf16 %v927_v17, %v927_v17  ;;  %v913_v20 = vpop.f32.mrf.mxu1 }
 0x1cd   : > { %vm919_vm5 = vcmp.gt.f32.partialorder %v912_v18, 0.0  ;;  %v924_v21 = vmul.f32 %v920_v52, %v912_v18 }
 0x1ce   : > { %947 = vst.msk [vmem:[%s1463_s23 + $0x8] sm:$0xf] %vm251_vm0, %v1079_v19 }
 0x1cf   : > { %v928_v22 = vsel %vm919_vm5, %v912_v18, %v924_v21 }
 0x1d0   : > { %v1080_v23 = vpack.c.bf16 %v928_v22, %v928_v22 }
 0x1d2   : > { %948 = vst.msk [vmem:[%s1463_s23 + $0xc] sm:$0xf] %vm251_vm0, %v1080_v23 }
 0x1d3 PF: > { %s16_s20 = sadd.s32 1, %s1184_s20  }
 0x1d4   : > { %p13_p4 = scmp.ge.s32.totalorder %s16_s20, 4  }
 0x1d6   :  { %15 = sbr.rel (!%p13_p4) target bundleno = 2 (0x2), region = 73 }

// kernel: generator_forward.10
= control target key start
LH: loop header
LB: loop body
LE: loop exit
PB: predicated region body
PF: predicated region fallthrough
CT: control target
= control target key end

     0   :  { %s1113_s17 = smov 0   ;;  %s1290_s0 = inlined_call_operand.vmem [shape: bf16[2,32,79], index: 0, kind: input, shape index: {}]   ;;  %s1291_s1 = inlined_call_operand.vmem [shape: bf16[16,512], index: 1, kind: input, shape index: {}]   ;;  %s1292_s2 = inlined_call_operand.vmem [shape: f32[16,1], index: 2, kind: input, shape index: {}]   ;;  %s1293_s3 = inlined_call_operand.<no memory space> [shape: f32[1], index: 3, kind: input, shape index: {}]   ;;  %s1294_s4 = inlined_call_operand.vmem [shape: bf16[2,16,64], index: 4, kind: output, shape index: {}]  }
   0x1   :  { %9 = sst [smem:[#allocation3]] %s1293_s3 }
   0x2 LB: > { %s900_s18 = sadd.s32 4294967295, %s1067_s17   ;;  %p904_p0 = scmp.ge.s32.totalorder %s1067_s17, 1  ;;  %s1067_s17 = sphi %s1113_s17, %s15_s17  }
   0x3   : > { %p163_p1 = scmp.lt.s32.totalorder %s1067_s17, 3 }
   0x5   : > { %p164_p2 = pnand %p904_p0, %p163_p1 }
   0x6   : > { %p189_p3 = scmp.lt.s32.totalorder (!%p164_p2), %s900_s18, 1  ;;  %s1069_s22 = smov (!%p164_p2), 125  }
   0x7   : > { %167 = sbr.rel (%p164_p2) target bundleno = 467 (0x1d3), region = 36  ;;  %s1070_s23 = smov (!%p164_p2), 121  }
   0x8   : > { %s1071_s24 = smov (!%p164_p2), 113   ;;  %s1072_s25 = smov (!%p164_p2), 117  }
   0x9   : > { %s1073_s26 = smov (!%p164_p2), 122   ;;  %s1074_s27 = smov (!%p164_p2), 126  }
   0xa   : > { %s1075_s28 = smov (!%p164_p2), 114   ;;  %s1076_s29 = smov (!%p164_p2), 118  }
   0xb   : > { %s1077_s30 = smov (!%p164_p2), 123   ;;  %s1078_s5 = smov (!%p164_p2), 127  }
   0xc   : > { %s1296_s18 = smov (!%p189_p3, %s900_s18), 1  ;;  %vm204_vm0 = vcmask 519168   ;;  %s1079_s6 = smov 115   ;;  %v1055_v4 = vld [vmem:[%s1291_s1 + $0x4] ss:$16 sps:$4 sm:$0xff]   ;;  %v1084_v8 = vmov 0  }
   0xd   : > { %s949_s3 = sshll.u32 %s1296_s18, 4  ;;  %s1080_s7 = smov 119   ;;  %777 = vmatprep.mubr.bf16.mxu0 %v1055_v4  ;;  %v1060_v5 = vld [vmem:[%s1291_s1 + $0xc] ss:$16 sps:$4 sm:$0xff]   ;;  %1021 = vset.pattern.permute.xlu0 %v1084_v8  ;;  %v521_v9 = vld [vmem:[%s1292_s2] sm:$0xff] }
   0xe   : > { %s193_s21 = scalar_lea.vmem %s1290_s0, %s949_s3  ;;  %s1081_s8 = smov 124   ;;  %818 = vmatprep.mubr.bf16.mxu1 %v1060_v5  ;;  %1022 = vset.pattern.permute.xlu1 %v1084_v8  ;;  %v522_v10 = vld [vmem:[%s1292_s2 + $0x8] sm:$0xff] }
   0xf   : > { %v1127_v0 = vld [vmem:[%s193_s21 + $0x8] sm:$0xf]  ;;  %v1129_v1 = vld [vmem:[%s193_s21 + $0xc] sm:$0xf]  ;;  %v1131_v2 = vld [vmem:[%s193_s21 + $0x4] sm:$0xf] }
  0x10   : > { %249 = vrot.lane.b32.xlu1 %v1127_v0, %s1069_s22  ;;  %313 = vrot.lane.b32.xlu0 %v1127_v0, %s1070_s23  ;;  %v1135_v3 = vld [vmem:[%s193_s21] sm:$0xf]  ;;  %206 = vst.msk [vmem:[#allocation2 + $0x4] sm:$0xf] %vm204_vm0, %v1131_v2  ;;  %207 = vst.msk [vmem:[#allocation2 + $0x8] sm:$0xf] %vm204_vm0, %v1127_v0 }
  0x11   : > { %208 = vst.msk [vmem:[#allocation2 + $0xc] sm:$0xf] %vm204_vm0, %v1129_v1  ;;  %205 = vst.msk [vmem:[#allocation2] sm:$0xf] %vm204_vm0, %v1135_v3  ;;  %s1082_s9 = smov 116   ;;  %s1083_s10 = smov 120  }
  0x14   : > { %251 = vrot.lane.b32.xlu1 %v1129_v1, %s1069_s22  ;;  %315 = vrot.lane.b32.xlu0 %v1129_v1, %s1070_s23 }
  0x18   : > { %443 = vrot.lane.b32.xlu1 %v1129_v1, %s1071_s24  ;;  %441 = vrot.lane.b32.xlu0 %v1127_v0, %s1071_s24 }
  0x1c   : > { %379 = vrot.lane.b32.xlu1 %v1129_v1, %s1072_s25  ;;  %377 = vrot.lane.b32.xlu0 %v1127_v0, %s1072_s25 }
  0x20   : > { %311 = vrot.lane.b32.xlu1 %v1131_v2, %s1070_s23  ;;  %309 = vrot.lane.b32.xlu0 %v1135_v3, %s1070_s23 }
  0x24   : > { %247 = vrot.lane.b32.xlu1 %v1131_v2, %s1069_s22  ;;  %245 = vrot.lane.b32.xlu0 %v1135_v3, %s1069_s22 }
  0x28   : > { %439 = vrot.lane.b32.xlu1 %v1131_v2, %s1071_s24  ;;  %437 = vrot.lane.b32.xlu0 %v1135_v3, %s1071_s24  ;;  %s827_s24 = sld [smem:[#allocation3]] }
  0x2c   : > { %375 = vrot.lane.b32.xlu1 %v1131_v2, %s1072_s25  ;;  %373 = vrot.lane.b32.xlu0 %v1135_v3, %s1072_s25  ;;  %s950_s25 = sshll.u32 %s1296_s18, 3 }
  0x30   : > { %299 = vrot.lane.b32.xlu1 %v1129_v1, %s1073_s26  ;;  %297 = vrot.lane.b32.xlu0 %v1127_v0, %s1073_s26 }
  0x34   : > { %235 = vrot.lane.b32.xlu1 %v1129_v1, %s1074_s27  ;;  %233 = vrot.lane.b32.xlu0 %v1127_v0, %s1074_s27 }
  0x38   : > { %427 = vrot.lane.b32.xlu1 %v1129_v1, %s1075_s28  ;;  %425 = vrot.lane.b32.xlu0 %v1127_v0, %s1075_s28 }
  0x3c   : > { %363 = vrot.lane.b32.xlu1 %v1129_v1, %s1076_s29  ;;  %361 = vrot.lane.b32.xlu0 %v1127_v0, %s1076_s29 }
  0x40   : > { %295 = vrot.lane.b32.xlu1 %v1131_v2, %s1073_s26  ;;  %293 = vrot.lane.b32.xlu0 %v1135_v3, %s1073_s26 }
  0x44   : > { %231 = vrot.lane.b32.xlu1 %v1131_v2, %s1074_s27  ;;  %229 = vrot.lane.b32.xlu0 %v1135_v3, %s1074_s27 }
  0x48   : > { %423 = vrot.lane.b32.xlu1 %v1131_v2, %s1075_s28  ;;  %421 = vrot.lane.b32.xlu0 %v1135_v3, %s1075_s28  ;;  %s198_s28 = scalar_lea.vmem %s1294_s4, %s950_s25 }
  0x4c   : > { %359 = vrot.lane.b32.xlu1 %v1131_v2, %s1076_s29  ;;  %357 = vrot.lane.b32.xlu0 %v1135_v3, %s1076_s29 }
  0x50   : > { %283 = vrot.lane.b32.xlu1 %v1129_v1, %s1077_s30  ;;  %281 = vrot.lane.b32.xlu0 %v1127_v0, %s1077_s30 }
  0x54   : > { %219 = vrot.lane.b32.xlu1 %v1129_v1, %s1078_s5  ;;  %217 = vrot.lane.b32.xlu0 %v1127_v0, %s1078_s5 }
  0x58   : > { %411 = vrot.lane.b32.xlu1 %v1129_v1, %s1079_s6  ;;  %409 = vrot.lane.b32.xlu0 %v1127_v0, %s1079_s6 }
  0x5c   : > { %347 = vrot.lane.b32.xlu1 %v1129_v1, %s1080_s7  ;;  %345 = vrot.lane.b32.xlu0 %v1127_v0, %s1080_s7 }
  0x60   : > { %279 = vrot.lane.b32.xlu1 %v1131_v2, %s1077_s30  ;;  %277 = vrot.lane.b32.xlu0 %v1135_v3, %s1077_s30 }
  0x64   : > { %215 = vrot.lane.b32.xlu1 %v1131_v2, %s1078_s5  ;;  %213 = vrot.lane.b32.xlu0 %v1135_v3, %s1078_s5 }
  0x68   : > { %407 = vrot.lane.b32.xlu1 %v1131_v2, %s1079_s6  ;;  %405 = vrot.lane.b32.xlu0 %v1135_v3, %s1079_s6 }
  0x6c   : > { %343 = vrot.lane.b32.xlu1 %v1131_v2, %s1080_s7  ;;  %341 = vrot.lane.b32.xlu0 %v1135_v3, %s1080_s7 }
  0x70   : > { %267 = vrot.lane.b32.xlu1 %v1129_v1, %s1081_s8  ;;  %265 = vrot.lane.b32.xlu0 %v1127_v0, %s1081_s8 }
  0x74   : > { %395 = vrot.lane.b32.xlu1 %v1129_v1, %s1082_s9  ;;  %393 = vrot.lane.b32.xlu0 %v1127_v0, %s1082_s9 }
  0x78   : > { %331 = vrot.lane.b32.xlu1 %v1129_v1, %s1083_s10  ;;  %329 = vrot.lane.b32.xlu0 %v1127_v0, %s1083_s10 }
  0x7c   : > { %263 = vrot.lane.b32.xlu1 %v1131_v2, %s1081_s8  ;;  %261 = vrot.lane.b32.xlu0 %v1135_v3, %s1081_s8 }
  0x80   : > { %391 = vrot.lane.b32.xlu1 %v1131_v2, %s1082_s9  ;;  %389 = vrot.lane.b32.xlu0 %v1135_v3, %s1082_s9 }
  0x82   : > { %v250_v6 = vpop.permute.xlu1 %249  ;;  %v314_v7 = vpop.permute.xlu0 %313 }
  0x83   : > { %259 = vst.msk [vmem:[#allocation2 + $0x38] sm:$0xf] %vm204_vm0, %v250_v6  ;;  %323 = vst.msk [vmem:[#allocation2 + $0x78] sm:$0xf] %vm204_vm0, %v314_v7 }
  0x84   : > { %327 = vrot.lane.b32.xlu1 %v1131_v2, %s1083_s10  ;;  %325 = vrot.lane.b32.xlu0 %v1135_v3, %s1083_s10 }
  0x86   : > { %v252_v11 = vpop.permute.xlu1 %251  ;;  %v316_v12 = vpop.permute.xlu0 %315 }
  0x87   : > { %260 = vst.msk [vmem:[#allocation2 + $0x3c] sm:$0xf] %vm204_vm0, %v252_v11  ;;  %324 = vst.msk [vmem:[#allocation2 + $0x7c] sm:$0xf] %vm204_vm0, %v316_v12 }
  0x88   : > { %525 = vperm.xlu0 %1021, %v521_v9   ;;  %530 = vperm.xlu1 %1022, %v522_v10  }
  0x8a   : > { %v444_v13 = vpop.permute.xlu1 %443  ;;  %v442_v14 = vpop.permute.xlu0 %441 }
  0x8b   : > { %452 = vst.msk [vmem:[#allocation2 + $0xfc] sm:$0xf] %vm204_vm0, %v444_v13  ;;  %451 = vst.msk [vmem:[#allocation2 + $0xf8] sm:$0xf] %vm204_vm0, %v442_v14 }
  0x8e   : > { %v380_v15 = vpop.permute.xlu1 %379  ;;  %v378_v16 = vpop.permute.xlu0 %377  ;;  %v1023_v17 = vld [vmem:[#allocation2 + $0x78] sm:$0xff]  }
  0x8f   : > { %388 = vst.msk [vmem:[#allocation2 + $0xbc] sm:$0xf] %vm204_vm0, %v380_v15  ;;  %387 = vst.msk [vmem:[#allocation2 + $0xb8] sm:$0xf] %vm204_vm0, %v378_v16  ;;  %v1024_v18 = vld [vmem:[#allocation2 + $0x38] sm:$0xff]   ;;  %953 = vmatprep.subr.bf16.mxu0 %v1023_v17 }
  0x90   : > { %954 = vmatpush3.bf16.msra.mxu0 %v1024_v18 }
  0x92   : > { %v312_v19 = vpop.permute.xlu1 %311  ;;  %v310_v20 = vpop.permute.xlu0 %309  ;;  %v1025_v21 = vld [vmem:[#allocation2 + $0xf8] sm:$0xff]  }
  0x93   : > { %322 = vst.msk [vmem:[#allocation2 + $0x74] sm:$0xf] %vm204_vm0, %v312_v19  ;;  %321 = vst.msk [vmem:[#allocation2 + $0x70] sm:$0xf] %vm204_vm0, %v310_v20  ;;  %975 = vmatprep.subr.bf16.mxu1 %v1025_v21  ;;  %v1050_v21 = vld [vmem:[#allocation2 + $0x8] sm:$0xff]  }
  0x96   : > { %v248_v22 = vpop.permute.xlu1 %247  ;;  %v246_v23 = vpop.permute.xlu0 %245  ;;  %v1026_v24 = vld [vmem:[#allocation2 + $0xb8] sm:$0xff]  }
  0x97   : > { %258 = vst.msk [vmem:[#allocation2 + $0x34] sm:$0xf] %vm204_vm0, %v248_v22  ;;  %257 = vst.msk [vmem:[#allocation2 + $0x30] sm:$0xf] %vm204_vm0, %v246_v23  ;;  %976 = vmatpush3.bf16.msra.mxu1 %v1026_v24 }
  0x9a   : > { %v440_v25 = vpop.permute.xlu1 %439  ;;  %v438_v26 = vpop.permute.xlu0 %437  ;;  %v1027_v27 = vld [vmem:[#allocation2 + $0x70] sm:$0xff]  }
  0x9b   : > { %450 = vst.msk [vmem:[#allocation2 + $0xf4] sm:$0xf] %vm204_vm0, %v440_v25  ;;  %449 = vst.msk [vmem:[#allocation2 + $0xf0] sm:$0xf] %vm204_vm0, %v438_v26  ;;  %955 = vmatprep.subr.bf16.mxu0 %v1027_v27 }
  0x9e   : > { %v376_v28 = vpop.permute.xlu1 %375  ;;  %v374_v29 = vpop.permute.xlu0 %373  ;;  %v1028_v30 = vld [vmem:[#allocation2 + $0x30] sm:$0xff]  }
  0x9f   : > { %386 = vst.msk [vmem:[#allocation2 + $0xb4] sm:$0xf] %vm204_vm0, %v376_v28  ;;  %385 = vst.msk [vmem:[#allocation2 + $0xb0] sm:$0xf] %vm204_vm0, %v374_v29  ;;  %956 = vmatpush3.bf16.msra.mxu0 %v1028_v30 }
  0xa2   : > { %v300_v31 = vpop.permute.xlu1 %299  ;;  %v298_v32 = vpop.permute.xlu0 %297  ;;  %v1029_v33 = vld [vmem:[#allocation2 + $0xf0] sm:$0xff]  }
  0xa3   : > { %308 = vst.msk [vmem:[#allocation2 + $0x6c] sm:$0xf] %vm204_vm0, %v300_v31  ;;  %307 = vst.msk [vmem:[#allocation2 + $0x68] sm:$0xf] %vm204_vm0, %v298_v32  ;;  %977 = vmatprep.subr.bf16.mxu1 %v1029_v33  ;;  %v1052_v31 = vld [vmem:[#allocation2] sm:$0xff]  }
  0xa6   : > { %v236_v34 = vpop.permute.xlu1 %235  ;;  %v234_v35 = vpop.permute.xlu0 %233  ;;  %v1030_v36 = vld [vmem:[#allocation2 + $0xb0] sm:$0xff]  }
  0xa7   : > { %244 = vst.msk [vmem:[#allocation2 + $0x2c] sm:$0xf] %vm204_vm0, %v236_v34  ;;  %243 = vst.msk [vmem:[#allocation2 + $0x28] sm:$0xf] %vm204_vm0, %v234_v35  ;;  %978 = vmatpush3.bf16.msra.mxu1 %v1030_v36  ;;  %v1053_v35 = vld [vmem:[%s1291_s1] ss:$16 sps:$4 sm:$0xff]  }
  0xaa   : > { %v428_v37 = vpop.permute.xlu1 %427  ;;  %v426_v38 = vpop.permute.xlu0 %425  ;;  %v1031_v39 = vld [vmem:[#allocation2 + $0x68] sm:$0xff]  }
  0xab   : > { %436 = vst.msk [vmem:[#allocation2 + $0xec] sm:$0xf] %vm204_vm0, %v428_v37  ;;  %435 = vst.msk [vmem:[#allocation2 + $0xe8] sm:$0xf] %vm204_vm0, %v426_v38  ;;  %957 = vmatprep.subr.bf16.mxu0 %v1031_v39  ;;  %v1058_v38 = vld [vmem:[%s1291_s1 + $0x8] ss:$16 sps:$4 sm:$0xff]  }
  0xae   : > { %v364_v40 = vpop.permute.xlu1 %363  ;;  %v362_v41 = vpop.permute.xlu0 %361  ;;  %v1032_v42 = vld [vmem:[#allocation2 + $0x28] sm:$0xff]  }
  0xaf   : > { %372 = vst.msk [vmem:[#allocation2 + $0xac] sm:$0xf] %vm204_vm0, %v364_v40  ;;  %371 = vst.msk [vmem:[#allocation2 + $0xa8] sm:$0xf] %vm204_vm0, %v362_v41  ;;  %958 = vmatpush3.bf16.msra.mxu0 %v1032_v42 }
  0xb2   : > { %v296_v43 = vpop.permute.xlu1 %295  ;;  %v294_v44 = vpop.permute.xlu0 %293  ;;  %v1033_v45 = vld [vmem:[#allocation2 + $0xe8] sm:$0xff]  }
  0xb3   : > { %306 = vst.msk [vmem:[#allocation2 + $0x64] sm:$0xf] %vm204_vm0, %v296_v43  ;;  %305 = vst.msk [vmem:[#allocation2 + $0x60] sm:$0xf] %vm204_vm0, %v294_v44  ;;  %979 = vmatprep.subr.bf16.mxu1 %v1033_v45 }
  0xb6   : > { %v232_v46 = vpop.permute.xlu1 %231  ;;  %v230_v47 = vpop.permute.xlu0 %229  ;;  %v1034_v48 = vld [vmem:[#allocation2 + $0xa8] sm:$0xff]  }
  0xb7   : > { %242 = vst.msk [vmem:[#allocation2 + $0x24] sm:$0xf] %vm204_vm0, %v232_v46  ;;  %241 = vst.msk [vmem:[#allocation2 + $0x20] sm:$0xf] %vm204_vm0, %v230_v47  ;;  %980 = vmatpush3.bf16.msra.mxu1 %v1034_v48 }
  0xba   : > { %v424_v49 = vpop.permute.xlu1 %423  ;;  %v422_v50 = vpop.permute.xlu0 %421  ;;  %v1035_v51 = vld [vmem:[#allocation2 + $0x60] sm:$0xff]  }
  0xbb   : > { %434 = vst.msk [vmem:[#allocation2 + $0xe4] sm:$0xf] %vm204_vm0, %v424_v49  ;;  %433 = vst.msk [vmem:[#allocation2 + $0xe0] sm:$0xf] %vm204_vm0, %v422_v50  ;;  %959 = vmatprep.subr.bf16.mxu0 %v1035_v51  ;;  %v830_v51 = vstv %s827_s24 }
  0xbe   : > { %v360_v52 = vpop.permute.xlu1 %359  ;;  %v358_v53 = vpop.permute.xlu0 %357  ;;  %v1036_v54 = vld [vmem:[#allocation2 + $0x20] sm:$0xff]  }
  0xbf   : > { %370 = vst.msk [vmem:[#allocation2 + $0xa4] sm:$0xf] %vm204_vm0, %v360_v52  ;;  %369 = vst.msk [vmem:[#allocation2 + $0xa0] sm:$0xf] %vm204_vm0, %v358_v53  ;;  %960 = vmatpush3.bf16.msra.mxu0 %v1036_v54 }
  0xc2   : > { %v284_v55 = vpop.permute.xlu1 %283  ;;  %v282_v56 = vpop.permute.xlu0 %281  ;;  %v1037_v57 = vld [vmem:[#allocation2 + $0xe0] sm:$0xff]  }
  0xc3   : > { %292 = vst.msk [vmem:[#allocation2 + $0x5c] sm:$0xf] %vm204_vm0, %v284_v55  ;;  %291 = vst.msk [vmem:[#allocation2 + $0x58] sm:$0xf] %vm204_vm0, %v282_v56  ;;  %981 = vmatprep.subr.bf16.mxu1 %v1037_v57 }
  0xc6   : > { %v220_v58 = vpop.permute.xlu1 %219  ;;  %v218_v59 = vpop.permute.xlu0 %217  ;;  %v1038_v60 = vld [vmem:[#allocation2 + $0xa0] sm:$0xff]  }
  0xc7   : > { %228 = vst.msk [vmem:[#allocation2 + $0x1c] sm:$0xf] %vm204_vm0, %v220_v58  ;;  %227 = vst.msk [vmem:[#allocation2 + $0x18] sm:$0xf] %vm204_vm0, %v218_v59  ;;  %982 = vmatpush3.bf16.msra.mxu1 %v1038_v60 }
  0xca   : > { %v412_v61 = vpop.permute.xlu1 %411  ;;  %v410_v62 = vpop.permute.xlu0 %409  ;;  %v1039_v63 = vld [vmem:[#allocation2 + $0x58] sm:$0xff]  }
  0xcb   : > { %420 = vst.msk [vmem:[#allocation2 + $0xdc] sm:$0xf] %vm204_vm0, %v412_v61  ;;  %419 = vst.msk [vmem:[#allocation2 + $0xd8] sm:$0xf] %vm204_vm0, %v410_v62  ;;  %961 = vmatprep.subr.bf16.mxu0 %v1039_v63 }
  0xce   : > { %v348_v0 = vpop.permute.xlu1 %347  ;;  %v346_v1 = vpop.permute.xlu0 %345  ;;  %v1040_v2 = vld [vmem:[#allocation2 + $0x18] sm:$0xff]  }
  0xcf   : > { %356 = vst.msk [vmem:[#allocation2 + $0x9c] sm:$0xf] %vm204_vm0, %v348_v0  ;;  %355 = vst.msk [vmem:[#allocation2 + $0x98] sm:$0xf] %vm204_vm0, %v346_v1  ;;  %962 = vmatpush3.bf16.msra.mxu0 %v1040_v2 }
  0xd2   : > { %v280_v3 = vpop.permute.xlu1 %279  ;;  %v278_v4 = vpop.permute.xlu0 %277  ;;  %v1041_v5 = vld [vmem:[#allocation2 + $0xd8] sm:$0xff]  }
  0xd3   : > { %290 = vst.msk [vmem:[#allocation2 + $0x54] sm:$0xf] %vm204_vm0, %v280_v3  ;;  %289 = vst.msk [vmem:[#allocation2 + $0x50] sm:$0xf] %vm204_vm0, %v278_v4  ;;  %983 = vmatprep.subr.bf16.mxu1 %v1041_v5 }
  0xd6   : > { %v216_v6 = vpop.permute.xlu1 %215  ;;  %v214_v7 = vpop.permute.xlu0 %213  ;;  %v1042_v8 = vld [vmem:[#allocation2 + $0x98] sm:$0xff]  }
  0xd7   : > { %226 = vst.msk [vmem:[#allocation2 + $0x14] sm:$0xf] %vm204_vm0, %v216_v6  ;;  %225 = vst.msk [vmem:[#allocation2 + $0x10] sm:$0xf] %vm204_vm0, %v214_v7  ;;  %984 = vmatpush3.bf16.msra.mxu1 %v1042_v8 }
  0xda   : > { %v408_v9 = vpop.permute.xlu1 %407  ;;  %v406_v10 = vpop.permute.xlu0 %405  ;;  %v1043_v11 = vld [vmem:[#allocation2 + $0x50] sm:$0xff]  }
  0xdb   : > { %418 = vst.msk [vmem:[#allocation2 + $0xd4] sm:$0xf] %vm204_vm0, %v408_v9  ;;  %417 = vst.msk [vmem:[#allocation2 + $0xd0] sm:$0xf] %vm204_vm0, %v406_v10  ;;  %963 = vmatprep.subr.bf16.mxu0 %v1043_v11 }
  0xde   : > { %v344_v12 = vpop.permute.xlu1 %343  ;;  %v342_v13 = vpop.permute.xlu0 %341  ;;  %v1044_v14 = vld [vmem:[#allocation2 + $0x10] sm:$0xff]  }
  0xdf   : > { %354 = vst.msk [vmem:[#allocation2 + $0x94] sm:$0xf] %vm204_vm0, %v344_v12  ;;  %353 = vst.msk [vmem:[#allocation2 + $0x90] sm:$0xf] %vm204_vm0, %v342_v13  ;;  %964 = vmatpush3.bf16.msra.mxu0 %v1044_v14 }
  0xe2   : > { %v268_v15 = vpop.permute.xlu1 %267  ;;  %v266_v16 = vpop.permute.xlu0 %265  ;;  %v1045_v17 = vld [vmem:[#allocation2 + $0xd0] sm:$0xff]  }
  0xe3   : > { %276 = vst.msk [vmem:[#allocation2 + $0x4c] sm:$0xf] %vm204_vm0, %v268_v15  ;;  %275 = vst.msk [vmem:[#allocation2 + $0x48] sm:$0xf] %vm204_vm0, %v266_v16  ;;  %985 = vmatprep.subr.bf16.mxu1 %v1045_v17 }
  0xe6   : > { %v396_v18 = vpop.permute.xlu1 %395  ;;  %v394_v19 = vpop.permute.xlu0 %393  ;;  %v1046_v20 = vld [vmem:[#allocation2 + $0x90] sm:$0xff]  }
  0xe7   : > { %404 = vst.msk [vmem:[#allocation2 + $0xcc] sm:$0xf] %vm204_vm0, %v396_v18  ;;  %403 = vst.msk [vmem:[#allocation2 + $0xc8] sm:$0xf] %vm204_vm0, %v394_v19  ;;  %986 = vmatpush3.bf16.msra.mxu1 %v1046_v20 }
  0xea   : > { %v332_v22 = vpop.permute.xlu1 %331  ;;  %v330_v23 = vpop.permute.xlu0 %329  ;;  %v1047_v24 = vld [vmem:[#allocation2 + $0x48] sm:$0xff]  }
  0xeb   : > { %340 = vst.msk [vmem:[#allocation2 + $0x8c] sm:$0xf] %vm204_vm0, %v332_v22  ;;  %339 = vst.msk [vmem:[#allocation2 + $0x88] sm:$0xf] %vm204_vm0, %v330_v23  ;;  %965 = vmatprep.subr.bf16.mxu0 %v1047_v24 }
  0xec   : > { %966 = vmatpush3.bf16.msra.mxu0 %v1050_v21 }
  0xee   : > { %v264_v25 = vpop.permute.xlu1 %263  ;;  %v262_v26 = vpop.permute.xlu0 %261  ;;  %v1048_v27 = vld [vmem:[#allocation2 + $0xc8] sm:$0xff]  }
  0xef   : > { %274 = vst.msk [vmem:[#allocation2 + $0x44] sm:$0xf] %vm204_vm0, %v264_v25  ;;  %273 = vst.msk [vmem:[#allocation2 + $0x40] sm:$0xf] %vm204_vm0, %v262_v26  ;;  %987 = vmatprep.subr.bf16.mxu1 %v1048_v27 }
  0xf2   : > { %v392_v28 = vpop.permute.xlu1 %391  ;;  %v390_v29 = vpop.permute.xlu0 %389  ;;  %v1049_v30 = vld [vmem:[#allocation2 + $0x88] sm:$0xff]  }
  0xf3   : > { %402 = vst.msk [vmem:[#allocation2 + $0xc4] sm:$0xf] %vm204_vm0, %v392_v28  ;;  %401 = vst.msk [vmem:[#allocation2 + $0xc0] sm:$0xf] %vm204_vm0, %v390_v29  ;;  %988 = vmatpush3.bf16.msra.mxu1 %v1049_v30 }
  0xf6   : > { %v328_v32 = vpop.permute.xlu1 %327  ;;  %v326_v33 = vpop.permute.xlu0 %325  ;;  %v1051_v34 = vld [vmem:[#allocation2 + $0x40] sm:$0xff]  }
  0xf7   : > { %338 = vst.msk [vmem:[#allocation2 + $0x84] sm:$0xf] %vm204_vm0, %v328_v32  ;;  %337 = vst.msk [vmem:[#allocation2 + $0x80] sm:$0xf] %vm204_vm0, %v326_v33  ;;  %967 = vmatprep.subr.bf16.mxu0 %v1051_v34 }
  0xf8   : > { %968 = vmatpush3.bf16.msra.mxu0 %v1052_v31 }
  0xfa   : > { %v1056_v36 = vld [vmem:[#allocation2 + $0xc0] sm:$0xff]  }
  0xfb   : > { %778 = vmatmul.mubr.bf16.vlgmr.msra.gmra.mxu0 %v1053_v35  ;;  %989 = vmatprep.subr.bf16.mxu1 %v1056_v36 }
  0xfe   : > { %v1057_v37 = vld [vmem:[#allocation2 + $0x80] sm:$0xff]  }
  0xff   : > { %990 = vmatpush3.bf16.msra.mxu1 %v1057_v37 }
 0x102   : > { %819 = vmatmul.mubr.bf16.vlgmr.msra.gmra.mxu1 %v1058_v38 }
 0x103   : > { %v526_v43 = vpop.permute.xlu0 %525  ;;  %v531_v50 = vpop.permute.xlu1 %530 }
 0x1bb   : > { %v969_v39 = vpop.f32.mrf.mxu0 }
 0x1bd   : > { %v970_v40 = vpop.f32.mrf.mxu0 }
 0x1be   : > { %v971_v42 = vadd.f32 %v970_v40, %v969_v39 }
 0x1bf   : > { %v972_v41 = vpop.f32.mrf.mxu0 }
 0x1c0   : > { %v780_v48 = vadd.f32 %v971_v42, %v526_v43 }
 0x1c1   : > { %v973_v44 = vpop.f32.mrf.mxu0 }
 0x1c2   : > { %v991_v45 = vpop.f32.mrf.mxu1  ;;  %v974_v47 = vadd.f32 %v973_v44, %v972_v41 }
 0x1c4   : > { %v992_v46 = vpop.f32.mrf.mxu1  ;;  %v783_v55 = vadd.f32 %v974_v47, %v531_v50 }
 0x1c5   : > { %v993_v49 = vadd.f32 %v992_v46, %v991_v45 }
 0x1c6   : > { %v994_v52 = vpop.f32.mrf.mxu1 }
 0x1c7   : > { %v821_v53 = vadd.f32 %v993_v49, %v780_v48 }
 0x1c8   : > { %v995_v54 = vpop.f32.mrf.mxu1 }
 0x1c9   : > { %vm828_vm1 = vcmp.gt.f32.partialorder %v821_v53, 0.0  ;;  %v831_v56 = vmul.f32 %v830_v51, %v821_v53  ;;  %v996_v57 = vadd.f32 %v995_v54, %v994_v52 }
 0x1cb   : > { %v833_v58 = vsel %vm828_vm1, %v821_v53, %v831_v56  ;;  %v824_v59 = vadd.f32 %v996_v57, %v783_v55 }
 0x1cc   : > { %v951_v60 = vpack.c.bf16 %v833_v58, %v833_v58 }
 0x1cd   : > { %vm829_vm2 = vcmp.gt.f32.partialorder %v824_v59, 0.0  ;;  %v832_v61 = vmul.f32 %v830_v51, %v824_v59 }
 0x1ce   : > { %843 = vst.msk [vmem:[%s198_s28] sm:$0xf] %vm204_vm0, %v951_v60 }
 0x1cf   : > { %v834_v62 = vsel %vm829_vm2, %v824_v59, %v832_v61 }
 0x1d0   : > { %v952_v63 = vpack.c.bf16 %v834_v62, %v834_v62 }
 0x1d2   : > { %844 = vst.msk [vmem:[%s198_s28 + $0x4] sm:$0xf] %vm204_vm0, %v952_v63 }
 0x1d3 PF: > { %s15_s17 = sadd.s32 1, %s1067_s17  }
 0x1d4   : > { %p12_p4 = scmp.ge.s32.totalorder %s15_s17, 4  }
 0x1d6   :  { %14 = sbr.rel (!%p12_p4) target bundleno = 2 (0x2), region = 66 }

// kernel: generator_forward.9
= control target key start
LH: loop header
LB: loop body
LE: loop exit
PB: predicated region body
PF: predicated region fallthrough
CT: control target
= control target key end

     0   :  { %s1977_s17 = smov 0   ;;  %s2458_s0 = inlined_call_operand.vmem [shape: bf16[2,64,47], index: 0, kind: input, shape index: {}]   ;;  %s2459_s1 = inlined_call_operand.vmem [shape: bf16[32,1024], index: 1, kind: input, shape index: {}]   ;;  %s2460_s2 = inlined_call_operand.vmem [shape: f32[32,1], index: 2, kind: input, shape index: {}]   ;;  %s2461_s3 = inlined_call_operand.<no memory space> [shape: f32[1], index: 3, kind: input, shape index: {}]   ;;  %s2462_s4 = inlined_call_operand.vmem [shape: bf16[2,32,32], index: 4, kind: output, shape index: {}]  }
   0x1   :  { %9 = sst [smem:[#allocation3]] %s2461_s3 }
   0x2 LB: > { %s1622_s18 = sadd.s32 4294967295, %s1931_s17   ;;  %p1626_p0 = scmp.ge.s32.totalorder %s1931_s17, 1  ;;  %s1931_s17 = sphi %s1977_s17, %s15_s17  }
   0x3   : > { %p163_p1 = scmp.lt.s32.totalorder %s1931_s17, 3 }
   0x5   : > { %p164_p2 = pnand %p1626_p0, %p163_p1 }
   0x6   : > { %p189_p3 = scmp.lt.s32.totalorder (!%p164_p2), %s1622_s18, 1  ;;  %s1933_s22 = smov (!%p164_p2), 127  }
   0x7   : > { %167 = sbr.rel (%p164_p2) target bundleno = 595 (0x253), region = 36  ;;  %s1934_s23 = smov (!%p164_p2), 125  }
   0x8   : > { %s1935_s24 = smov (!%p164_p2), 121   ;;  %s1936_s25 = smov (!%p164_p2), 123  }
   0x9   : > { %s1937_s26 = smov (!%p164_p2), 126   ;;  %s1938_s27 = smov (!%p164_p2), 122  }
   0xa   : > { %s1939_s28 = smov (!%p164_p2), 124   ;;  %s1940_s7 = smov (!%p164_p2), 117  }
   0xb   : > { %s1941_s8 = smov (!%p164_p2), 119   ;;  %s1942_s13 = smov (!%p164_p2), 113  }
   0xc   : > { %s2464_s18 = smov (!%p189_p3, %s1622_s18), 1  ;;  %vm208_vm0 = vcmask 257024   ;;  %v2098_v8 = vld [vmem:[%s2459_s1] sm:$0xff]  ;;  %v2122_v14 = vld [vmem:[%s2459_s1 + $0x8] sm:$0xff]  ;;  %s1943_s14 = smov 115  }
   0xd   : > { %s1717_s3 = sshll.u32 %s2464_s18, 5  ;;  %v2103_v9 = vld [vmem:[%s2459_s1 + $0x20] sm:$0xff]  ;;  %v2127_v15 = vld [vmem:[%s2459_s1 + $0x28] sm:$0xff]  ;;  %s1944_s15 = smov 118  }
   0xe   : > { %s193_s21 = scalar_lea.vmem %s2458_s0, %s1717_s3  ;;  %v1632_v10 = vcombine.high %v2098_v8, %v2103_v9  ;;  %v1631_v11 = vcombine.low %v2098_v8, %v2103_v9  ;;  %v1634_v18 = vcombine.high %v2122_v14, %v2127_v15  ;;  %v1633_v19 = vcombine.low %v2122_v14, %v2127_v15  ;;  %s1945_s16 = smov 120   ;;  %v2337_v8 = vld [vmem:[%s2459_s1 + $0x18] sm:$0xff]  ;;  %v850_v14 = vld [vmem:[%s2460_s2 + $0x8] sm:$0xff] }
   0xf   : > { %v1991_v0 = vld [vmem:[%s193_s21 + $0x18] sm:$0xf]  ;;  %v1993_v1 = vld [vmem:[%s193_s21 + $0x1c] sm:$0xf]  ;;  %v1995_v2 = vld [vmem:[%s193_s21 + $0x14] sm:$0xf] }
  0x10   : > { %237 = vrot.lane.b32.xlu1 %v1991_v0, %s1933_s22  ;;  %301 = vrot.lane.b32.xlu0 %v1991_v0, %s1934_s23  ;;  %v2001_v3 = vld [vmem:[%s193_s21 + $0x10] sm:$0xf]  ;;  %v2003_v4 = vld [vmem:[%s193_s21 + $0xc] sm:$0xf]  ;;  %214 = vst.msk [vmem:[#allocation2 + $0x14] sm:$0xf] %vm208_vm0, %v1995_v2 }
  0x11   : > { %215 = vst.msk [vmem:[#allocation2 + $0x18] sm:$0xf] %vm208_vm0, %v1991_v0  ;;  %216 = vst.msk [vmem:[#allocation2 + $0x1c] sm:$0xf] %vm208_vm0, %v1993_v1  ;;  %v2011_v5 = vld [vmem:[%s193_s21 + $0x8] sm:$0xf]  ;;  %1369 = vmatprep.mubr.bf16.mxu0 %v1632_v10  ;;  %1418 = vmatprep.mubr.bf16.mxu1 %v1634_v18 }
  0x12   : > { %v2013_v6 = vld [vmem:[%s193_s21 + $0x4] sm:$0xf]  ;;  %v2015_v7 = vld [vmem:[%s193_s21] sm:$0xf]  ;;  %212 = vst.msk [vmem:[#allocation2 + $0xc] sm:$0xf] %vm208_vm0, %v2003_v4 }
  0x13   : > { %213 = vst.msk [vmem:[#allocation2 + $0x10] sm:$0xf] %vm208_vm0, %v2001_v3  ;;  %209 = vst.msk [vmem:[#allocation2] sm:$0xf] %vm208_vm0, %v2015_v7  ;;  %s1946_s3 = smov 114   ;;  %s1947_s19 = smov 116  }
  0x14   : > { %210 = vst.msk [vmem:[#allocation2 + $0x4] sm:$0xf] %vm208_vm0, %v2013_v6  ;;  %211 = vst.msk [vmem:[#allocation2 + $0x8] sm:$0xf] %vm208_vm0, %v2011_v5  ;;  %239 = vrot.lane.b32.xlu1 %v1993_v1, %s1933_s22  ;;  %303 = vrot.lane.b32.xlu0 %v1993_v1, %s1934_s23  ;;  %v2342_v9 = vld [vmem:[%s2459_s1 + $0x38] sm:$0xff]  ;;  %v1948_v15 = vmov 0  }
  0x15   : > { %1860 = vset.pattern.permute.xlu1 %v1948_v15  ;;  %1859 = vset.pattern.permute.xlu0 %v1948_v15 }
  0x18   : > { %431 = vrot.lane.b32.xlu1 %v1993_v1, %s1935_s24  ;;  %429 = vrot.lane.b32.xlu0 %v1991_v0, %s1935_s24 }
  0x1c   : > { %367 = vrot.lane.b32.xlu1 %v1993_v1, %s1936_s25  ;;  %365 = vrot.lane.b32.xlu0 %v1991_v0, %s1936_s25 }
  0x20   : > { %299 = vrot.lane.b32.xlu1 %v1995_v2, %s1934_s23  ;;  %297 = vrot.lane.b32.xlu0 %v2001_v3, %s1934_s23 }
  0x24   : > { %235 = vrot.lane.b32.xlu1 %v1995_v2, %s1933_s22  ;;  %233 = vrot.lane.b32.xlu0 %v2001_v3, %s1933_s22 }
  0x28   : > { %427 = vrot.lane.b32.xlu1 %v1995_v2, %s1935_s24  ;;  %425 = vrot.lane.b32.xlu0 %v2001_v3, %s1935_s24 }
  0x2c   : > { %363 = vrot.lane.b32.xlu1 %v1995_v2, %s1936_s25  ;;  %361 = vrot.lane.b32.xlu0 %v2001_v3, %s1936_s25 }
  0x30   : > { %295 = vrot.lane.b32.xlu1 %v2003_v4, %s1934_s23  ;;  %293 = vrot.lane.b32.xlu0 %v2011_v5, %s1934_s23 }
  0x34   : > { %231 = vrot.lane.b32.xlu1 %v2003_v4, %s1933_s22  ;;  %229 = vrot.lane.b32.xlu0 %v2011_v5, %s1933_s22 }
  0x38   : > { %423 = vrot.lane.b32.xlu1 %v2003_v4, %s1935_s24  ;;  %421 = vrot.lane.b32.xlu0 %v2011_v5, %s1935_s24 }
  0x3c   : > { %359 = vrot.lane.b32.xlu1 %v2003_v4, %s1936_s25  ;;  %357 = vrot.lane.b32.xlu0 %v2011_v5, %s1936_s25 }
  0x40   : > { %291 = vrot.lane.b32.xlu1 %v2013_v6, %s1934_s23  ;;  %289 = vrot.lane.b32.xlu0 %v2015_v7, %s1934_s23 }
  0x44   : > { %227 = vrot.lane.b32.xlu1 %v2013_v6, %s1933_s22  ;;  %225 = vrot.lane.b32.xlu0 %v2015_v7, %s1933_s22 }
  0x48   : > { %419 = vrot.lane.b32.xlu1 %v2013_v6, %s1935_s24  ;;  %417 = vrot.lane.b32.xlu0 %v2015_v7, %s1935_s24 }
  0x4c   : > { %355 = vrot.lane.b32.xlu1 %v2013_v6, %s1936_s25  ;;  %353 = vrot.lane.b32.xlu0 %v2015_v7, %s1936_s25 }
  0x50   : > { %271 = vrot.lane.b32.xlu1 %v1993_v1, %s1937_s26  ;;  %269 = vrot.lane.b32.xlu0 %v1991_v0, %s1937_s26 }
  0x54   : > { %399 = vrot.lane.b32.xlu1 %v1993_v1, %s1938_s27  ;;  %397 = vrot.lane.b32.xlu0 %v1991_v0, %s1938_s27 }
  0x58   : > { %335 = vrot.lane.b32.xlu1 %v1993_v1, %s1939_s28  ;;  %333 = vrot.lane.b32.xlu0 %v1991_v0, %s1939_s28 }
  0x5c   : > { %267 = vrot.lane.b32.xlu1 %v1995_v2, %s1937_s26  ;;  %265 = vrot.lane.b32.xlu0 %v2001_v3, %s1937_s26 }
  0x60   : > { %395 = vrot.lane.b32.xlu1 %v1995_v2, %s1938_s27  ;;  %393 = vrot.lane.b32.xlu0 %v2001_v3, %s1938_s27 }
  0x64   : > { %331 = vrot.lane.b32.xlu1 %v1995_v2, %s1939_s28  ;;  %329 = vrot.lane.b32.xlu0 %v2001_v3, %s1939_s28 }
  0x68   : > { %263 = vrot.lane.b32.xlu1 %v2003_v4, %s1937_s26  ;;  %261 = vrot.lane.b32.xlu0 %v2011_v5, %s1937_s26 }
  0x6c   : > { %391 = vrot.lane.b32.xlu1 %v2003_v4, %s1938_s27  ;;  %389 = vrot.lane.b32.xlu0 %v2011_v5, %s1938_s27 }
  0x70   : > { %327 = vrot.lane.b32.xlu1 %v2003_v4, %s1939_s28  ;;  %325 = vrot.lane.b32.xlu0 %v2011_v5, %s1939_s28 }
  0x74   : > { %259 = vrot.lane.b32.xlu1 %v2013_v6, %s1937_s26  ;;  %257 = vrot.lane.b32.xlu0 %v2015_v7, %s1937_s26 }
  0x78   : > { %387 = vrot.lane.b32.xlu1 %v2013_v6, %s1938_s27  ;;  %385 = vrot.lane.b32.xlu0 %v2015_v7, %s1938_s27  ;;  %s1533_s27 = sld [smem:[#allocation3]] }
  0x7c   : > { %323 = vrot.lane.b32.xlu1 %v2013_v6, %s1939_s28  ;;  %321 = vrot.lane.b32.xlu0 %v2015_v7, %s1939_s28  ;;  %s1718_s28 = sshll.u32 %s2464_s18, 4 }
  0x7d   : > { %s198_s5 = scalar_lea.vmem %s2462_s4, %s1718_s28 }
  0x80   : > { %559 = vrot.lane.b32.xlu1 %v1993_v1, %s1940_s7  ;;  %557 = vrot.lane.b32.xlu0 %v1991_v0, %s1940_s7 }
  0x82   : > { %v238_v12 = vpop.permute.xlu1 %237  ;;  %v302_v13 = vpop.permute.xlu0 %301 }
  0x83   : > { %255 = vst.msk [vmem:[#allocation2 + $0x38] sm:$0xf] %vm208_vm0, %v238_v12  ;;  %319 = vst.msk [vmem:[#allocation2 + $0x78] sm:$0xf] %vm208_vm0, %v302_v13 }
  0x84   : > { %495 = vrot.lane.b32.xlu1 %v1993_v1, %s1941_s8  ;;  %493 = vrot.lane.b32.xlu0 %v1991_v0, %s1941_s8 }
  0x86   : > { %v240_v16 = vpop.permute.xlu1 %239  ;;  %v304_v17 = vpop.permute.xlu0 %303 }
  0x87   : > { %256 = vst.msk [vmem:[#allocation2 + $0x3c] sm:$0xf] %vm208_vm0, %v240_v16  ;;  %320 = vst.msk [vmem:[#allocation2 + $0x7c] sm:$0xf] %vm208_vm0, %v304_v17  ;;  %v1880_v17 = vld [vmem:[#allocation2 + $0x18] sm:$0xff]  }
  0x88   : > { %687 = vrot.lane.b32.xlu1 %v1993_v1, %s1942_s13  ;;  %685 = vrot.lane.b32.xlu0 %v1991_v0, %s1942_s13 }
  0x8a   : > { %v432_v20 = vpop.permute.xlu1 %431  ;;  %v430_v21 = vpop.permute.xlu0 %429 }
  0x8b   : > { %448 = vst.msk [vmem:[#allocation2 + $0xfc] sm:$0xf] %vm208_vm0, %v432_v20  ;;  %447 = vst.msk [vmem:[#allocation2 + $0xf8] sm:$0xf] %vm208_vm0, %v430_v21 }
  0x8c   : > { %623 = vrot.lane.b32.xlu1 %v1993_v1, %s1943_s14  ;;  %621 = vrot.lane.b32.xlu0 %v1991_v0, %s1943_s14 }
  0x8e   : > { %v368_v22 = vpop.permute.xlu1 %367  ;;  %v366_v23 = vpop.permute.xlu0 %365  ;;  %v1861_v24 = vld [vmem:[#allocation2 + $0x78] sm:$0xff]  }
  0x8f   : > { %384 = vst.msk [vmem:[#allocation2 + $0xbc] sm:$0xf] %vm208_vm0, %v368_v22  ;;  %383 = vst.msk [vmem:[#allocation2 + $0xb8] sm:$0xf] %vm208_vm0, %v366_v23  ;;  %v1862_v25 = vld [vmem:[#allocation2 + $0x38] sm:$0xff]   ;;  %1723 = vmatprep.subr.bf16.mxu0 %v1861_v24 }
  0x90   : > { %555 = vrot.lane.b32.xlu1 %v1995_v2, %s1940_s7  ;;  %553 = vrot.lane.b32.xlu0 %v2001_v3, %s1940_s7 }
  0x91   : > { %1724 = vmatpush3.bf16.msra.mxu0 %v1862_v25 }
  0x92   : > { %v300_v26 = vpop.permute.xlu1 %299  ;;  %v298_v27 = vpop.permute.xlu0 %297  ;;  %v1863_v28 = vld [vmem:[#allocation2 + $0xf8] sm:$0xff]  }
  0x93   : > { %318 = vst.msk [vmem:[#allocation2 + $0x74] sm:$0xf] %vm208_vm0, %v300_v26  ;;  %317 = vst.msk [vmem:[#allocation2 + $0x70] sm:$0xf] %vm208_vm0, %v298_v27  ;;  %1751 = vmatprep.subr.bf16.mxu1 %v1863_v28 }
  0x94   : > { %491 = vrot.lane.b32.xlu1 %v1995_v2, %s1941_s8  ;;  %489 = vrot.lane.b32.xlu0 %v2001_v3, %s1941_s8 }
  0x96   : > { %v236_v29 = vpop.permute.xlu1 %235  ;;  %v234_v30 = vpop.permute.xlu0 %233  ;;  %v1864_v31 = vld [vmem:[#allocation2 + $0xb8] sm:$0xff]  }
  0x97   : > { %254 = vst.msk [vmem:[#allocation2 + $0x34] sm:$0xf] %vm208_vm0, %v236_v29  ;;  %253 = vst.msk [vmem:[#allocation2 + $0x30] sm:$0xf] %vm208_vm0, %v234_v30  ;;  %1752 = vmatpush3.bf16.msra.mxu1 %v1864_v31 }
  0x98   : > { %683 = vrot.lane.b32.xlu1 %v1995_v2, %s1942_s13  ;;  %681 = vrot.lane.b32.xlu0 %v2001_v3, %s1942_s13 }
  0x9a   : > { %v428_v32 = vpop.permute.xlu1 %427  ;;  %v426_v33 = vpop.permute.xlu0 %425  ;;  %v1865_v34 = vld [vmem:[#allocation2 + $0x70] sm:$0xff]  }
  0x9b   : > { %446 = vst.msk [vmem:[#allocation2 + $0xf4] sm:$0xf] %vm208_vm0, %v428_v32  ;;  %445 = vst.msk [vmem:[#allocation2 + $0xf0] sm:$0xf] %vm208_vm0, %v426_v33  ;;  %1725 = vmatprep.subr.bf16.mxu0 %v1865_v34 }
  0x9c   : > { %619 = vrot.lane.b32.xlu1 %v1995_v2, %s1943_s14  ;;  %617 = vrot.lane.b32.xlu0 %v2001_v3, %s1943_s14 }
  0x9e   : > { %v364_v35 = vpop.permute.xlu1 %363  ;;  %v362_v36 = vpop.permute.xlu0 %361  ;;  %v1866_v37 = vld [vmem:[#allocation2 + $0x30] sm:$0xff]  }
  0x9f   : > { %382 = vst.msk [vmem:[#allocation2 + $0xb4] sm:$0xf] %vm208_vm0, %v364_v35  ;;  %381 = vst.msk [vmem:[#allocation2 + $0xb0] sm:$0xf] %vm208_vm0, %v362_v36  ;;  %1726 = vmatpush3.bf16.msra.mxu0 %v1866_v37  ;;  %v1888_v36 = vld [vmem:[#allocation2 + $0x8] sm:$0xff]  }
  0xa0   : > { %551 = vrot.lane.b32.xlu1 %v2003_v4, %s1940_s7  ;;  %549 = vrot.lane.b32.xlu0 %v2011_v5, %s1940_s7 }
  0xa2   : > { %v296_v38 = vpop.permute.xlu1 %295  ;;  %v294_v39 = vpop.permute.xlu0 %293  ;;  %v1867_v40 = vld [vmem:[#allocation2 + $0xf0] sm:$0xff]  }
  0xa3   : > { %316 = vst.msk [vmem:[#allocation2 + $0x6c] sm:$0xf] %vm208_vm0, %v296_v38  ;;  %315 = vst.msk [vmem:[#allocation2 + $0x68] sm:$0xf] %vm208_vm0, %v294_v39  ;;  %1753 = vmatprep.subr.bf16.mxu1 %v1867_v40 }
  0xa4   : > { %487 = vrot.lane.b32.xlu1 %v2003_v4, %s1941_s8  ;;  %485 = vrot.lane.b32.xlu0 %v2011_v5, %s1941_s8 }
  0xa6   : > { %v232_v41 = vpop.permute.xlu1 %231  ;;  %v230_v42 = vpop.permute.xlu0 %229  ;;  %v1868_v43 = vld [vmem:[#allocation2 + $0xb0] sm:$0xff]  }
  0xa7   : > { %252 = vst.msk [vmem:[#allocation2 + $0x2c] sm:$0xf] %vm208_vm0, %v232_v41  ;;  %251 = vst.msk [vmem:[#allocation2 + $0x28] sm:$0xf] %vm208_vm0, %v230_v42  ;;  %1754 = vmatpush3.bf16.msra.mxu1 %v1868_v43 }
  0xa8   : > { %679 = vrot.lane.b32.xlu1 %v2003_v4, %s1942_s13  ;;  %677 = vrot.lane.b32.xlu0 %v2011_v5, %s1942_s13 }
  0xaa   : > { %v424_v44 = vpop.permute.xlu1 %423  ;;  %v422_v45 = vpop.permute.xlu0 %421  ;;  %v1869_v46 = vld [vmem:[#allocation2 + $0x68] sm:$0xff]  }
  0xab   : > { %444 = vst.msk [vmem:[#allocation2 + $0xec] sm:$0xf] %vm208_vm0, %v424_v44  ;;  %443 = vst.msk [vmem:[#allocation2 + $0xe8] sm:$0xf] %vm208_vm0, %v422_v45  ;;  %1727 = vmatprep.subr.bf16.mxu0 %v1869_v46  ;;  %v1892_v44 = vld [vmem:[#allocation2] sm:$0xff]  }
  0xac   : > { %615 = vrot.lane.b32.xlu1 %v2003_v4, %s1943_s14  ;;  %613 = vrot.lane.b32.xlu0 %v2011_v5, %s1943_s14 }
  0xae   : > { %v360_v47 = vpop.permute.xlu1 %359  ;;  %v358_v48 = vpop.permute.xlu0 %357  ;;  %v1870_v49 = vld [vmem:[#allocation2 + $0x28] sm:$0xff]  }
  0xaf   : > { %380 = vst.msk [vmem:[#allocation2 + $0xac] sm:$0xf] %vm208_vm0, %v360_v47  ;;  %379 = vst.msk [vmem:[#allocation2 + $0xa8] sm:$0xf] %vm208_vm0, %v358_v48  ;;  %1728 = vmatpush3.bf16.msra.mxu0 %v1870_v49  ;;  %v713_v48 = vld [vmem:[%s2459_s1 + $0x40] sm:$0xff]  ;;  %v2309_v49 = vld [vmem:[%s2459_s1 + $0x30] sm:$0xff] }
  0xb0   : > { %547 = vrot.lane.b32.xlu1 %v2013_v6, %s1940_s7  ;;  %545 = vrot.lane.b32.xlu0 %v2015_v7, %s1940_s7 }
  0xb2   : > { %v292_v50 = vpop.permute.xlu1 %291  ;;  %v290_v51 = vpop.permute.xlu0 %289  ;;  %v1871_v52 = vld [vmem:[#allocation2 + $0xe8] sm:$0xff]  }
  0xb3   : > { %314 = vst.msk [vmem:[#allocation2 + $0x64] sm:$0xf] %vm208_vm0, %v292_v50  ;;  %313 = vst.msk [vmem:[#allocation2 + $0x60] sm:$0xf] %vm208_vm0, %v290_v51  ;;  %1755 = vmatprep.subr.bf16.mxu1 %v1871_v52 }
  0xb4   : > { %483 = vrot.lane.b32.xlu1 %v2013_v6, %s1941_s8  ;;  %481 = vrot.lane.b32.xlu0 %v2015_v7, %s1941_s8 }
  0xb6   : > { %v228_v53 = vpop.permute.xlu1 %227  ;;  %v226_v54 = vpop.permute.xlu0 %225  ;;  %v1872_v55 = vld [vmem:[#allocation2 + $0xa8] sm:$0xff]  }
  0xb7   : > { %250 = vst.msk [vmem:[#allocation2 + $0x24] sm:$0xf] %vm208_vm0, %v228_v53  ;;  %249 = vst.msk [vmem:[#allocation2 + $0x20] sm:$0xf] %vm208_vm0, %v226_v54  ;;  %1756 = vmatpush3.bf16.msra.mxu1 %v1872_v55 }
  0xb8   : > { %675 = vrot.lane.b32.xlu1 %v2013_v6, %s1942_s13  ;;  %673 = vrot.lane.b32.xlu0 %v2015_v7, %s1942_s13 }
  0xba   : > { %v420_v56 = vpop.permute.xlu1 %419  ;;  %v418_v57 = vpop.permute.xlu0 %417  ;;  %v1873_v58 = vld [vmem:[#allocation2 + $0x60] sm:$0xff]  }
  0xbb   : > { %442 = vst.msk [vmem:[#allocation2 + $0xe4] sm:$0xf] %vm208_vm0, %v420_v56  ;;  %441 = vst.msk [vmem:[#allocation2 + $0xe0] sm:$0xf] %vm208_vm0, %v418_v57  ;;  %1729 = vmatprep.subr.bf16.mxu0 %v1873_v58  ;;  %v714_v58 = vld [vmem:[%s2459_s1 + $0x48] sm:$0xff] }
  0xbc   : > { %611 = vrot.lane.b32.xlu1 %v2013_v6, %s1943_s14  ;;  %609 = vrot.lane.b32.xlu0 %v2015_v7, %s1943_s14 }
  0xbe   : > { %v356_v59 = vpop.permute.xlu1 %355  ;;  %v354_v60 = vpop.permute.xlu0 %353  ;;  %v1874_v61 = vld [vmem:[#allocation2 + $0x20] sm:$0xff]  }
  0xbf   : > { %378 = vst.msk [vmem:[#allocation2 + $0xa4] sm:$0xf] %vm208_vm0, %v356_v59  ;;  %377 = vst.msk [vmem:[#allocation2 + $0xa0] sm:$0xf] %vm208_vm0, %v354_v60  ;;  %1730 = vmatpush3.bf16.msra.mxu0 %v1874_v61  ;;  %v718_v59 = vld [vmem:[%s2459_s1 + $0x68] sm:$0xff] }
  0xc0   : > { %527 = vrot.lane.b32.xlu1 %v1993_v1, %s1944_s15  ;;  %525 = vrot.lane.b32.xlu0 %v1991_v0, %s1944_s15 }
  0xc2   : > { %v272_v62 = vpop.permute.xlu1 %271  ;;  %v270_v63 = vpop.permute.xlu0 %269  ;;  %v1875_v10 = vld [vmem:[#allocation2 + $0xe0] sm:$0xff]  }
  0xc3   : > { %288 = vst.msk [vmem:[#allocation2 + $0x5c] sm:$0xf] %vm208_vm0, %v272_v62  ;;  %287 = vst.msk [vmem:[#allocation2 + $0x58] sm:$0xf] %vm208_vm0, %v270_v63  ;;  %1757 = vmatprep.subr.bf16.mxu1 %v1875_v10  ;;  %v1642_v63 = vcombine.high %v714_v58, %v718_v59  ;;  %v1637_v10 = vcombine.low %v2337_v8, %v2342_v9 }
  0xc4   : > { %463 = vrot.lane.b32.xlu1 %v1993_v1, %s1945_s16  ;;  %461 = vrot.lane.b32.xlu0 %v1991_v0, %s1945_s16 }
  0xc6   : > { %v400_v12 = vpop.permute.xlu1 %399  ;;  %v398_v13 = vpop.permute.xlu0 %397  ;;  %v1876_v16 = vld [vmem:[#allocation2 + $0xa0] sm:$0xff]  }
  0xc7   : > { %416 = vst.msk [vmem:[#allocation2 + $0xdc] sm:$0xf] %vm208_vm0, %v400_v12  ;;  %415 = vst.msk [vmem:[#allocation2 + $0xd8] sm:$0xf] %vm208_vm0, %v398_v13  ;;  %1758 = vmatpush3.bf16.msra.mxu1 %v1876_v16 }
  0xc8   : > { %655 = vrot.lane.b32.xlu1 %v1993_v1, %s1946_s3  ;;  %653 = vrot.lane.b32.xlu0 %v1991_v0, %s1946_s3 }
  0xca   : > { %v336_v18 = vpop.permute.xlu1 %335  ;;  %v334_v20 = vpop.permute.xlu0 %333  ;;  %v1877_v21 = vld [vmem:[#allocation2 + $0x58] sm:$0xff]  }
  0xcb   : > { %352 = vst.msk [vmem:[#allocation2 + $0x9c] sm:$0xf] %vm208_vm0, %v336_v18  ;;  %351 = vst.msk [vmem:[#allocation2 + $0x98] sm:$0xf] %vm208_vm0, %v334_v20  ;;  %1731 = vmatprep.subr.bf16.mxu0 %v1877_v21  ;;  %v1638_v21 = vcombine.high %v2337_v8, %v2342_v9 }
  0xcc   : > { %591 = vrot.lane.b32.xlu1 %v1993_v1, %s1947_s19  ;;  %589 = vrot.lane.b32.xlu0 %v1991_v0, %s1947_s19  ;;  %v1884_v0 = vld [vmem:[#allocation2 + $0x10] sm:$0xff]  }
  0xcd   : > { %1732 = vmatpush3.bf16.msra.mxu0 %v1880_v17 }
  0xce   : > { %v268_v22 = vpop.permute.xlu1 %267  ;;  %v266_v23 = vpop.permute.xlu0 %265  ;;  %v1878_v24 = vld [vmem:[#allocation2 + $0xd8] sm:$0xff]  }
  0xcf   : > { %286 = vst.msk [vmem:[#allocation2 + $0x54] sm:$0xf] %vm208_vm0, %v268_v22  ;;  %285 = vst.msk [vmem:[#allocation2 + $0x50] sm:$0xf] %vm208_vm0, %v266_v23  ;;  %1759 = vmatprep.subr.bf16.mxu1 %v1878_v24 }
  0xd0   : > { %523 = vrot.lane.b32.xlu1 %v1995_v2, %s1944_s15  ;;  %521 = vrot.lane.b32.xlu0 %v2001_v3, %s1944_s15 }
  0xd2   : > { %v396_v1 = vpop.permute.xlu1 %395  ;;  %v394_v25 = vpop.permute.xlu0 %393  ;;  %v1879_v26 = vld [vmem:[#allocation2 + $0x98] sm:$0xff]  }
  0xd3   : > { %414 = vst.msk [vmem:[#allocation2 + $0xd4] sm:$0xf] %vm208_vm0, %v396_v1  ;;  %413 = vst.msk [vmem:[#allocation2 + $0xd0] sm:$0xf] %vm208_vm0, %v394_v25  ;;  %1760 = vmatpush3.bf16.msra.mxu1 %v1879_v26  ;;  %v851_v1 = vld [vmem:[%s2460_s2 + $0x10] sm:$0xff]  ;;  %v852_v25 = vld [vmem:[%s2460_s2 + $0x18] sm:$0xff] }
  0xd4   : > { %459 = vrot.lane.b32.xlu1 %v1995_v2, %s1945_s16  ;;  %457 = vrot.lane.b32.xlu0 %v2001_v3, %s1945_s16 }
  0xd6   : > { %v332_v27 = vpop.permute.xlu1 %331  ;;  %v330_v28 = vpop.permute.xlu0 %329  ;;  %v1881_v29 = vld [vmem:[#allocation2 + $0x50] sm:$0xff]  }
  0xd7   : > { %350 = vst.msk [vmem:[#allocation2 + $0x94] sm:$0xf] %vm208_vm0, %v332_v27  ;;  %349 = vst.msk [vmem:[#allocation2 + $0x90] sm:$0xf] %vm208_vm0, %v330_v28  ;;  %1733 = vmatprep.subr.bf16.mxu0 %v1881_v29 }
  0xd8   : > { %651 = vrot.lane.b32.xlu1 %v1995_v2, %s1946_s3  ;;  %649 = vrot.lane.b32.xlu0 %v2001_v3, %s1946_s3 }
  0xd9   : > { %1734 = vmatpush3.bf16.msra.mxu0 %v1884_v0 }
  0xda   : > { %v264_v30 = vpop.permute.xlu1 %263  ;;  %v262_v31 = vpop.permute.xlu0 %261  ;;  %v1882_v32 = vld [vmem:[#allocation2 + $0xd0] sm:$0xff]  }
  0xdb   : > { %284 = vst.msk [vmem:[#allocation2 + $0x4c] sm:$0xf] %vm208_vm0, %v264_v30  ;;  %283 = vst.msk [vmem:[#allocation2 + $0x48] sm:$0xf] %vm208_vm0, %v262_v31  ;;  %1761 = vmatprep.subr.bf16.mxu1 %v1882_v32 }
  0xdc   : > { %587 = vrot.lane.b32.xlu1 %v1995_v2, %s1947_s19  ;;  %585 = vrot.lane.b32.xlu0 %v2001_v3, %s1947_s19 }
  0xde   : > { %v392_v33 = vpop.permute.xlu1 %391  ;;  %v390_v34 = vpop.permute.xlu0 %389  ;;  %v1883_v35 = vld [vmem:[#allocation2 + $0x90] sm:$0xff]  }
  0xdf   : > { %412 = vst.msk [vmem:[#allocation2 + $0xcc] sm:$0xf] %vm208_vm0, %v392_v33  ;;  %411 = vst.msk [vmem:[#allocation2 + $0xc8] sm:$0xf] %vm208_vm0, %v390_v34  ;;  %1762 = vmatpush3.bf16.msra.mxu1 %v1883_v35 }
  0xe0   : > { %519 = vrot.lane.b32.xlu1 %v2003_v4, %s1944_s15  ;;  %517 = vrot.lane.b32.xlu0 %v2011_v5, %s1944_s15 }
  0xe2   : > { %v328_v2 = vpop.permute.xlu1 %327  ;;  %v326_v37 = vpop.permute.xlu0 %325  ;;  %v1885_v38 = vld [vmem:[#allocation2 + $0x48] sm:$0xff]  }
  0xe3   : > { %348 = vst.msk [vmem:[#allocation2 + $0x8c] sm:$0xf] %vm208_vm0, %v328_v2  ;;  %347 = vst.msk [vmem:[#allocation2 + $0x88] sm:$0xf] %vm208_vm0, %v326_v37  ;;  %1735 = vmatprep.subr.bf16.mxu0 %v1885_v38 }
  0xe4   : > { %455 = vrot.lane.b32.xlu1 %v2003_v4, %s1945_s16  ;;  %453 = vrot.lane.b32.xlu0 %v2011_v5, %s1945_s16 }
  0xe5   : > { %1736 = vmatpush3.bf16.msra.mxu0 %v1888_v36 }
  0xe6   : > { %v260_v3 = vpop.permute.xlu1 %259  ;;  %v258_v39 = vpop.permute.xlu0 %257  ;;  %v1886_v40 = vld [vmem:[#allocation2 + $0xc8] sm:$0xff]  }
  0xe7   : > { %282 = vst.msk [vmem:[#allocation2 + $0x44] sm:$0xf] %vm208_vm0, %v260_v3  ;;  %281 = vst.msk [vmem:[#allocation2 + $0x40] sm:$0xf] %vm208_vm0, %v258_v39  ;;  %1763 = vmatprep.subr.bf16.mxu1 %v1886_v40 }
  0xe8   : > { %647 = vrot.lane.b32.xlu1 %v2003_v4, %s1946_s3  ;;  %645 = vrot.lane.b32.xlu0 %v2011_v5, %s1946_s3 }
  0xea   : > { %v388_v41 = vpop.permute.xlu1 %387  ;;  %v386_v42 = vpop.permute.xlu0 %385  ;;  %v1887_v43 = vld [vmem:[#allocation2 + $0x88] sm:$0xff]  }
  0xeb   : > { %410 = vst.msk [vmem:[#allocation2 + $0xc4] sm:$0xf] %vm208_vm0, %v388_v41  ;;  %409 = vst.msk [vmem:[#allocation2 + $0xc0] sm:$0xf] %vm208_vm0, %v386_v42  ;;  %1764 = vmatpush3.bf16.msra.mxu1 %v1887_v43 }
  0xec   : > { %583 = vrot.lane.b32.xlu1 %v2003_v4, %s1947_s19  ;;  %581 = vrot.lane.b32.xlu0 %v2011_v5, %s1947_s19  ;;  %v717_v4 = vld [vmem:[%s2459_s1 + $0x60] sm:$0xff]  ;;  %v2304_v5 = vld [vmem:[%s2459_s1 + $0x10] sm:$0xff] }
  0xed   : > { %v1635_v50 = vcombine.low %v2304_v5, %v2309_v49  ;;  %v1640_v54 = vcombine.high %v713_v48, %v717_v4  ;;  %v1639_v62 = vcombine.low %v713_v48, %v717_v4  ;;  %v1636_v12 = vcombine.high %v2304_v5, %v2309_v49 }
  0xee   : > { %v324_v45 = vpop.permute.xlu1 %323  ;;  %v322_v46 = vpop.permute.xlu0 %321  ;;  %v1889_v47 = vld [vmem:[#allocation2 + $0x40] sm:$0xff]  }
  0xef   : > { %346 = vst.msk [vmem:[#allocation2 + $0x84] sm:$0xf] %vm208_vm0, %v324_v45  ;;  %345 = vst.msk [vmem:[#allocation2 + $0x80] sm:$0xf] %vm208_vm0, %v322_v46  ;;  %1737 = vmatprep.subr.bf16.mxu0 %v1889_v47 }
  0xf0   : > { %515 = vrot.lane.b32.xlu1 %v2013_v6, %s1944_s15  ;;  %513 = vrot.lane.b32.xlu0 %v2015_v7, %s1944_s15 }
  0xf1   : > { %1738 = vmatpush3.bf16.msra.mxu0 %v1892_v44 }
  0xf2   : > { %v560_v51 = vpop.permute.xlu1 %559  ;;  %v558_v52 = vpop.permute.xlu0 %557  ;;  %v1890_v53 = vld [vmem:[#allocation2 + $0xc0] sm:$0xff]  }
  0xf3   : > { %576 = vst.msk [vmem:[#allocation2 + $0x17c] sm:$0xf] %vm208_vm0, %v560_v51  ;;  %575 = vst.msk [vmem:[#allocation2 + $0x178] sm:$0xf] %vm208_vm0, %v558_v52  ;;  %1765 = vmatprep.subr.bf16.mxu1 %v1890_v53 }
  0xf4   : > { %451 = vrot.lane.b32.xlu1 %v2013_v6, %s1945_s16  ;;  %449 = vrot.lane.b32.xlu0 %v2015_v7, %s1945_s16 }
  0xf5   : > { %1370 = vmatmul.mubr.bf16.vlgmr.msra.gmra.mxu0 %v1631_v11 }
  0xf6   : > { %v496_v55 = vpop.permute.xlu1 %495  ;;  %v494_v56 = vpop.permute.xlu0 %493  ;;  %v1891_v57 = vld [vmem:[#allocation2 + $0x80] sm:$0xff]   ;;  %1377 = vmatprep.mubr.bf16.mxu0 %v1640_v54 }
  0xf7   : > { %512 = vst.msk [vmem:[#allocation2 + $0x13c] sm:$0xf] %vm208_vm0, %v496_v55  ;;  %511 = vst.msk [vmem:[#allocation2 + $0x138] sm:$0xf] %vm208_vm0, %v494_v56  ;;  %1766 = vmatpush3.bf16.msra.mxu1 %v1891_v57 }
  0xf8   : > { %643 = vrot.lane.b32.xlu1 %v2013_v6, %s1946_s3  ;;  %641 = vrot.lane.b32.xlu0 %v2015_v7, %s1946_s3 }
  0xfa   : > { %v688_v11 = vpop.permute.xlu1 %687  ;;  %v686_v60 = vpop.permute.xlu0 %685  ;;  %v1893_v61 = vld [vmem:[#allocation2 + $0x178] sm:$0xff]   ;;  %1419 = vmatmul.mubr.bf16.vlgmr.msra.gmra.mxu1 %v1633_v19  ;;  %v849_v19 = vld [vmem:[%s2460_s2] sm:$0xff] }
  0xfb   : > { %704 = vst.msk [vmem:[#allocation2 + $0x1fc] sm:$0xf] %vm208_vm0, %v688_v11  ;;  %703 = vst.msk [vmem:[#allocation2 + $0x1f8] sm:$0xf] %vm208_vm0, %v686_v60  ;;  %1779 = vmatprep.subr.bf16.mxu0 %v1893_v61  ;;  %1426 = vmatprep.mubr.bf16.mxu1 %v1642_v63 }
  0xfc   : > { %579 = vrot.lane.b32.xlu1 %v2013_v6, %s1947_s19  ;;  %577 = vrot.lane.b32.xlu0 %v2015_v7, %s1947_s19  ;;  %v1641_v6 = vcombine.low %v714_v58, %v718_v59 }
  0xfd   : > { %1378 = vmatmul.mubr.bf16.gmra.mxu0 %v1639_v62 }
  0xfe   : > { %v624_v13 = vpop.permute.xlu1 %623  ;;  %v622_v16 = vpop.permute.xlu0 %621  ;;  %v1894_v17 = vld [vmem:[#allocation2 + $0x138] sm:$0xff]   ;;  %1467 = vmatprep.mubr.bf16.mxu0 %v1636_v12 }
  0xff   : > { %640 = vst.msk [vmem:[#allocation2 + $0x1bc] sm:$0xf] %vm208_vm0, %v624_v13  ;;  %639 = vst.msk [vmem:[#allocation2 + $0x1b8] sm:$0xf] %vm208_vm0, %v622_v16  ;;  %1780 = vmatpush3.bf16.msra.mxu0 %v1894_v17 }
 0x100   : > { %860 = vperm.xlu1 %1860, %v850_v14   ;;  %855 = vperm.xlu0 %1859, %v849_v19  }
 0x102   : > { %v556_v18 = vpop.permute.xlu1 %555  ;;  %v554_v20 = vpop.permute.xlu0 %553  ;;  %v1895_v7 = vld [vmem:[#allocation2 + $0x1f8] sm:$0xff]   ;;  %1427 = vmatmul.mubr.bf16.gmra.mxu1 %v1641_v6 }
 0x103   : > { %574 = vst.msk [vmem:[#allocation2 + $0x174] sm:$0xf] %vm208_vm0, %v556_v18  ;;  %573 = vst.msk [vmem:[#allocation2 + $0x170] sm:$0xf] %vm208_vm0, %v554_v20  ;;  %1807 = vmatprep.subr.bf16.mxu1 %v1895_v7  ;;  %1516 = vmatprep.mubr.bf16.mxu1 %v1638_v21 }
 0x104   : > { %865 = vperm.xlu1 %1860, %v851_v1   ;;  %870 = vperm.xlu0 %1859, %v852_v25  }
 0x106   : > { %v492_v22 = vpop.permute.xlu1 %491  ;;  %v490_v23 = vpop.permute.xlu0 %489  ;;  %v1896_v24 = vld [vmem:[#allocation2 + $0x1b8] sm:$0xff]  }
 0x107   : > { %510 = vst.msk [vmem:[#allocation2 + $0x134] sm:$0xf] %vm208_vm0, %v492_v22  ;;  %509 = vst.msk [vmem:[#allocation2 + $0x130] sm:$0xf] %vm208_vm0, %v490_v23  ;;  %1808 = vmatpush3.bf16.msra.mxu1 %v1896_v24 }
 0x10a   : > { %v684_v26 = vpop.permute.xlu1 %683  ;;  %v682_v0 = vpop.permute.xlu0 %681  ;;  %v1897_v27 = vld [vmem:[#allocation2 + $0x170] sm:$0xff]  }
 0x10b   : > { %702 = vst.msk [vmem:[#allocation2 + $0x1f4] sm:$0xf] %vm208_vm0, %v684_v26  ;;  %701 = vst.msk [vmem:[#allocation2 + $0x1f0] sm:$0xf] %vm208_vm0, %v682_v0  ;;  %1781 = vmatprep.subr.bf16.mxu0 %v1897_v27 }
 0x10e   : > { %v620_v28 = vpop.permute.xlu1 %619  ;;  %v618_v29 = vpop.permute.xlu0 %617  ;;  %v1898_v30 = vld [vmem:[#allocation2 + $0x130] sm:$0xff]  }
 0x10f   : > { %638 = vst.msk [vmem:[#allocation2 + $0x1b4] sm:$0xf] %vm208_vm0, %v620_v28  ;;  %637 = vst.msk [vmem:[#allocation2 + $0x1b0] sm:$0xf] %vm208_vm0, %v618_v29  ;;  %1782 = vmatpush3.bf16.msra.mxu0 %v1898_v30 }
 0x112   : > { %v552_v31 = vpop.permute.xlu1 %551  ;;  %v550_v32 = vpop.permute.xlu0 %549  ;;  %v1899_v33 = vld [vmem:[#allocation2 + $0x1f0] sm:$0xff]  }
 0x113   : > { %572 = vst.msk [vmem:[#allocation2 + $0x16c] sm:$0xf] %vm208_vm0, %v552_v31  ;;  %571 = vst.msk [vmem:[#allocation2 + $0x168] sm:$0xf] %vm208_vm0, %v550_v32  ;;  %1809 = vmatprep.subr.bf16.mxu1 %v1899_v33 }
 0x116   : > { %v488_v34 = vpop.permute.xlu1 %487  ;;  %v486_v35 = vpop.permute.xlu0 %485  ;;  %v1900_v36 = vld [vmem:[#allocation2 + $0x1b0] sm:$0xff]  }
 0x117   : > { %508 = vst.msk [vmem:[#allocation2 + $0x12c] sm:$0xf] %vm208_vm0, %v488_v34  ;;  %507 = vst.msk [vmem:[#allocation2 + $0x128] sm:$0xf] %vm208_vm0, %v486_v35  ;;  %1810 = vmatpush3.bf16.msra.mxu1 %v1900_v36 }
 0x11a   : > { %v680_v2 = vpop.permute.xlu1 %679  ;;  %v678_v37 = vpop.permute.xlu0 %677  ;;  %v1901_v38 = vld [vmem:[#allocation2 + $0x168] sm:$0xff]  }
 0x11b   : > { %700 = vst.msk [vmem:[#allocation2 + $0x1ec] sm:$0xf] %vm208_vm0, %v680_v2  ;;  %699 = vst.msk [vmem:[#allocation2 + $0x1e8] sm:$0xf] %vm208_vm0, %v678_v37  ;;  %1783 = vmatprep.subr.bf16.mxu0 %v1901_v38 }
 0x11e   : > { %v616_v3 = vpop.permute.xlu1 %615  ;;  %v614_v39 = vpop.permute.xlu0 %613  ;;  %v1902_v40 = vld [vmem:[#allocation2 + $0x128] sm:$0xff]  }
 0x11f   : > { %636 = vst.msk [vmem:[#allocation2 + $0x1ac] sm:$0xf] %vm208_vm0, %v616_v3  ;;  %635 = vst.msk [vmem:[#allocation2 + $0x1a8] sm:$0xf] %vm208_vm0, %v614_v39  ;;  %1784 = vmatpush3.bf16.msra.mxu0 %v1902_v40  ;;  %v715_v40 = vld [vmem:[%s2459_s1 + $0x50] sm:$0xff] }
 0x122   : > { %v548_v41 = vpop.permute.xlu1 %547  ;;  %v546_v42 = vpop.permute.xlu0 %545  ;;  %v1903_v43 = vld [vmem:[#allocation2 + $0x1e8] sm:$0xff]  }
 0x123   : > { %570 = vst.msk [vmem:[#allocation2 + $0x164] sm:$0xf] %vm208_vm0, %v548_v41  ;;  %569 = vst.msk [vmem:[#allocation2 + $0x160] sm:$0xf] %vm208_vm0, %v546_v42  ;;  %1811 = vmatprep.subr.bf16.mxu1 %v1903_v43  ;;  %v719_v41 = vld [vmem:[%s2459_s1 + $0x70] sm:$0xff] }
 0x126   : > { %v484_v44 = vpop.permute.xlu1 %483  ;;  %v482_v45 = vpop.permute.xlu0 %481  ;;  %v1904_v46 = vld [vmem:[#allocation2 + $0x1a8] sm:$0xff]  }
 0x127   : > { %506 = vst.msk [vmem:[#allocation2 + $0x124] sm:$0xf] %vm208_vm0, %v484_v44  ;;  %505 = vst.msk [vmem:[#allocation2 + $0x120] sm:$0xf] %vm208_vm0, %v482_v45  ;;  %1812 = vmatpush3.bf16.msra.mxu1 %v1904_v46  ;;  %v1644_v45 = vcombine.high %v715_v40, %v719_v41 }
 0x12a   : > { %v676_v47 = vpop.permute.xlu1 %675  ;;  %v674_v48 = vpop.permute.xlu0 %673  ;;  %v1905_v4 = vld [vmem:[#allocation2 + $0x160] sm:$0xff]  }
 0x12b   : > { %698 = vst.msk [vmem:[#allocation2 + $0x1e4] sm:$0xf] %vm208_vm0, %v676_v47  ;;  %697 = vst.msk [vmem:[#allocation2 + $0x1e0] sm:$0xf] %vm208_vm0, %v674_v48  ;;  %1785 = vmatprep.subr.bf16.mxu0 %v1905_v4  ;;  %v716_v47 = vld [vmem:[%s2459_s1 + $0x58] sm:$0xff] }
 0x12c   : > { %v720_v48 = vld [vmem:[%s2459_s1 + $0x78] sm:$0xff] }
 0x12d   : > { %v1645_v5 = vcombine.low %v716_v47, %v720_v48 }
 0x12e   : > { %v612_v51 = vpop.permute.xlu1 %611  ;;  %v610_v52 = vpop.permute.xlu0 %609  ;;  %v1906_v53 = vld [vmem:[#allocation2 + $0x120] sm:$0xff]  }
 0x12f   : > { %634 = vst.msk [vmem:[#allocation2 + $0x1a4] sm:$0xf] %vm208_vm0, %v612_v51  ;;  %633 = vst.msk [vmem:[#allocation2 + $0x1a0] sm:$0xf] %vm208_vm0, %v610_v52  ;;  %1786 = vmatpush3.bf16.msra.mxu0 %v1906_v53  ;;  %v1643_v51 = vcombine.low %v715_v40, %v719_v41  ;;  %v1646_v52 = vcombine.high %v716_v47, %v720_v48 }
 0x132   : > { %v528_v54 = vpop.permute.xlu1 %527  ;;  %v526_v55 = vpop.permute.xlu0 %525  ;;  %v1907_v56 = vld [vmem:[#allocation2 + $0x1e0] sm:$0xff]  }
 0x133   : > { %544 = vst.msk [vmem:[#allocation2 + $0x15c] sm:$0xf] %vm208_vm0, %v528_v54  ;;  %543 = vst.msk [vmem:[#allocation2 + $0x158] sm:$0xf] %vm208_vm0, %v526_v55  ;;  %1813 = vmatprep.subr.bf16.mxu1 %v1907_v56 }
 0x136   : > { %v464_v57 = vpop.permute.xlu1 %463  ;;  %v462_v58 = vpop.permute.xlu0 %461  ;;  %v1908_v59 = vld [vmem:[#allocation2 + $0x1a0] sm:$0xff]  }
 0x137   : > { %480 = vst.msk [vmem:[#allocation2 + $0x11c] sm:$0xf] %vm208_vm0, %v464_v57  ;;  %479 = vst.msk [vmem:[#allocation2 + $0x118] sm:$0xf] %vm208_vm0, %v462_v58  ;;  %1814 = vmatpush3.bf16.msra.mxu1 %v1908_v59 }
 0x13a   : > { %v656_v11 = vpop.permute.xlu1 %655  ;;  %v654_v60 = vpop.permute.xlu0 %653  ;;  %v1909_v61 = vld [vmem:[#allocation2 + $0x158] sm:$0xff]  }
 0x13b   : > { %672 = vst.msk [vmem:[#allocation2 + $0x1dc] sm:$0xf] %vm208_vm0, %v656_v11  ;;  %671 = vst.msk [vmem:[#allocation2 + $0x1d8] sm:$0xf] %vm208_vm0, %v654_v60  ;;  %1787 = vmatprep.subr.bf16.mxu0 %v1909_v61 }
 0x13e   : > { %v592_v62 = vpop.permute.xlu1 %591  ;;  %v590_v63 = vpop.permute.xlu0 %589  ;;  %v1910_v12 = vld [vmem:[#allocation2 + $0x118] sm:$0xff]  }
 0x13f   : > { %608 = vst.msk [vmem:[#allocation2 + $0x19c] sm:$0xf] %vm208_vm0, %v592_v62  ;;  %607 = vst.msk [vmem:[#allocation2 + $0x198] sm:$0xf] %vm208_vm0, %v590_v63  ;;  %1788 = vmatpush3.bf16.msra.mxu0 %v1910_v12 }
 0x142   : > { %v524_v13 = vpop.permute.xlu1 %523  ;;  %v522_v16 = vpop.permute.xlu0 %521  ;;  %v1911_v17 = vld [vmem:[#allocation2 + $0x1d8] sm:$0xff]  }
 0x143   : > { %542 = vst.msk [vmem:[#allocation2 + $0x154] sm:$0xf] %vm208_vm0, %v524_v13  ;;  %541 = vst.msk [vmem:[#allocation2 + $0x150] sm:$0xf] %vm208_vm0, %v522_v16  ;;  %1815 = vmatprep.subr.bf16.mxu1 %v1911_v17 }
 0x146   : > { %v460_v6 = vpop.permute.xlu1 %459  ;;  %v458_v18 = vpop.permute.xlu0 %457  ;;  %v1912_v20 = vld [vmem:[#allocation2 + $0x198] sm:$0xff]  }
 0x147   : > { %478 = vst.msk [vmem:[#allocation2 + $0x114] sm:$0xf] %vm208_vm0, %v460_v6  ;;  %477 = vst.msk [vmem:[#allocation2 + $0x110] sm:$0xf] %vm208_vm0, %v458_v18  ;;  %1816 = vmatpush3.bf16.msra.mxu1 %v1912_v20 }
 0x14a   : > { %v652_v7 = vpop.permute.xlu1 %651  ;;  %v650_v21 = vpop.permute.xlu0 %649  ;;  %v1913_v14 = vld [vmem:[#allocation2 + $0x150] sm:$0xff]  }
 0x14b   : > { %670 = vst.msk [vmem:[#allocation2 + $0x1d4] sm:$0xf] %vm208_vm0, %v652_v7  ;;  %669 = vst.msk [vmem:[#allocation2 + $0x1d0] sm:$0xf] %vm208_vm0, %v650_v21  ;;  %1789 = vmatprep.subr.bf16.mxu0 %v1913_v14 }
 0x14e   : > { %v588_v15 = vpop.permute.xlu1 %587  ;;  %v586_v19 = vpop.permute.xlu0 %585  ;;  %v1914_v22 = vld [vmem:[#allocation2 + $0x110] sm:$0xff]  }
 0x14f   : > { %606 = vst.msk [vmem:[#allocation2 + $0x194] sm:$0xf] %vm208_vm0, %v588_v15  ;;  %605 = vst.msk [vmem:[#allocation2 + $0x190] sm:$0xf] %vm208_vm0, %v586_v19  ;;  %1790 = vmatpush3.bf16.msra.mxu0 %v1914_v22 }
 0x152   : > { %v520_v23 = vpop.permute.xlu1 %519  ;;  %v518_v24 = vpop.permute.xlu0 %517  ;;  %v1915_v1 = vld [vmem:[#allocation2 + $0x1d0] sm:$0xff]  }
 0x153   : > { %540 = vst.msk [vmem:[#allocation2 + $0x14c] sm:$0xf] %vm208_vm0, %v520_v23  ;;  %539 = vst.msk [vmem:[#allocation2 + $0x148] sm:$0xf] %vm208_vm0, %v518_v24  ;;  %1817 = vmatprep.subr.bf16.mxu1 %v1915_v1 }
 0x156   : > { %v456_v25 = vpop.permute.xlu1 %455  ;;  %v454_v26 = vpop.permute.xlu0 %453  ;;  %v1916_v0 = vld [vmem:[#allocation2 + $0x190] sm:$0xff]  }
 0x157   : > { %476 = vst.msk [vmem:[#allocation2 + $0x10c] sm:$0xf] %vm208_vm0, %v456_v25  ;;  %475 = vst.msk [vmem:[#allocation2 + $0x108] sm:$0xf] %vm208_vm0, %v454_v26  ;;  %1818 = vmatpush3.bf16.msra.mxu1 %v1916_v0 }
 0x15a   : > { %v648_v27 = vpop.permute.xlu1 %647  ;;  %v646_v28 = vpop.permute.xlu0 %645  ;;  %v1917_v29 = vld [vmem:[#allocation2 + $0x148] sm:$0xff]  }
 0x15b   : > { %668 = vst.msk [vmem:[#allocation2 + $0x1cc] sm:$0xf] %vm208_vm0, %v648_v27  ;;  %667 = vst.msk [vmem:[#allocation2 + $0x1c8] sm:$0xf] %vm208_vm0, %v646_v28  ;;  %1791 = vmatprep.subr.bf16.mxu0 %v1917_v29 }
 0x15e   : > { %v584_v30 = vpop.permute.xlu1 %583  ;;  %v582_v31 = vpop.permute.xlu0 %581  ;;  %v1918_v32 = vld [vmem:[#allocation2 + $0x108] sm:$0xff]  }
 0x15f   : > { %604 = vst.msk [vmem:[#allocation2 + $0x18c] sm:$0xf] %vm208_vm0, %v584_v30  ;;  %603 = vst.msk [vmem:[#allocation2 + $0x188] sm:$0xf] %vm208_vm0, %v582_v31  ;;  %1792 = vmatpush3.bf16.msra.mxu0 %v1918_v32  ;;  %v1538_v32 = vstv %s1533_s27 }
 0x162   : > { %v516_v33 = vpop.permute.xlu1 %515  ;;  %v514_v34 = vpop.permute.xlu0 %513  ;;  %v1919_v35 = vld [vmem:[#allocation2 + $0x1c8] sm:$0xff]  }
 0x163   : > { %538 = vst.msk [vmem:[#allocation2 + $0x144] sm:$0xf] %vm208_vm0, %v516_v33  ;;  %537 = vst.msk [vmem:[#allocation2 + $0x140] sm:$0xf] %vm208_vm0, %v514_v34  ;;  %1819 = vmatprep.subr.bf16.mxu1 %v1919_v35 }
 0x166   : > { %v452_v36 = vpop.permute.xlu1 %451  ;;  %v450_v2 = vpop.permute.xlu0 %449  ;;  %v1920_v37 = vld [vmem:[#allocation2 + $0x188] sm:$0xff]  }
 0x167   : > { %474 = vst.msk [vmem:[#allocation2 + $0x104] sm:$0xf] %vm208_vm0, %v452_v36  ;;  %473 = vst.msk [vmem:[#allocation2 + $0x100] sm:$0xf] %vm208_vm0, %v450_v2  ;;  %1820 = vmatpush3.bf16.msra.mxu1 %v1920_v37 }
 0x16a   : > { %v644_v38 = vpop.permute.xlu1 %643  ;;  %v642_v3 = vpop.permute.xlu0 %641  ;;  %v1921_v39 = vld [vmem:[#allocation2 + $0x140] sm:$0xff]  }
 0x16b   : > { %666 = vst.msk [vmem:[#allocation2 + $0x1c4] sm:$0xf] %vm208_vm0, %v644_v38  ;;  %665 = vst.msk [vmem:[#allocation2 + $0x1c0] sm:$0xf] %vm208_vm0, %v642_v3  ;;  %1793 = vmatprep.subr.bf16.mxu0 %v1921_v39 }
 0x16e   : > { %v580_v42 = vpop.permute.xlu1 %579  ;;  %v578_v43 = vpop.permute.xlu0 %577  ;;  %v1922_v44 = vld [vmem:[#allocation2 + $0x100] sm:$0xff]  }
 0x16f   : > { %602 = vst.msk [vmem:[#allocation2 + $0x184] sm:$0xf] %vm208_vm0, %v580_v42  ;;  %601 = vst.msk [vmem:[#allocation2 + $0x180] sm:$0xf] %vm208_vm0, %v578_v43  ;;  %1794 = vmatpush3.bf16.msra.mxu0 %v1922_v44 }
 0x172   : > { %v1923_v46 = vld [vmem:[#allocation2 + $0x1c0] sm:$0xff]   ;;  %1468 = vmatmul.mubr.bf16.vlgmr.msra.gmra.mxu0 %v1635_v50 }
 0x173   : > { %1821 = vmatprep.subr.bf16.mxu1 %v1923_v46  ;;  %1475 = vmatprep.mubr.bf16.mxu0 %v1644_v45 }
 0x176   : > { %v1924_v4 = vld [vmem:[#allocation2 + $0x180] sm:$0xff]  }
 0x177   : > { %1822 = vmatpush3.bf16.msra.mxu1 %v1924_v4 }
 0x17a   : > { %1476 = vmatmul.mubr.bf16.gmra.mxu0 %v1643_v51  ;;  %1517 = vmatmul.mubr.bf16.vlgmr.msra.gmra.mxu1 %v1637_v10 }
 0x17b   : > { %1524 = vmatprep.mubr.bf16.mxu1 %v1646_v52  ;;  %v856_v9 = vpop.permute.xlu0 %855  ;;  %v861_v18 = vpop.permute.xlu1 %860 }
 0x17f   : > { %v866_v25 = vpop.permute.xlu1 %865  ;;  %v871_v37 = vpop.permute.xlu0 %870 }
 0x182   : > { %1525 = vmatmul.mubr.bf16.gmra.mxu1 %v1645_v5 }
 0x1b5   : > { %v1739_v49 = vpop.f32.mrf.mxu0 }
 0x1b7   : > { %v1740_v50 = vpop.f32.mrf.mxu0 }
 0x1b8   : > { %v1741_v8 = vadd.f32 %v1740_v50, %v1739_v49 }
 0x1b9   : > { %v1742_v53 = vpop.f32.mrf.mxu0 }
 0x1ba   : > { %v1767_v54 = vpop.f32.mrf.mxu1  ;;  %v1372_v20 = vadd.f32 %v1741_v8, %v856_v9 }
 0x1bb   : > { %v1743_v55 = vpop.f32.mrf.mxu0 }
 0x1bc   : > { %v1768_v56 = vpop.f32.mrf.mxu1  ;;  %v1744_v6 = vadd.f32 %v1743_v55, %v1742_v53 }
 0x1bd   : > { %v1745_v57 = vpop.f32.mrf.mxu0  ;;  %v1769_v17 = vadd.f32 %v1768_v56, %v1767_v54 }
 0x1be   : > { %v1770_v58 = vpop.f32.mrf.mxu1  ;;  %v1375_v23 = vadd.f32 %v1744_v6, %v861_v18 }
 0x1bf   : > { %v1746_v59 = vpop.f32.mrf.mxu0  ;;  %v1421_v1 = vadd.f32 %v1769_v17, %v1372_v20 }
 0x1c0   : > { %v1771_v11 = vpop.f32.mrf.mxu1  ;;  %v1747_v15 = vadd.f32 %v1746_v59, %v1745_v57 }
 0x1c1   : > { %v1748_v60 = vpop.f32.mrf.mxu0  ;;  %v1772_v24 = vadd.f32 %v1771_v11, %v1770_v58 }
 0x1c2   : > { %v1773_v61 = vpop.f32.mrf.mxu1  ;;  %v1380_v31 = vadd.f32 %v1747_v15, %v866_v25 }
 0x1c3   : > { %v1749_v62 = vpop.f32.mrf.mxu0  ;;  %v1424_v35 = vadd.f32 %v1772_v24, %v1375_v23 }
 0x1c4   : > { %v1774_v63 = vpop.f32.mrf.mxu1  ;;  %v1750_v36 = vadd.f32 %v1749_v62, %v1748_v60 }
 0x1c5   : > { %v1775_v30 = vadd.f32 %v1774_v63, %v1773_v61 }
 0x1c6   : > { %v1776_v10 = vpop.f32.mrf.mxu1  ;;  %v1383_v46 = vadd.f32 %v1750_v36, %v871_v37 }
 0x1c7   : > { %v1429_v42 = vadd.f32 %v1775_v30, %v1380_v31 }
 0x1c8   : > { %v1777_v7 = vpop.f32.mrf.mxu1 }
 0x1c9   : > { %v1778_v45 = vadd.f32 %v1777_v7, %v1776_v10 }
 0x1cb   : > { %v1432_v54 = vadd.f32 %v1778_v45, %v1383_v46 }
 0x232   : > { %v1795_v12 = vpop.f32.mrf.mxu0 }
 0x234   : > { %v1796_v13 = vpop.f32.mrf.mxu0 }
 0x235   : > { %v1797_v14 = vadd.f32 %v1796_v13, %v1795_v12 }
 0x236   : > { %v1798_v16 = vpop.f32.mrf.mxu0 }
 0x237   : > { %v1470_v27 = vadd.f32 %v1797_v14, %v1421_v1 }
 0x238   : > { %v1799_v21 = vpop.f32.mrf.mxu0 }
 0x239   : > { %v1800_v28 = vadd.f32 %v1799_v21, %v1798_v16 }
 0x23a   : > { %v1801_v19 = vpop.f32.mrf.mxu0  ;;  %v1823_v22 = vpop.f32.mrf.mxu1 }
 0x23b   : > { %v1473_v39 = vadd.f32 %v1800_v28, %v1424_v35 }
 0x23c   : > { %v1802_v26 = vpop.f32.mrf.mxu0  ;;  %v1824_v0 = vpop.f32.mrf.mxu1 }
 0x23d   : > { %v1825_v29 = vadd.f32 %v1824_v0, %v1823_v22  ;;  %v1803_v38 = vadd.f32 %v1802_v26, %v1801_v19 }
 0x23e   : > { %v1804_v33 = vpop.f32.mrf.mxu0  ;;  %v1826_v34 = vpop.f32.mrf.mxu1 }
 0x23f   : > { %v1519_v2 = vadd.f32 %v1825_v29, %v1470_v27  ;;  %v1478_v4 = vadd.f32 %v1803_v38, %v1429_v42 }
 0x240   : > { %v1827_v3 = vpop.f32.mrf.mxu1  ;;  %v1805_v43 = vpop.f32.mrf.mxu0 }
 0x241   : > { %vm1534_vm1 = vcmp.gt.f32.partialorder %v1519_v2, 0.0  ;;  %v1539_v40 = vmul.f32 %v1538_v32, %v1519_v2  ;;  %v1828_v41 = vadd.f32 %v1827_v3, %v1826_v34  ;;  %v1806_v5 = vadd.f32 %v1805_v43, %v1804_v33 }
 0x242   : > { %v1829_v44 = vpop.f32.mrf.mxu1 }
 0x243   : > { %v1543_v47 = vsel %vm1534_vm1, %v1519_v2, %v1539_v40  ;;  %v1522_v48 = vadd.f32 %v1828_v41, %v1473_v39  ;;  %v1481_v59 = vadd.f32 %v1806_v5, %v1432_v54 }
 0x244   : > { %v1719_v51 = vpack.c.bf16 %v1543_v47, %v1543_v47  ;;  %v1830_v52 = vpop.f32.mrf.mxu1 }
 0x245   : > { %vm1535_vm2 = vcmp.gt.f32.partialorder %v1522_v48, 0.0  ;;  %v1540_v49 = vmul.f32 %v1538_v32, %v1522_v48  ;;  %v1831_v50 = vadd.f32 %v1830_v52, %v1829_v44 }
 0x246   : > { %1563 = vst.msk [vmem:[%s198_s5] sm:$0xf] %vm208_vm0, %v1719_v51  ;;  %v1832_v53 = vpop.f32.mrf.mxu1 }
 0x247   : > { %v1544_v55 = vsel %vm1535_vm2, %v1522_v48, %v1540_v49  ;;  %v1527_v56 = vadd.f32 %v1831_v50, %v1478_v4 }
 0x248   : > { %v1720_v57 = vpack.c.bf16 %v1544_v55, %v1544_v55  ;;  %v1833_v58 = vpop.f32.mrf.mxu1 }
 0x249   : > { %vm1536_vm3 = vcmp.gt.f32.partialorder %v1527_v56, 0.0  ;;  %v1541_v11 = vmul.f32 %v1538_v32, %v1527_v56  ;;  %v1834_v60 = vadd.f32 %v1833_v58, %v1832_v53 }
 0x24a   : > { %1564 = vst.msk [vmem:[%s198_s5 + $0x4] sm:$0xf] %vm208_vm0, %v1720_v57 }
 0x24b   : > { %v1545_v61 = vsel %vm1536_vm3, %v1527_v56, %v1541_v11  ;;  %v1530_v62 = vadd.f32 %v1834_v60, %v1481_v59 }
 0x24c   : > { %v1721_v63 = vpack.c.bf16 %v1545_v61, %v1545_v61 }
 0x24d   : > { %vm1537_vm4 = vcmp.gt.f32.partialorder %v1530_v62, 0.0  ;;  %v1542_v12 = vmul.f32 %v1538_v32, %v1530_v62 }
 0x24e   : > { %1565 = vst.msk [vmem:[%s198_s5 + $0x8] sm:$0xf] %vm208_vm0, %v1721_v63 }
 0x24f   : > { %v1546_v8 = vsel %vm1537_vm4, %v1530_v62, %v1542_v12 }
 0x250   : > { %v1722_v9 = vpack.c.bf16 %v1546_v8, %v1546_v8 }
 0x252   : > { %1566 = vst.msk [vmem:[%s198_s5 + $0xc] sm:$0xf] %vm208_vm0, %v1722_v9 }
 0x253 PF: > { %s15_s17 = sadd.s32 1, %s1931_s17  }
 0x254   : > { %p12_p4 = scmp.ge.s32.totalorder %s15_s17, 4  }
 0x256   :  { %14 = sbr.rel (!%p12_p4) target bundleno = 2 (0x2), region = 66 }

// kernel: generator_forward.11
= control target key start
LH: loop header
LB: loop body
LE: loop exit
PB: predicated region body
PF: predicated region fallthrough
CT: control target
= control target key end

     0   :  { %s795_s17 = smov 0   ;;  %s834_s0 = inlined_call_operand.vmem [shape: bf16[2,16,143], index: 0, kind: input, shape index: {}]   ;;  %s835_s1 = inlined_call_operand.vmem [shape: bf16[2,256], index: 1, kind: input, shape index: {}]   ;;  %s836_s2 = inlined_call_operand.vmem [shape: f32[2,1], index: 2, kind: input, shape index: {}]   ;;  %s837_s3 = inlined_call_operand.<no memory space> [shape: f32[1], index: 3, kind: input, shape index: {}]   ;;  %s838_s4 = inlined_call_operand.vmem [shape: bf16[2,2,128], index: 4, kind: output, shape index: {}]  }
   0x1   :  { %9 = sst [smem:[#allocation3]] %s837_s3 }
   0x2 LB: > { %s651_s18 = sadd.s32 4294967295, %s748_s17   ;;  %p655_p0 = scmp.ge.s32.totalorder %s748_s17, 1  ;;  %s748_s17 = sphi %s795_s17, %s15_s17  }
   0x3   : > { %p163_p1 = scmp.lt.s32.totalorder %s748_s17, 3 }
   0x5   : > { %p164_p2 = pnand %p655_p0, %p163_p1 }
   0x6   : > { %p187_p3 = scmp.lt.s32.totalorder (!%p164_p2), %s651_s18, 1  ;;  %s750_s22 = smov (!%p164_p2), 121  }
   0x7   : > { %167 = sbr.rel (%p164_p2) target bundleno = 407 (0x197), region = 36  ;;  %s751_s23 = smov (!%p164_p2), 113  }
   0x8   : > { %s752_s24 = smov (!%p164_p2), 114   ;;  %s753_s25 = smov (!%p164_p2), 122  }
   0x9   : > { %s754_s26 = smov (!%p164_p2), 115   ;;  %s755_s27 = smov (!%p164_p2), 123  }
   0xa   : > { %s756_s28 = smov (!%p164_p2), 116   ;;  %s757_s29 = smov (!%p164_p2), 124  }
   0xb   : > { %s758_s30 = smov (!%p164_p2), 117   ;;  %s759_s5 = smov (!%p164_p2), 125  }
   0xc   : > { %s840_s18 = smov (!%p187_p3, %s651_s18), 1  ;;  %s760_s6 = smov 118   ;;  %v763_v2 = vmov 1966171168   ;;  %v448_v4 = vlaneseq  ;;  %v430_v12 = vld [vmem:[%s836_s2] sm:$0x3] }
   0xd   : > { %s677_s3 = sshll.u32 %s840_s18, 4  ;;  %s761_s7 = smov 126   ;;  %v446_v3 = vunpack.c.l.s4 %v763_v2  ;;  %v812_v7 = vld.sshfl [vmem:[%s835_s1] sm:$0x11 pattern:$0x75316420] }
   0xe   : > { %s191_s21 = scalar_lea.vmem %s834_s0, %s677_s3  ;;  %s762_s8 = smov 119   ;;  %v449_v6 = vshrl.u32 %v448_v4, 7  ;;  %v444_v8 = vcombine.high %v812_v7, %v812_v7  ;;  %v766_v13 = vmov 0   ;;  %vm286_vm0 = vcmask 990208  }
   0xf   : > { %v196_v0 = vld [vmem:[%s191_s21] sm:$0xff]  ;;  %v197_v1 = vld [vmem:[%s191_s21 + $0x8] sm:$0xff]  ;;  %s764_s9 = smov 127   ;;  %v447_v5 = vunpack.c.0.s8 %v446_v3  ;;  %s765_s12 = smov 120   ;;  %725 = vset.pattern.permute.xlu0 %v766_v13  ;;  %vm390_vm1 = vcmask 924672   ;;  %vm377_vm2 = vcmask 932864  }
  0x10   : > { %280 = vrot.lane.b32.xlu1 %v196_v0, %s750_s22  ;;  %198 = vst [vmem:[#allocation2] sm:$0xf] %v196_v0  ;;  %384 = vrot.lane.b32.xlu0 %v196_v0, %s751_s23  ;;  %199 = vst [vmem:[#allocation2 + $0x4] sm:$0xf] %v197_v1  ;;  %vm273_vm3 = vcmask 998400   ;;  %vm364_vm4 = vcmask 941056   ;;  %s194_s19 = scalar_lea.vmem %s838_s4, %s840_s18 }
  0x11   : > { %v816_v9 = vsub.s32 %v447_v5, %v449_v6  ;;  %vm260_vm5 = vcmask 1006592   ;;  %vm351_vm6 = vcmask 949248   ;;  %vm247_vm7 = vcmask 1014784   ;;  %s597_s15 = sld [smem:[#allocation3]] }
  0x12   : > { %vm338_vm8 = vcmask 957440   ;;  %vm234_vm9 = vcmask 1022976   ;;  %vm325_vm10 = vcmask 965632   ;;  %vm221_vm11 = vcmask 1031168  }
  0x13   : > { %v458_v10 = vrot.slane %v444_v8, %v816_v9  ;;  %v451_v11 = vrot.slane %v812_v7, %v816_v9  ;;  %vm312_vm12 = vcmask 973824   ;;  %vm208_vm13 = vcmask 1039360  }
  0x14   : > { %282 = vrot.lane.b32.xlu1 %v197_v1, %s750_s22  ;;  %386 = vrot.lane.b32.xlu0 %v197_v1, %s751_s23  ;;  %vm299_vm14 = vcmask 982016  }
  0x15   : > { %589 = vmatprep.mubr.bf16.mxu0 %v458_v10 }
  0x18   : > { %373 = vrot.lane.b32.xlu1 %v197_v1, %s752_s24  ;;  %371 = vrot.lane.b32.xlu0 %v196_v0, %s752_s24 }
  0x1c   : > { %269 = vrot.lane.b32.xlu1 %v197_v1, %s753_s25  ;;  %267 = vrot.lane.b32.xlu0 %v196_v0, %s753_s25 }
  0x20   : > { %360 = vrot.lane.b32.xlu1 %v197_v1, %s754_s26  ;;  %358 = vrot.lane.b32.xlu0 %v196_v0, %s754_s26 }
  0x24   : > { %256 = vrot.lane.b32.xlu1 %v197_v1, %s755_s27  ;;  %254 = vrot.lane.b32.xlu0 %v196_v0, %s755_s27 }
  0x28   : > { %347 = vrot.lane.b32.xlu1 %v197_v1, %s756_s28  ;;  %345 = vrot.lane.b32.xlu0 %v196_v0, %s756_s28 }
  0x2c   : > { %243 = vrot.lane.b32.xlu1 %v197_v1, %s757_s29  ;;  %241 = vrot.lane.b32.xlu0 %v196_v0, %s757_s29 }
  0x30   : > { %334 = vrot.lane.b32.xlu1 %v197_v1, %s758_s30  ;;  %332 = vrot.lane.b32.xlu0 %v196_v0, %s758_s30 }
  0x34   : > { %230 = vrot.lane.b32.xlu1 %v197_v1, %s759_s5  ;;  %228 = vrot.lane.b32.xlu0 %v196_v0, %s759_s5 }
  0x38   : > { %321 = vrot.lane.b32.xlu1 %v197_v1, %s760_s6  ;;  %319 = vrot.lane.b32.xlu0 %v196_v0, %s760_s6 }
  0x3c   : > { %217 = vrot.lane.b32.xlu1 %v197_v1, %s761_s7  ;;  %215 = vrot.lane.b32.xlu0 %v196_v0, %s761_s7 }
  0x40   : > { %308 = vrot.lane.b32.xlu1 %v197_v1, %s762_s8  ;;  %306 = vrot.lane.b32.xlu0 %v196_v0, %s762_s8 }
  0x44   : > { %204 = vrot.lane.b32.xlu1 %v197_v1, %s764_s9  ;;  %202 = vrot.lane.b32.xlu0 %v196_v0, %s764_s9 }
  0x48   : > { %295 = vrot.lane.b32.xlu1 %v197_v1, %s765_s12  ;;  %293 = vrot.lane.b32.xlu0 %v196_v0, %s765_s12 }
  0x4c   : > { %433 = vperm.xlu0 %725, %v430_v12  }
  0x82   : > { %v281_v14 = vpop.permute.xlu1 %280  ;;  %v385_v15 = vpop.permute.xlu0 %384 }
  0x83   : > { %v284_v16 = vrot.slane %v281_v14, 4  ;;  %v388_v17 = vrot.slane %v385_v15, 4 }
  0x85   : > { %v287_v18 = vsel %vm286_vm0, %v281_v14, %v284_v16  ;;  %v391_v19 = vsel %vm390_vm1, %v385_v15, %v388_v17 }
  0x86   : > { %291 = vst [vmem:[#allocation2 + $0x38] sm:$0xf] %v287_v18  ;;  %395 = vst [vmem:[#allocation2 + $0x78] sm:$0xf] %v391_v19  ;;  %v283_v20 = vpop.permute.xlu1 %282  ;;  %v387_v21 = vpop.permute.xlu0 %386 }
  0x87   : > { %v285_v22 = vrot.slane %v283_v20, 4  ;;  %v389_v23 = vrot.slane %v387_v21, 4 }
  0x89   : > { %v288_v24 = vsel %vm286_vm0, %v283_v20, %v285_v22  ;;  %v392_v25 = vsel %vm390_vm1, %v387_v21, %v389_v23 }
  0x8a   : > { %292 = vst [vmem:[#allocation2 + $0x3c] sm:$0xf] %v288_v24  ;;  %396 = vst [vmem:[#allocation2 + $0x7c] sm:$0xf] %v392_v25  ;;  %v374_v26 = vpop.permute.xlu1 %373  ;;  %v372_v27 = vpop.permute.xlu0 %371 }
  0x8b   : > { %v376_v28 = vrot.slane %v374_v26, 4  ;;  %v375_v29 = vrot.slane %v372_v27, 4 }
  0x8d   : > { %v379_v30 = vsel %vm377_vm2, %v374_v26, %v376_v28  ;;  %v378_v31 = vsel %vm377_vm2, %v372_v27, %v375_v29 }
  0x8e   : > { %383 = vst [vmem:[#allocation2 + $0x74] sm:$0xf] %v379_v30  ;;  %382 = vst [vmem:[#allocation2 + $0x70] sm:$0xf] %v378_v31  ;;  %v270_v32 = vpop.permute.xlu1 %269  ;;  %v268_v33 = vpop.permute.xlu0 %267 }
  0x8f   : > { %v272_v34 = vrot.slane %v270_v32, 4  ;;  %v271_v35 = vrot.slane %v268_v33, 4 }
  0x91   : > { %v275_v36 = vsel %vm273_vm3, %v270_v32, %v272_v34  ;;  %v274_v37 = vsel %vm273_vm3, %v268_v33, %v271_v35  ;;  %v726_v38 = vld [vmem:[#allocation2 + $0x78] sm:$0xff]  }
  0x92   : > { %279 = vst [vmem:[#allocation2 + $0x34] sm:$0xf] %v275_v36  ;;  %278 = vst [vmem:[#allocation2 + $0x30] sm:$0xf] %v274_v37  ;;  %v361_v39 = vpop.permute.xlu1 %360  ;;  %v359_v40 = vpop.permute.xlu0 %358  ;;  %v727_v41 = vld [vmem:[#allocation2 + $0x38] sm:$0xff]   ;;  %678 = vmatprep.subr.bf16.mxu0 %v726_v38 }
  0x93   : > { %v363_v42 = vrot.slane %v361_v39, 4  ;;  %v362_v43 = vrot.slane %v359_v40, 4  ;;  %679 = vmatpush3.bf16.msra.mxu0 %v727_v41 }
  0x95   : > { %v366_v44 = vsel %vm364_vm4, %v361_v39, %v363_v42  ;;  %v365_v45 = vsel %vm364_vm4, %v359_v40, %v362_v43  ;;  %v728_v46 = vld [vmem:[#allocation2 + $0x70] sm:$0xff]  }
  0x96   : > { %370 = vst [vmem:[#allocation2 + $0x6c] sm:$0xf] %v366_v44  ;;  %369 = vst [vmem:[#allocation2 + $0x68] sm:$0xf] %v365_v45  ;;  %v257_v47 = vpop.permute.xlu1 %256  ;;  %v255_v48 = vpop.permute.xlu0 %254  ;;  %680 = vmatprep.subr.bf16.mxu0 %v728_v46 }
  0x97   : > { %v259_v49 = vrot.slane %v257_v47, 4  ;;  %v258_v50 = vrot.slane %v255_v48, 4 }
  0x99   : > { %v262_v51 = vsel %vm260_vm5, %v257_v47, %v259_v49  ;;  %v261_v52 = vsel %vm260_vm5, %v255_v48, %v258_v50  ;;  %v729_v53 = vld [vmem:[#allocation2 + $0x30] sm:$0xff]  }
  0x9a   : > { %266 = vst [vmem:[#allocation2 + $0x2c] sm:$0xf] %v262_v51  ;;  %265 = vst [vmem:[#allocation2 + $0x28] sm:$0xf] %v261_v52  ;;  %v348_v54 = vpop.permute.xlu1 %347  ;;  %v346_v55 = vpop.permute.xlu0 %345  ;;  %681 = vmatpush3.bf16.msra.mxu0 %v729_v53 }
  0x9b   : > { %v350_v56 = vrot.slane %v348_v54, 4  ;;  %v349_v57 = vrot.slane %v346_v55, 4 }
  0x9d   : > { %v353_v58 = vsel %vm351_vm6, %v348_v54, %v350_v56  ;;  %v352_v59 = vsel %vm351_vm6, %v346_v55, %v349_v57  ;;  %v730_v60 = vld [vmem:[#allocation2 + $0x68] sm:$0xff]   ;;  %v741_v57 = vld [vmem:[#allocation2] sm:$0xff]  }
  0x9e   : > { %357 = vst [vmem:[#allocation2 + $0x64] sm:$0xf] %v353_v58  ;;  %356 = vst [vmem:[#allocation2 + $0x60] sm:$0xf] %v352_v59  ;;  %v244_v61 = vpop.permute.xlu1 %243  ;;  %v242_v62 = vpop.permute.xlu0 %241  ;;  %682 = vmatprep.subr.bf16.mxu0 %v730_v60 }
  0x9f   : > { %v246_v63 = vrot.slane %v244_v61, 4  ;;  %v245_v0 = vrot.slane %v242_v62, 4 }
  0xa1   : > { %v249_v1 = vsel %vm247_vm7, %v244_v61, %v246_v63  ;;  %v248_v2 = vsel %vm247_vm7, %v242_v62, %v245_v0  ;;  %v731_v3 = vld [vmem:[#allocation2 + $0x28] sm:$0xff]   ;;  %v599_v63 = vstv %s597_s15 }
  0xa2   : > { %253 = vst [vmem:[#allocation2 + $0x24] sm:$0xf] %v249_v1  ;;  %252 = vst [vmem:[#allocation2 + $0x20] sm:$0xf] %v248_v2  ;;  %v335_v4 = vpop.permute.xlu1 %334  ;;  %v333_v5 = vpop.permute.xlu0 %332  ;;  %683 = vmatpush3.bf16.msra.mxu0 %v731_v3 }
  0xa3   : > { %v337_v6 = vrot.slane %v335_v4, 4  ;;  %v336_v8 = vrot.slane %v333_v5, 4 }
  0xa5   : > { %v340_v10 = vsel %vm338_vm8, %v335_v4, %v337_v6  ;;  %v339_v12 = vsel %vm338_vm8, %v333_v5, %v336_v8  ;;  %v732_v13 = vld [vmem:[#allocation2 + $0x60] sm:$0xff]  }
  0xa6   : > { %344 = vst [vmem:[#allocation2 + $0x5c] sm:$0xf] %v340_v10  ;;  %343 = vst [vmem:[#allocation2 + $0x58] sm:$0xf] %v339_v12  ;;  %v231_v14 = vpop.permute.xlu1 %230  ;;  %v229_v15 = vpop.permute.xlu0 %228  ;;  %684 = vmatprep.subr.bf16.mxu0 %v732_v13 }
  0xa7   : > { %v233_v16 = vrot.slane %v231_v14, 4  ;;  %v232_v17 = vrot.slane %v229_v15, 4 }
  0xa9   : > { %v236_v18 = vsel %vm234_vm9, %v231_v14, %v233_v16  ;;  %v235_v19 = vsel %vm234_vm9, %v229_v15, %v232_v17  ;;  %v733_v20 = vld [vmem:[#allocation2 + $0x20] sm:$0xff]  }
  0xaa   : > { %240 = vst [vmem:[#allocation2 + $0x1c] sm:$0xf] %v236_v18  ;;  %239 = vst [vmem:[#allocation2 + $0x18] sm:$0xf] %v235_v19  ;;  %v322_v21 = vpop.permute.xlu1 %321  ;;  %v320_v22 = vpop.permute.xlu0 %319  ;;  %685 = vmatpush3.bf16.msra.mxu0 %v733_v20 }
  0xab   : > { %v324_v23 = vrot.slane %v322_v21, 4  ;;  %v323_v24 = vrot.slane %v320_v22, 4 }
  0xad   : > { %v327_v25 = vsel %vm325_vm10, %v322_v21, %v324_v23  ;;  %v326_v26 = vsel %vm325_vm10, %v320_v22, %v323_v24  ;;  %v734_v27 = vld [vmem:[#allocation2 + $0x58] sm:$0xff]  }
  0xae   : > { %331 = vst [vmem:[#allocation2 + $0x54] sm:$0xf] %v327_v25  ;;  %330 = vst [vmem:[#allocation2 + $0x50] sm:$0xf] %v326_v26  ;;  %v218_v28 = vpop.permute.xlu1 %217  ;;  %v216_v29 = vpop.permute.xlu0 %215  ;;  %686 = vmatprep.subr.bf16.mxu0 %v734_v27 }
  0xaf   : > { %v220_v30 = vrot.slane %v218_v28, 4  ;;  %v219_v31 = vrot.slane %v216_v29, 4 }
  0xb1   : > { %v223_v32 = vsel %vm221_vm11, %v218_v28, %v220_v30  ;;  %v222_v33 = vsel %vm221_vm11, %v216_v29, %v219_v31  ;;  %v735_v34 = vld [vmem:[#allocation2 + $0x18] sm:$0xff]  }
  0xb2   : > { %227 = vst [vmem:[#allocation2 + $0x14] sm:$0xf] %v223_v32  ;;  %226 = vst [vmem:[#allocation2 + $0x10] sm:$0xf] %v222_v33  ;;  %v309_v35 = vpop.permute.xlu1 %308  ;;  %v307_v36 = vpop.permute.xlu0 %306  ;;  %687 = vmatpush3.bf16.msra.mxu0 %v735_v34 }
  0xb3   : > { %v311_v37 = vrot.slane %v309_v35, 4  ;;  %v310_v38 = vrot.slane %v307_v36, 4 }
  0xb5   : > { %v314_v39 = vsel %vm312_vm12, %v309_v35, %v311_v37  ;;  %v313_v40 = vsel %vm312_vm12, %v307_v36, %v310_v38  ;;  %v736_v41 = vld [vmem:[#allocation2 + $0x50] sm:$0xff]  }
  0xb6   : > { %318 = vst [vmem:[#allocation2 + $0x4c] sm:$0xf] %v314_v39  ;;  %317 = vst [vmem:[#allocation2 + $0x48] sm:$0xf] %v313_v40  ;;  %v205_v42 = vpop.permute.xlu1 %204  ;;  %v203_v43 = vpop.permute.xlu0 %202  ;;  %688 = vmatprep.subr.bf16.mxu0 %v736_v41 }
  0xb7   : > { %v207_v44 = vrot.slane %v205_v42, 4  ;;  %v206_v45 = vrot.slane %v203_v43, 4 }
  0xb9   : > { %v210_v46 = vsel %vm208_vm13, %v205_v42, %v207_v44  ;;  %v209_v47 = vsel %vm208_vm13, %v203_v43, %v206_v45  ;;  %v737_v48 = vld [vmem:[#allocation2 + $0x10] sm:$0xff]  }
  0xba   : > { %214 = vst [vmem:[#allocation2 + $0xc] sm:$0xf] %v210_v46  ;;  %213 = vst [vmem:[#allocation2 + $0x8] sm:$0xf] %v209_v47  ;;  %v296_v49 = vpop.permute.xlu1 %295  ;;  %v294_v50 = vpop.permute.xlu0 %293  ;;  %689 = vmatpush3.bf16.msra.mxu0 %v737_v48 }
  0xbb   : > { %v298_v51 = vrot.slane %v296_v49, 4  ;;  %v297_v52 = vrot.slane %v294_v50, 4 }
  0xbd   : > { %v301_v53 = vsel %vm299_vm14, %v296_v49, %v298_v51  ;;  %v300_v54 = vsel %vm299_vm14, %v294_v50, %v297_v52  ;;  %v738_v55 = vld [vmem:[#allocation2 + $0x48] sm:$0xff]  }
  0xbe   : > { %305 = vst [vmem:[#allocation2 + $0x44] sm:$0xf] %v301_v53  ;;  %304 = vst [vmem:[#allocation2 + $0x40] sm:$0xf] %v300_v54  ;;  %690 = vmatprep.subr.bf16.mxu0 %v738_v55 }
  0xc1   : > { %v739_v56 = vld [vmem:[#allocation2 + $0x8] sm:$0xff]  }
  0xc2   : > { %691 = vmatpush3.bf16.msra.mxu0 %v739_v56 }
  0xc5   : > { %v740_v58 = vld [vmem:[#allocation2 + $0x40] sm:$0xff]  }
  0xc6   : > { %692 = vmatprep.subr.bf16.mxu0 %v740_v58 }
  0xc7   : > { %693 = vmatpush3.bf16.msra.mxu0 %v741_v57  ;;  %v434_v61 = vpop.permute.xlu0 %433 }
  0xca   : > { %590 = vmatmul.mubr.bf16.vlgmr.msra.gmra.mxu0 %v451_v11 }
 0x18a   : > { %v694_v59 = vpop.f32.mrf.mxu0 }
 0x18c   : > { %v695_v60 = vpop.f32.mrf.mxu0 }
 0x18d   : > { %v696_v62 = vadd.f32 %v695_v60, %v694_v59 }
 0x18e   : > { %v697_v0 = vpop.f32.mrf.mxu0 }
 0x18f   : > { %v592_v1 = vadd.f32 %v696_v62, %v434_v61 }
 0x190   : > { %v698_v2 = vpop.f32.mrf.mxu0 }
 0x191   : > { %vm598_vm15 = vcmp.gt.f32.partialorder %v592_v1, 0.0  ;;  %v600_v3 = vmul.f32 %v599_v63, %v592_v1 }
 0x193   : > { %v601_v4 = vsel %vm598_vm15, %v592_v1, %v600_v3 }
 0x194   : > { %v602_v5 = vpack.c.bf16 %v601_v4, %v601_v4 }
 0x196   : > { %603 = vst [vmem:[%s194_s19] sm:$0x1] %v602_v5 }
 0x197 PF: > { %s15_s17 = sadd.s32 1, %s748_s17  }
 0x198   : > { %p12_p4 = scmp.ge.s32.totalorder %s15_s17, 4  }
 0x19a   :  { %14 = sbr.rel (!%p12_p4) target bundleno = 2 (0x2), region = 66 }

</bundles_post_ra>
